<compile_context>
chip_gen: v5e
topology: v5e:2x2
jax: 0.10.0
libtpu: 0.0.40
codegen_flags: <defaults>
</compile_context>

<pallas_src>
import functools

import numpy as np
import jax
import jax.numpy as jnp
from jax import lax
from jax.experimental import pallas as pl
from jax.experimental.pallas import tpu as pltpu


def _axis_weights(start, bin_size, n_bins, sampling_ratio, size):
    """Per-ROI, per-axis pooled bilinear weights (wrapper-side, plain XLA).

    start, bin_size: (R,) f32.  Returns (R, n_bins, size) f32 W such that
    sum_k W[r, p, k] * line[k] equals the mean over the bin's `sampling_ratio`
    sub-samples of roi_align_forward_cuda's 1-D bilinear interpolation:
      coord outside [-1, size] -> 0;  coord clamped to [0, size-1];
      low = floor(coord), high = low + 1 (weight on `high` vanishes at the edge).
    """
    p = jnp.arange(n_bins, dtype=jnp.float32)[None, :, None]      # (1, n_bins, 1)
    pos = jnp.arange(size, dtype=jnp.float32)[None, None, :]      # (1, 1, size)
    start = start[:, None, None]
    bin_size = bin_size[:, None, None]
    acc = jnp.zeros((start.shape[0], n_bins, size), jnp.float32)
    for s in range(sampling_ratio):
        coord = start + bin_size * (p + (s + 0.5) / sampling_ratio)  # (R, n_bins, 1)
        valid = jnp.logical_and(coord >= -1.0, coord <= float(size))
        c = jnp.clip(coord, 0.0, float(size - 1))
        low = jnp.floor(c)
        frac = c - low
        w = (jnp.where(pos == low, 1.0 - frac, 0.0)
             + jnp.where(pos == low + 1.0, frac, 0.0))
        acc = acc + jnp.where(valid, w, 0.0)
    return acc * (1.0 / sampling_ratio)


def _roi_align_kernel(bidx_ref, feat_ref, wc_ref, out_ref, *, rois_per_step):
    # bidx_ref: SMEM (R_pad,)           int32 -- batch index per ROI (clamped)
    # feat_ref: VMEM (B, C, H*W)        f32   -- whole feature map, resident
    # wc_ref:   VMEM (nb, H*W, AH*AW)   f32   -- per-step combined pooling weights
    # out_ref:  VMEM (nb, C, AH*AW)     f32
    step = pl.program_id(0)

    def body(i, carry):
        r = step * rois_per_step + i
        b = bidx_ref[r]
        feat = feat_ref[b]                      # (C, H*W)
        w = wc_ref[i]                           # (H*W, AH*AW)
        out_ref[i] = jnp.dot(
            feat, w,
            preferred_element_type=jnp.float32,
            precision=jax.lax.Precision.HIGHEST,
        ).astype(out_ref.dtype)
        return carry

    lax.fori_loop(0, rois_per_step, body, 0, unroll=True)


def roi_align(features, rois, aligned_height, aligned_width, spatial_scale,
              sampling_ratio, *, rois_per_step=8):
    """Pallas TPU forward of RoIAlign.

    features: (B, C, H, W) float32
    rois:     (R, 5) float32, rows = [batch_idx, x1, y1, x2, y2] (image coords)
    returns:  (R, C, aligned_height, aligned_width) float32
    """
    if int(sampling_ratio) < 1:
        raise NotImplementedError("only static sampling_ratio >= 1 is supported")

    features = features.astype(jnp.float32)
    rois = rois.astype(jnp.float32)
    B, C, H, W = features.shape
    R = rois.shape[0]
    AH, AW = int(aligned_height), int(aligned_width)
    sr = int(sampling_ratio)
    ss = float(spatial_scale)
    HW = H * W
    AHW = AH * AW

    nb = max(1, min(int(rois_per_step), R))
    r_pad = ((R + nb - 1) // nb) * nb
    rois_p = jnp.pad(rois, ((0, r_pad - R), (0, 0)))

    # O(R) scalar / small-tensor prep (no extra HBM pass over the feature map).
    batch_idx = jnp.clip(rois_p[:, 0].astype(jnp.int32), 0, B - 1)
    x1 = rois_p[:, 1] * ss
    y1 = rois_p[:, 2] * ss
    x2 = rois_p[:, 3] * ss
    y2 = rois_p[:, 4] * ss
    roi_w = jnp.maximum(x2 - x1, 1.0)
    roi_h = jnp.maximum(y2 - y1, 1.0)

    wy = _axis_weights(y1, roi_h / AH, AH, sr, H)   # (r_pad, AH, H)
    wx = _axis_weights(x1, roi_w / AW, AW, sr, W)   # (r_pad, AW, W)
    # Combined pooling weights: Wc[r, h*W+w, p*AW+q] = wy[r,p,h] * wx[r,q,w]
    wc = jnp.einsum('rph,rqw->rhwpq', wy, wx).reshape(r_pad, HW, AHW)

    feats_flat = features.reshape(B, C, HW)         # free contiguous reshape

    kernel = functools.partial(_roi_align_kernel, rois_per_step=nb)

    def _ru(x, m):
        return ((x + m - 1) // m) * m

    feat_vmem = B * _ru(C, 8) * _ru(HW, 128) * 4
    wc_vmem = nb * _ru(HW, 8) * _ru(AHW, 128) * 4
    out_vmem = nb * _ru(C, 8) * _ru(AHW, 128) * 4
    vmem_limit = int(feat_vmem + 2 * (wc_vmem + out_vmem) + (8 << 20))
    vmem_limit = max(min(vmem_limit, 100 << 20), 16 << 20)

    out = pl.pallas_call(
        kernel,
        out_shape=jax.ShapeDtypeStruct((r_pad, C, AHW), jnp.float32),
        grid=(r_pad // nb,),
        in_specs=[
            pl.BlockSpec(memory_space=pltpu.MemorySpace.SMEM),     # batch indices
            pl.BlockSpec((B, C, HW), lambda r: (0, 0, 0)),         # resident features
            pl.BlockSpec((nb, HW, AHW), lambda r: (r, 0, 0)),      # per-step weights
        ],
        out_specs=pl.BlockSpec((nb, C, AHW), lambda r: (r, 0, 0)),
        compiler_params=pltpu.CompilerParams(
            dimension_semantics=("arbitrary",),
            vmem_limit_bytes=vmem_limit),
    )(batch_idx, feats_flat, wc)

    return out[:R].reshape(R, C, AH, AW)


def roi_align_reference(features, rois, aligned_height, aligned_width,
                        spatial_scale, sampling_ratio):
    """Pure-JAX gather-based reference for the roi_align_forward_cuda semantics."""
    B, C, H, W = features.shape
    AH, AW, sr = int(aligned_height), int(aligned_width), int(sampling_ratio)
    ss = float(spatial_scale)

    def one_roi(roi):
        b = roi[0].astype(jnp.int32)
        fmap = jnp.take(features, b, axis=0)              # (C, H, W)
        x1, y1 = roi[1] * ss, roi[2] * ss
        x2, y2 = roi[3] * ss, roi[4] * ss
        roi_w = jnp.maximum(x2 - x1, 1.0)
        roi_h = jnp.maximum(y2 - y1, 1.0)
        bin_h = roi_h / AH
        bin_w = roi_w / AW

        def sample_coords(start, bin_size, n_bins):
            p = jnp.arange(n_bins, dtype=jnp.float32)[:, None]
            s = jnp.arange(sr, dtype=jnp.float32)[None, :]
            return (start + bin_size * (p + (s + 0.5) / sr)).reshape(-1)

        ys = sample_coords(y1, bin_h, AH)                 # (AH*sr,)
        xs = sample_coords(x1, bin_w, AW)                 # (AW*sr,)

        y_ok = (ys >= -1.0) & (ys <= H)
        x_ok = (xs >= -1.0) & (xs <= W)
        yc = jnp.clip(ys, 0.0, H - 1.0)
        xc = jnp.clip(xs, 0.0, W - 1.0)
        y0 = jnp.floor(yc); x0 = jnp.floor(xc)
        ly = yc - y0;       lx = xc - x0
        y0i = y0.astype(jnp.int32); x0i = x0.astype(jnp.int32)
        y1i = jnp.minimum(y0i + 1, H - 1)
        x1i = jnp.minimum(x0i + 1, W - 1)

        fy0 = fmap[:, y0i, :]; fy1 = fmap[:, y1i, :]      # (C, AH*sr, W)
        v00 = fy0[:, :, x0i]; v01 = fy0[:, :, x1i]        # (C, AH*sr, AW*sr)
        v10 = fy1[:, :, x0i]; v11 = fy1[:, :, x1i]
        wy1_ = ly[None, :, None]; wy0_ = 1.0 - wy1_
        wx1_ = lx[None, None, :]; wx0_ = 1.0 - wx1_
        vals = wy0_ * wx0_ * v00 + wy0_ * wx1_ * v01 + wy1_ * wx0_ * v10 + wy1_ * wx1_ * v11
        vals = vals * (y_ok[None, :, None] & x_ok[None, None, :]).astype(vals.dtype)
        return vals.reshape(C, AH, sr, AW, sr).mean(axis=(2, 4))

    return jax.vmap(one_roi)(rois.astype(jnp.float32))


if __name__ == "__main__":
    B, C, H, W = 2, 8, 16, 16
    AH = AW = 7
    spatial_scale = 0.25
    sampling_ratio = 2
    num_rois = 6

    key = jax.random.PRNGKey(0)
    kf, kb, kxy, kwh = jax.random.split(key, 4)
    features = jax.random.normal(kf, (B, C, H, W), dtype=jnp.float32)
    batch_col = jax.random.randint(kb, (num_rois, 1), 0, B).astype(jnp.float32)
    xy1 = jax.random.uniform(kxy, (num_rois, 2), minval=0.0, maxval=40.0,
                             dtype=jnp.float32)
    wh = jax.random.uniform(kwh, (num_rois, 2), minval=4.0, maxval=48.0,
                            dtype=jnp.float32)
    rois = jnp.concatenate([batch_col, xy1, xy1 + wh], axis=1)  # [b, x1, y1, x2, y2]

    out = jax.block_until_ready(
        roi_align(features, rois, AH, AW, spatial_scale, sampling_ratio))
    ref = jax.block_until_ready(
        roi_align_reference(features, rois, AH, AW, spatial_scale, sampling_ratio))

    assert out.shape == (num_rois, C, AH, AW), out.shape
    np.testing.assert_allclose(np.asarray(out), np.asarray(ref), rtol=1e-4, atol=1e-4)
    print("KERNEL_OK")
</pallas_src>

<mosaic_0001>
module attributes {stable_mosaic.version = 11 : i64} {
  func.func @_roi_align_kernel(%arg0: i32, %arg1: memref<6xi32, #tpu.memory_space<smem>>, %arg2: memref<2x8x256xf32, #tpu.memory_space<vmem>>, %arg3: memref<6x256x49xf32, #tpu.memory_space<vmem>>, %arg4: memref<6x8x49xf32, #tpu.memory_space<vmem>>) attributes {dimension_semantics = [#tpu.dimension_semantics<arbitrary>], iteration_bounds = array<i64: 1>, scalar_prefetch = 0 : i64, scratch_operands = 0 : i64, tpu.core_type = #tpu.core_type<tc>, window_params = [{transform_indices = @transform_0, window_bounds = array<i64: 6>}, {pipeline_mode = #tpu.pipeline_mode<synchronous>, transform_indices = @transform_1, window_bounds = array<i64: 2, 8, 256>}, {transform_indices = @transform_2, window_bounds = array<i64: 6, 256, 49>}, {transform_indices = @transform_3, window_bounds = array<i64: 6, 8, 49>}]} {
    %c0_i32 = arith.constant 0 : i32
    %c6_i32 = arith.constant 6 : i32
    %0 = arith.muli %arg0, %c6_i32 : i32
    %1 = arith.addi %0, %c0_i32 : i32
    %2 = arith.index_cast %1 : i32 to index
    %3 = memref.load %arg1[%2] : memref<6xi32, #tpu.memory_space<smem>>
    %4 = arith.index_cast %3 : i32 to index
    %c0 = arith.constant 0 : index
    %c0_0 = arith.constant 0 : index
    %5 = vector.load %arg2[%4, %c0, %c0_0] : memref<2x8x256xf32, #tpu.memory_space<vmem>>, vector<1x8x256xf32>
    %6 = vector.shape_cast %5 : vector<1x8x256xf32> to vector<8x256xf32>
    %7 = arith.index_cast %c0_i32 : i32 to index
    %c0_1 = arith.constant 0 : index
    %c0_2 = arith.constant 0 : index
    %8 = vector.load %arg3[%7, %c0_1, %c0_2] : memref<6x256x49xf32, #tpu.memory_space<vmem>>, vector<1x256x49xf32>
    %9 = vector.shape_cast %8 : vector<1x256x49xf32> to vector<256x49xf32>
    %cst = arith.constant dense<0.000000e+00> : vector<8x49xf32>
    %10 = tpu.matmul %6, %9, %cst {dimension_numbers = #tpu.dot_dimension_numbers<[1], [0], [0], [1], [0, 0, 1, 1], [], []>, precision = #tpu.contract_precision<fp32>} : vector<8x256xf32>, vector<256x49xf32>, vector<8x49xf32> -> vector<8x49xf32>
    %11 = arith.index_cast %c0_i32 : i32 to index
    %c0_3 = arith.constant 0 : index
    %c0_4 = arith.constant 0 : index
    %12 = vector.load %arg4[%11, %c0_3, %c0_4] : memref<6x8x49xf32, #tpu.memory_space<vmem>>, vector<1x8x49xf32>
    %13 = vector.shape_cast %12 : vector<1x8x49xf32> to vector<8x49xf32>
    %14 = vector.shape_cast %10 : vector<8x49xf32> to vector<1x8x49xf32>
    tpu.vector_store %arg4[%11, %c0_3, %c0_4], %14 {strides = array<i32>} : memref<6x8x49xf32, #tpu.memory_space<vmem>>, vector<1x8x49xf32>,
    %c1_i32 = arith.constant 1 : i32
    %c6_i32_5 = arith.constant 6 : i32
    %15 = arith.muli %arg0, %c6_i32_5 : i32
    %16 = arith.addi %15, %c1_i32 : i32
    %17 = arith.index_cast %16 : i32 to index
    %18 = memref.load %arg1[%17] : memref<6xi32, #tpu.memory_space<smem>>
    %19 = arith.index_cast %18 : i32 to index
    %c0_6 = arith.constant 0 : index
    %c0_7 = arith.constant 0 : index
    %20 = vector.load %arg2[%19, %c0_6, %c0_7] : memref<2x8x256xf32, #tpu.memory_space<vmem>>, vector<1x8x256xf32>
    %21 = vector.shape_cast %20 : vector<1x8x256xf32> to vector<8x256xf32>
    %22 = arith.index_cast %c1_i32 : i32 to index
    %c0_8 = arith.constant 0 : index
    %c0_9 = arith.constant 0 : index
    %23 = vector.load %arg3[%22, %c0_8, %c0_9] : memref<6x256x49xf32, #tpu.memory_space<vmem>>, vector<1x256x49xf32>
    %24 = vector.shape_cast %23 : vector<1x256x49xf32> to vector<256x49xf32>
    %cst_10 = arith.constant dense<0.000000e+00> : vector<8x49xf32>
    %25 = tpu.matmul %21, %24, %cst_10 {dimension_numbers = #tpu.dot_dimension_numbers<[1], [0], [0], [1], [0, 0, 1, 1], [], []>, precision = #tpu.contract_precision<fp32>} : vector<8x256xf32>, vector<256x49xf32>, vector<8x49xf32> -> vector<8x49xf32>
    %26 = arith.index_cast %c1_i32 : i32 to index
    %c0_11 = arith.constant 0 : index
    %c0_12 = arith.constant 0 : index
    %27 = vector.load %arg4[%26, %c0_11, %c0_12] : memref<6x8x49xf32, #tpu.memory_space<vmem>>, vector<1x8x49xf32>
    %28 = vector.shape_cast %27 : vector<1x8x49xf32> to vector<8x49xf32>
    %29 = vector.shape_cast %25 : vector<8x49xf32> to vector<1x8x49xf32>
    tpu.vector_store %arg4[%26, %c0_11, %c0_12], %29 {strides = array<i32>} : memref<6x8x49xf32, #tpu.memory_space<vmem>>, vector<1x8x49xf32>,
    %c2_i32 = arith.constant 2 : i32
    %c6_i32_13 = arith.constant 6 : i32
    %30 = arith.muli %arg0, %c6_i32_13 : i32
    %31 = arith.addi %30, %c2_i32 : i32
    %32 = arith.index_cast %31 : i32 to index
    %33 = memref.load %arg1[%32] : memref<6xi32, #tpu.memory_space<smem>>
    %34 = arith.index_cast %33 : i32 to index
    %c0_14 = arith.constant 0 : index
    %c0_15 = arith.constant 0 : index
    %35 = vector.load %arg2[%34, %c0_14, %c0_15] : memref<2x8x256xf32, #tpu.memory_space<vmem>>, vector<1x8x256xf32>
    %36 = vector.shape_cast %35 : vector<1x8x256xf32> to vector<8x256xf32>
    %37 = arith.index_cast %c2_i32 : i32 to index
    %c0_16 = arith.constant 0 : index
    %c0_17 = arith.constant 0 : index
    %38 = vector.load %arg3[%37, %c0_16, %c0_17] : memref<6x256x49xf32, #tpu.memory_space<vmem>>, vector<1x256x49xf32>
    %39 = vector.shape_cast %38 : vector<1x256x49xf32> to vector<256x49xf32>
    %cst_18 = arith.constant dense<0.000000e+00> : vector<8x49xf32>
    %40 = tpu.matmul %36, %39, %cst_18 {dimension_numbers = #tpu.dot_dimension_numbers<[1], [0], [0], [1], [0, 0, 1, 1], [], []>, precision = #tpu.contract_precision<fp32>} : vector<8x256xf32>, vector<256x49xf32>, vector<8x49xf32> -> vector<8x49xf32>
    %41 = arith.index_cast %c2_i32 : i32 to index
    %c0_19 = arith.constant 0 : index
    %c0_20 = arith.constant 0 : index
    %42 = vector.load %arg4[%41, %c0_19, %c0_20] : memref<6x8x49xf32, #tpu.memory_space<vmem>>, vector<1x8x49xf32>
    %43 = vector.shape_cast %42 : vector<1x8x49xf32> to vector<8x49xf32>
    %44 = vector.shape_cast %40 : vector<8x49xf32> to vector<1x8x49xf32>
    tpu.vector_store %arg4[%41, %c0_19, %c0_20], %44 {strides = array<i32>} : memref<6x8x49xf32, #tpu.memory_space<vmem>>, vector<1x8x49xf32>,
    %c3_i32 = arith.constant 3 : i32
    %c6_i32_21 = arith.constant 6 : i32
    %45 = arith.muli %arg0, %c6_i32_21 : i32
    %46 = arith.addi %45, %c3_i32 : i32
    %47 = arith.index_cast %46 : i32 to index
    %48 = memref.load %arg1[%47] : memref<6xi32, #tpu.memory_space<smem>>
    %49 = arith.index_cast %48 : i32 to index
    %c0_22 = arith.constant 0 : index
    %c0_23 = arith.constant 0 : index
    %50 = vector.load %arg2[%49, %c0_22, %c0_23] : memref<2x8x256xf32, #tpu.memory_space<vmem>>, vector<1x8x256xf32>
    %51 = vector.shape_cast %50 : vector<1x8x256xf32> to vector<8x256xf32>
    %52 = arith.index_cast %c3_i32 : i32 to index
    %c0_24 = arith.constant 0 : index
    %c0_25 = arith.constant 0 : index
    %53 = vector.load %arg3[%52, %c0_24, %c0_25] : memref<6x256x49xf32, #tpu.memory_space<vmem>>, vector<1x256x49xf32>
    %54 = vector.shape_cast %53 : vector<1x256x49xf32> to vector<256x49xf32>
    %cst_26 = arith.constant dense<0.000000e+00> : vector<8x49xf32>
    %55 = tpu.matmul %51, %54, %cst_26 {dimension_numbers = #tpu.dot_dimension_numbers<[1], [0], [0], [1], [0, 0, 1, 1], [], []>, precision = #tpu.contract_precision<fp32>} : vector<8x256xf32>, vector<256x49xf32>, vector<8x49xf32> -> vector<8x49xf32>
    %56 = arith.index_cast %c3_i32 : i32 to index
    %c0_27 = arith.constant 0 : index
    %c0_28 = arith.constant 0 : index
    %57 = vector.load %arg4[%56, %c0_27, %c0_28] : memref<6x8x49xf32, #tpu.memory_space<vmem>>, vector<1x8x49xf32>
    %58 = vector.shape_cast %57 : vector<1x8x49xf32> to vector<8x49xf32>
    %59 = vector.shape_cast %55 : vector<8x49xf32> to vector<1x8x49xf32>
    tpu.vector_store %arg4[%56, %c0_27, %c0_28], %59 {strides = array<i32>} : memref<6x8x49xf32, #tpu.memory_space<vmem>>, vector<1x8x49xf32>,
    %c4_i32 = arith.constant 4 : i32
    %c6_i32_29 = arith.constant 6 : i32
    %60 = arith.muli %arg0, %c6_i32_29 : i32
    %61 = arith.addi %60, %c4_i32 : i32
    %62 = arith.index_cast %61 : i32 to index
    %63 = memref.load %arg1[%62] : memref<6xi32, #tpu.memory_space<smem>>
    %64 = arith.index_cast %63 : i32 to index
    %c0_30 = arith.constant 0 : index
    %c0_31 = arith.constant 0 : index
    %65 = vector.load %arg2[%64, %c0_30, %c0_31] : memref<2x8x256xf32, #tpu.memory_space<vmem>>, vector<1x8x256xf32>
    %66 = vector.shape_cast %65 : vector<1x8x256xf32> to vector<8x256xf32>
    %67 = arith.index_cast %c4_i32 : i32 to index
    %c0_32 = arith.constant 0 : index
    %c0_33 = arith.constant 0 : index
    %68 = vector.load %arg3[%67, %c0_32, %c0_33] : memref<6x256x49xf32, #tpu.memory_space<vmem>>, vector<1x256x49xf32>
    %69 = vector.shape_cast %68 : vector<1x256x49xf32> to vector<256x49xf32>
    %cst_34 = arith.constant dense<0.000000e+00> : vector<8x49xf32>
    %70 = tpu.matmul %66, %69, %cst_34 {dimension_numbers = #tpu.dot_dimension_numbers<[1], [0], [0], [1], [0, 0, 1, 1], [], []>, precision = #tpu.contract_precision<fp32>} : vector<8x256xf32>, vector<256x49xf32>, vector<8x49xf32> -> vector<8x49xf32>
    %71 = arith.index_cast %c4_i32 : i32 to index
    %c0_35 = arith.constant 0 : index
    %c0_36 = arith.constant 0 : index
    %72 = vector.load %arg4[%71, %c0_35, %c0_36] : memref<6x8x49xf32, #tpu.memory_space<vmem>>, vector<1x8x49xf32>
    %73 = vector.shape_cast %72 : vector<1x8x49xf32> to vector<8x49xf32>
    %74 = vector.shape_cast %70 : vector<8x49xf32> to vector<1x8x49xf32>
    tpu.vector_store %arg4[%71, %c0_35, %c0_36], %74 {strides = array<i32>} : memref<6x8x49xf32, #tpu.memory_space<vmem>>, vector<1x8x49xf32>,
    %c5_i32 = arith.constant 5 : i32
    %c6_i32_37 = arith.constant 6 : i32
    %75 = arith.muli %arg0, %c6_i32_37 : i32
    %76 = arith.addi %75, %c5_i32 : i32
    %77 = arith.index_cast %76 : i32 to index
    %78 = memref.load %arg1[%77] : memref<6xi32, #tpu.memory_space<smem>>
    %79 = arith.index_cast %78 : i32 to index
    %c0_38 = arith.constant 0 : index
    %c0_39 = arith.constant 0 : index
    %80 = vector.load %arg2[%79, %c0_38, %c0_39] : memref<2x8x256xf32, #tpu.memory_space<vmem>>, vector<1x8x256xf32>
    %81 = vector.shape_cast %80 : vector<1x8x256xf32> to vector<8x256xf32>
    %82 = arith.index_cast %c5_i32 : i32 to index
    %c0_40 = arith.constant 0 : index
    %c0_41 = arith.constant 0 : index
    %83 = vector.load %arg3[%82, %c0_40, %c0_41] : memref<6x256x49xf32, #tpu.memory_space<vmem>>, vector<1x256x49xf32>
    %84 = vector.shape_cast %83 : vector<1x256x49xf32> to vector<256x49xf32>
    %cst_42 = arith.constant dense<0.000000e+00> : vector<8x49xf32>
    %85 = tpu.matmul %81, %84, %cst_42 {dimension_numbers = #tpu.dot_dimension_numbers<[1], [0], [0], [1], [0, 0, 1, 1], [], []>, precision = #tpu.contract_precision<fp32>} : vector<8x256xf32>, vector<256x49xf32>, vector<8x49xf32> -> vector<8x49xf32>
    %86 = arith.index_cast %c5_i32 : i32 to index
    %c0_43 = arith.constant 0 : index
    %c0_44 = arith.constant 0 : index
    %87 = vector.load %arg4[%86, %c0_43, %c0_44] : memref<6x8x49xf32, #tpu.memory_space<vmem>>, vector<1x8x49xf32>
    %88 = vector.shape_cast %87 : vector<1x8x49xf32> to vector<8x49xf32>
    %89 = vector.shape_cast %85 : vector<8x49xf32> to vector<1x8x49xf32>
    tpu.vector_store %arg4[%86, %c0_43, %c0_44], %89 {strides = array<i32>} : memref<6x8x49xf32, #tpu.memory_space<vmem>>, vector<1x8x49xf32>,
    %c6_i32_45 = arith.constant 6 : i32
    return
  }
  func.func @transform_0(%arg0: i32) -> i32 {
    %c0_i32 = arith.constant 0 : i32
    %c0_i32_0 = arith.constant 0 : i32
    return %c0_i32 : i32
  }
  func.func @transform_1(%arg0: i32) -> (i32, i32, i32) {
    %c0_i32 = arith.constant 0 : i32
    %c0_i32_0 = arith.constant 0 : i32
    %c0_i32_1 = arith.constant 0 : i32
    %c0_i32_2 = arith.constant 0 : i32
    return %c0_i32, %c0_i32_0, %c0_i32_1 : i32, i32, i32
  }
  func.func @transform_2(%arg0: i32) -> (i32, i32, i32) {
    %c0_i32 = arith.constant 0 : i32
    %c0_i32_0 = arith.constant 0 : i32
    %c0_i32_1 = arith.constant 0 : i32
    return %arg0, %c0_i32, %c0_i32_0 : i32, i32, i32
  }
  func.func @transform_3(%arg0: i32) -> (i32, i32, i32) {
    %c0_i32 = arith.constant 0 : i32
    %c0_i32_0 = arith.constant 0 : i32
    %c0_i32_1 = arith.constant 0 : i32
    return %arg0, %c0_i32, %c0_i32_0 : i32, i32, i32
  }
}

</mosaic_0001>

<bundles_post_ra>
// kernel: tpu_custom_call.1
= control target key start
LH: loop header
LB: loop body
LE: loop exit
PB: predicated region body
PF: predicated region fallthrough
CT: control target
= control target key end

     0   :  { %8 = vsyncpa [#allocation4], 0  ;;  %s8337_s0 = inlined_call_operand.vmem [shape: s32[6], index: 0, kind: input, shape index: {}]   ;;  %s8338_s1 = inlined_call_operand.vmem [shape: f32[2,8,256], index: 1, kind: input, shape index: {}]   ;;  %s8339_s2 = inlined_call_operand.vmem [shape: f32[6,256,49], index: 2, kind: input, shape index: {}]   ;;  %s8340_s3 = inlined_call_operand.hbm [shape: f32[6,8,49], index: 3, kind: output, shape index: {}]  }
   0x1   :  { %9 = vsyncpa [#allocation3], 0  ;;  %s15_s14 = sshll.u32 %s8337_s0, 4  ;;  %s4629_s15 = smov [#allocation2]   ;;  %s16_s14 = int_to_ptr.vmem [resolvable:$true] %s15_s14 }
   0x2   :  { %18 = dma.vmem_to_smem %s16_s14, 16, %s4629_s15, [#allocation4]  }
   0x3   :  { %4625 = dma.done.wait [#allocation4], 16  }
   0x4   :  { %4626 = vsyncadd [#allocation4], 4294967280 }
   0x5   :  { %27 = sfence }
   0x6   :  { %v50_v0 = vld [vmem:[%s8339_s2 + $0x78] sm:$0xff]  ;;  %v49_v1 = vld [vmem:[%s8339_s2 + $0x70] sm:$0xff]  ;;  %v48_v2 = vld [vmem:[%s8339_s2 + $0x68] sm:$0xff]  ;;  %s4919_s6 = sld [smem:[#allocation2]]  ;;  %vm749_vm0 = vcmask 400384   ;;  %s4377_s12 = sshll.u32 %s8340_s3, 4  ;;  %s4378_s12 = int_to_ptr.hbm [resolvable:$true] %s4377_s12 }
   0x7   :  { %v4665_v3 = vand.u32 4294901760, %v50_v0  ;;  %v4667_v4 = vand.u32 4294901760, %v49_v1  ;;  %v4669_v5 = vand.u32 4294901760, %v48_v2  ;;  %v47_v6 = vld [vmem:[%s8339_s2 + $0x60] sm:$0xff]  ;;  %v46_v7 = vld [vmem:[%s8339_s2 + $0x58] sm:$0xff]  ;;  %v45_v8 = vld [vmem:[%s8339_s2 + $0x50] sm:$0xff] }
   0x8   :  { %v4680_v9 = vand.u32 4294901760, %v47_v6  ;;  %v4682_v10 = vand.u32 4294901760, %v46_v7  ;;  %v4684_v11 = vand.u32 4294901760, %v45_v8  ;;  %v44_v12 = vld [vmem:[%s8339_s2 + $0x48] sm:$0xff]  ;;  %v43_v13 = vld [vmem:[%s8339_s2 + $0x40] sm:$0xff]  ;;  %v42_v18 = vld [vmem:[%s8339_s2 + $0x38] sm:$0xff] }
   0x9   :  { %68 = vmatpush.msra.mxu0 %v4665_v3  ;;  %v4694_v14 = vsub.f32 %v50_v0, %v4665_v3  ;;  %v4697_v15 = vsub.f32 %v49_v1, %v4667_v4  ;;  %264 = vmatpush.msra.mxu3 %v4665_v3  ;;  %v4701_v16 = vsub.f32 %v48_v2, %v4669_v5  ;;  %v4703_v17 = vand.u32 4294901760, %v44_v12  ;;  %v41_v26 = vld [vmem:[%s8339_s2 + $0x30] sm:$0xff]  ;;  %v40_v34 = vld [vmem:[%s8339_s2 + $0x28] sm:$0xff]  ;;  %v39_v42 = vld [vmem:[%s8339_s2 + $0x20] sm:$0xff]  ;;  %s5529_s17 = sld [smem:[#allocation2 + $0x1]]  ;;  %s4632_s14 = smov 8  }
   0xa   :  { %v4709_v19 = vsub.f32 %v47_v6, %v4680_v9  ;;  %v4712_v20 = vsub.f32 %v46_v7, %v4682_v10  ;;  %v4715_v21 = vsub.f32 %v45_v8, %v4684_v11  ;;  %v4722_v25 = vand.u32 4294901760, %v43_v13  ;;  %v38_v48 = vld [vmem:[%s8339_s2 + $0x18] sm:$0xff]  ;;  %v37_v54 = vld [vmem:[%s8339_s2 + $0x10] sm:$0xff]  ;;  %v36_v61 = vld [vmem:[%s8339_s2 + $0x8] sm:$0xff]  ;;  %s6141_s29 = sld [smem:[#allocation2 + $0x2]] }
   0xb   :  { %70 = vmatpush.msra.mxu0 %v4667_v4  ;;  %211 = vmatpush.msra.mxu2 %v4694_v14  ;;  %v110_v22 = vand.u32 4294901760, %v4694_v14  ;;  %v8356_v23 = vand.u32 4294901760, %v4697_v15  ;;  %v8354_v24 = vand.u32 4294901760, %v4701_v16  ;;  %v4729_v28 = vand.u32 4294901760, %v42_v18  ;;  %v66_v59 = vld [vmem:[%s8339_s2 + $0xf8] sm:$0xff]  ;;  %v35_v2 = vld [vmem:[%s8339_s2] sm:$0xff] }
   0xc   :  { %266 = vmatpush.msra.mxu3 %v4667_v4  ;;  %v8352_v27 = vand.u32 4294901760, %v4709_v19  ;;  %v4732_v29 = vsub.f32 %v44_v12, %v4703_v17  ;;  %v8350_v33 = vand.u32 4294901760, %v4712_v20  ;;  %v4750_v35 = vand.u32 4294901760, %v41_v26  ;;  %v65_v6 = vld [vmem:[%s8339_s2 + $0xf0] sm:$0xff]  ;;  %s4579_s15 = sshll.u32 %s4919_s6, 4  ;;  %s7367_s27 = sld [smem:[#allocation2 + $0x4]] }
   0xd   :  { %72 = vmatpush.msra.mxu0 %v4669_v5  ;;  %214 = vmatpush.msra.mxu2 %v4697_v15  ;;  %v111_v30 = vsub.f32 %v4694_v14, %v110_v22  ;;  %v117_v31 = vsub.f32 %v4697_v15, %v8356_v23  ;;  %v123_v32 = vsub.f32 %v4701_v16, %v8354_v24  ;;  %v8349_v36 = vand.u32 4294901760, %v4715_v21  ;;  %s5017_s20 = scalar_lea.vmem %s8338_s1, %s4579_s15  ;;  %s6754_s15 = sld [smem:[#allocation2 + $0x3]] }
   0xe   :  { %268 = vmatpush.msra.mxu3 %v4669_v5  ;;  %v129_v39 = vsub.f32 %v4709_v19, %v8352_v27  ;;  %v4759_v40 = vsub.f32 %v43_v13, %v4722_v25  ;;  %v4762_v41 = vand.u32 4294901760, %v40_v34  ;;  %v135_v44 = vsub.f32 %v4712_v20, %v8350_v33  ;;  %s7980_s13 = sld [smem:[#allocation2 + $0x5]] }
   0xf   :  { %74 = vmatpush.msra.mxu0 %v4680_v9  ;;  %v112_v37 = vand.u32 4294901760, %v111_v30  ;;  %217 = vmatpush.msra.mxu2 %v4701_v16  ;;  %v118_v38 = vand.u32 4294901760, %v117_v31  ;;  %v124_v43 = vand.u32 4294901760, %v123_v32  ;;  %v8347_v45 = vand.u32 4294901760, %v4732_v29  ;;  %v64_v32 = vld [vmem:[%s8339_s2 + $0xe8] sm:$0xff]  ;;  %s4580_s25 = sshll.u32 %s5529_s17, 4 }
  0x10   :  { %270 = vmatpush.msra.mxu3 %v4680_v9  ;;  %v4773_v46 = vsub.f32 %v42_v18, %v4729_v28  ;;  %v141_v47 = vsub.f32 %v4715_v21, %v8349_v36  ;;  %v130_v49 = vand.u32 4294901760, %v129_v39  ;;  %v4784_v50 = vand.u32 4294901760, %v39_v42  ;;  %s5625_s5 = scalar_lea.vmem %s8338_s1, %s4580_s25  ;;  %s4581_s11 = sshll.u32 %s6141_s29, 4 }
  0x11   :  { %76 = vmatpush.msra.mxu0 %v4682_v10  ;;  %113 = vmatpush.msra.mxu1 %v112_v37  ;;  %v8346_v51 = vand.u32 4294901760, %v4759_v40  ;;  %v4788_v52 = vsub.f32 %v41_v26, %v4750_v35  ;;  %v4793_v53 = vsub.f32 %v40_v34, %v4762_v41  ;;  %v136_v55 = vand.u32 4294901760, %v135_v44  ;;  %v63_v44 = vld [vmem:[%s8339_s2 + $0xe0] sm:$0xff]  ;;  %s6238_s18 = scalar_lea.vmem %s8338_s1, %s4581_s11 }
  0x12   :  { %220 = vmatpush.msra.mxu2 %v4709_v19  ;;  %272 = vmatpush.msra.mxu3 %v4682_v10  ;;  %v147_v56 = vsub.f32 %v4732_v29, %v8347_v45  ;;  %v4802_v57 = vand.u32 4294901760, %v38_v48  ;;  %v8345_v58 = vand.u32 4294901760, %v4773_v46  ;;  %v142_v60 = vand.u32 4294901760, %v141_v47  ;;  %v59_v45 = vld [vmem:[%s8339_s2 + $0xc0] sm:$0xff]  ;;  %s4583_s9 = sshll.u32 %s7367_s27, 4 }
  0x13   :  { %78 = vmatpush.msra.mxu0 %v4684_v11  ;;  %119 = vmatpush.msra.mxu1 %v118_v38  ;;  %v153_v62 = vsub.f32 %v4759_v40, %v8346_v51  ;;  %v4817_v63 = vand.u32 4294901760, %v37_v54  ;;  %v8343_v0 = vand.u32 4294901760, %v4788_v52  ;;  %v4821_v1 = vsub.f32 %v39_v42, %v4784_v50  ;;  %s4582_s23 = sshll.u32 %s6754_s15, 4  ;;  %s7464_s16 = scalar_lea.vmem %s8338_s1, %s4583_s9 }
  0x14   :  { %223 = vmatpush.msra.mxu2 %v4712_v20  ;;  %274 = vmatpush.msra.mxu3 %v4684_v11  ;;  %v8342_v7 = vand.u32 4294901760, %v4793_v53  ;;  %v4832_v8 = vand.u32 4294901760, %v66_v59  ;;  %v148_v12 = vand.u32 4294901760, %v147_v56  ;;  %v159_v13 = vsub.f32 %v4773_v46, %v8345_v58  ;;  %s6851_s30 = scalar_lea.vmem %s8338_s1, %s4582_s23  ;;  %s4584_s0 = sshll.u32 %s7980_s13, 4 }
  0x15   :  { %80 = vmatpush.msra.mxu0 %v4703_v17  ;;  %125 = vmatpush.msra.mxu1 %v124_v43  ;;  %v4838_v18 = vand.u32 4294901760, %v36_v61  ;;  %v4841_v26 = vsub.f32 %v38_v48, %v4802_v57  ;;  %v4845_v30 = vand.u32 4294901760, %v35_v2  ;;  %v4847_v31 = vand.u32 4294901760, %v65_v6  ;;  %s8077_s28 = scalar_lea.vmem %s8338_s1, %s4584_s0  ;;  %s4631_s13 = smov 128  }
  0x16   :  { %226 = vmatpush.msra.mxu2 %v4715_v21  ;;  %276 = vmatpush.msra.mxu3 %v4703_v17  ;;  %v154_v34 = vand.u32 4294901760, %v153_v62  ;;  %v165_v37 = vsub.f32 %v4788_v52, %v8343_v0  ;;  %v8341_v38 = vand.u32 4294901760, %v4821_v1  ;;  %v4858_v39 = vsub.f32 %v37_v54, %v4817_v63 }
  0x17   :  { %82 = vmatpush.msra.mxu0 %v4722_v25  ;;  %131 = vmatpush.msra.mxu1 %v130_v49  ;;  %v171_v42 = vsub.f32 %v4793_v53, %v8342_v7  ;;  %v4866_v43 = vsub.f32 %v66_v59, %v4832_v8  ;;  %v160_v47 = vand.u32 4294901760, %v159_v13  ;;  %v8344_v48 = vand.u32 4294901760, %v4841_v26  ;;  %v62_v59 = vld [vmem:[%s8339_s2 + $0xd8] sm:$0xff]  ;;  %v61_v13 = vld [vmem:[%s8339_s2 + $0xd0] sm:$0xff]  ;;  %v60_v7 = vld [vmem:[%s8339_s2 + $0xc8] sm:$0xff] }
  0x18   :  { %229 = vmatpush.msra.mxu2 %v4732_v29  ;;  %278 = vmatpush.msra.mxu3 %v4722_v25  ;;  %v4874_v49 = vsub.f32 %v36_v61, %v4838_v18  ;;  %v4876_v54 = vand.u32 4294901760, %v64_v32  ;;  %v4884_v56 = vsub.f32 %v65_v6, %v4847_v31  ;;  %v177_v61 = vsub.f32 %v4821_v1, %v8341_v38 }
  0x19   :  { %84 = vmatpush.msra.mxu0 %v4729_v28  ;;  %137 = vmatpush.msra.mxu1 %v136_v55  ;;  %v4881_v55 = vsub.f32 %v35_v2, %v4845_v30  ;;  %v8348_v62 = vand.u32 4294901760, %v4858_v39  ;;  %v172_v2 = vand.u32 4294901760, %v171_v42  ;;  %v8351_v6 = vand.u32 4294901760, %v4866_v43 }
  0x1a   :  { %232 = vmatpush.msra.mxu2 %v4759_v40  ;;  %280 = vmatpush.msra.mxu3 %v4729_v28  ;;  %8477 = vst [vmem:[#allocation8_spill] sm:$0xff] %v4876_v54  ;;  %v4908_v38 = vsub.f32 %v64_v32, %v4876_v54  ;;  %v4910_v42 = vand.u32 4294901760, %v62_v59  ;;  %v8355_v0 = vand.u32 4294901760, %v4884_v56  ;;  %v178_v32 = vand.u32 4294901760, %v177_v61 }
  0x1b   :  { %86 = vmatpush.msra.mxu0 %v4750_v35  ;;  %143 = vmatpush.msra.mxu1 %v142_v60  ;;  %v166_v60 = vand.u32 4294901760, %v165_v37  ;;  %v8353_v37 = vand.u32 4294901760, %v4874_v49  ;;  %v4928_v51 = vand.u32 4294901760, %v61_v13  ;;  %v4938_v61 = vand.u32 4294901760, %v60_v7 }
  0x1c   :  { %235 = vmatpush.msra.mxu2 %v4773_v46  ;;  %282 = vmatpush.msra.mxu3 %v4750_v35  ;;  %v8358_v36 = vand.u32 4294901760, %v4908_v38  ;;  %v4946_v33 = vsub.f32 %v62_v59, %v4910_v42  ;;  %v4953_v27 = vand.u32 4294901760, %v59_v45 }
  0x1d   :  { %88 = vmatpush.msra.mxu0 %v4762_v41  ;;  %149 = vmatpush.msra.mxu1 %v148_v12  ;;  %v4894_v12 = vand.u32 4294901760, %v63_v44  ;;  %v4964_v24 = vsub.f32 %v61_v13, %v4928_v51  ;;  %v4970_v23 = vsub.f32 %v60_v7, %v4938_v61 }
  0x1e   :  { %238 = vmatpush.msra.mxu2 %v4788_v52  ;;  %284 = vmatpush.msra.mxu3 %v4762_v41  ;;  %v464_v14 = vsub.f32 %v4908_v38, %v8358_v36 }
  0x1f   :  { %90 = vmatpush.msra.mxu0 %v4784_v50  ;;  %155 = vmatpush.msra.mxu1 %v154_v34  ;;  %v183_v34 = vsub.f32 %v4841_v26, %v8344_v48  ;;  %v189_v48 = vsub.f32 %v4858_v39, %v8348_v62  ;;  %v4926_v58 = vsub.f32 %v63_v44, %v4894_v12 }
  0x20   :  { %241 = vmatpush.msra.mxu2 %v4793_v53  ;;  %286 = vmatpush.msra.mxu3 %v4784_v50  ;;  %v195_v62 = vsub.f32 %v4874_v49, %v8353_v37 }
  0x21   :  { %92 = vmatpush.msra.mxu0 %v4802_v57  ;;  %161 = vmatpush.msra.mxu1 %v160_v47  ;;  %v8357_v47 = vand.u32 4294901760, %v4881_v55  ;;  %v184_v44 = vand.u32 4294901760, %v183_v34  ;;  %v190_v34 = vand.u32 4294901760, %v189_v48  ;;  %v8359_v37 = vand.u32 4294901760, %v4926_v58  ;;  %v57_v48 = vld [vmem:[%s8339_s2 + $0xb0] sm:$0xff] }
  0x22   :  { %244 = vmatpush.msra.mxu2 %v4821_v1  ;;  %288 = vmatpush.msra.mxu3 %v4802_v57  ;;  %v4997_v36 = vand.u32 4294901760, %v57_v48 }
  0x23   :  { %94 = vmatpush.msra.mxu0 %v4817_v63  ;;  %167 = vmatpush.msra.mxu1 %v166_v60  ;;  %v452_v60 = vsub.f32 %v4866_v43, %v8351_v6  ;;  %v458_v6 = vsub.f32 %v4884_v56, %v8355_v0  ;;  %v201_v59 = vsub.f32 %v4881_v55, %v8357_v47 }
  0x24   :  { %247 = vmatpush.msra.mxu2 %v4841_v26  ;;  %290 = vmatpush.msra.mxu3 %v4817_v63  ;;  %v4986_v47 = vsub.f32 %v59_v45, %v4953_v27  ;;  %v8479_v45 = vand.u32 4294901760, %v4701_v16 }
  0x25   :  { %96 = vmatpush.msra.mxu0 %v4838_v18  ;;  %173 = vmatpush.msra.mxu1 %v172_v2  ;;  %v58_v2 = vld [vmem:[%s8339_s2 + $0xb8] sm:$0xff]  ;;  %v453_v0 = vand.u32 4294901760, %v452_v60  ;;  %v8478_v60 = vand.u32 4294901760, %v4697_v15  ;;  %v459_v7 = vand.u32 4294901760, %v458_v6  ;;  %v470_v15 = vsub.f32 %v4926_v58, %v8359_v37 }
  0x26   :  { %250 = vmatpush.msra.mxu2 %v4858_v39  ;;  %292 = vmatpush.msra.mxu3 %v4838_v18  ;;  %v4980_v13 = vand.u32 4294901760, %v58_v2  ;;  %v5030_v6 = vsub.f32 %v57_v48, %v4997_v36 }
  0x27   :  { %98 = vmatpush.msra.mxu0 %v4845_v30  ;;  %179 = vmatpush.msra.mxu1 %v178_v32  ;;  %v196_v32 = vand.u32 4294901760, %v195_v62  ;;  %v56_v62 = vld [vmem:[%s8339_s2 + $0xa8] sm:$0xff] }
  0x28   :  { %253 = vmatpush.msra.mxu2 %v4874_v49  ;;  %294 = vmatpush.msra.mxu3 %v4845_v30  ;;  %v5012_v16 = vand.u32 4294901760, %v56_v62 }
  0x29   :  { %305 = vmatpush.msrb.mxu0 %v110_v22  ;;  %185 = vmatpush.msra.mxu1 %v184_v44  ;;  %v8360_v22 = vand.u32 4294901760, %v4946_v33  ;;  %v202_v44 = vand.u32 4294901760, %v201_v59  ;;  %v465_v59 = vand.u32 4294901760, %v464_v14  ;;  %v54_v14 = vld [vmem:[%s8339_s2 + $0x98] sm:$0xff] }
  0x2a   :  { %256 = vmatpush.msra.mxu2 %v4881_v55  ;;  %454 = vmatpush.msrb.mxu3 %v453_v0  ;;  %v8480_v0 = vand.u32 4294901760, %v4709_v19  ;;  %v5044_v48 = vsub.f32 %v56_v62, %v5012_v16 }
  0x2b   :  { %309 = vmatpush.msrb.mxu0 %v8478_v60  ;;  %191 = vmatpush.msra.mxu1 %v190_v34  ;;  %v55_v34 = vld [vmem:[%s8339_s2 + $0xa0] sm:$0xff]  ;;  %v476_v37 = vsub.f32 %v4946_v33, %v8360_v22  ;;  %v5010_v60 = vsub.f32 %v58_v2, %v4980_v13  ;;  %v471_v2 = vand.u32 4294901760, %v470_v15 }
  0x2c   :  { %409 = vmatpush.msrb.mxu2 %v4832_v8  ;;  %460 = vmatpush.msrb.mxu3 %v459_v7  ;;  %v5032_v19 = vand.u32 4294901760, %v55_v34  ;;  %v8482_v7 = vand.u32 4294901760, %v4712_v20  ;;  %v8484_v20 = vand.u32 4294901760, %v4715_v21 }
  0x2d   :  { %313 = vmatpush.msrb.mxu0 %v8479_v45  ;;  %197 = vmatpush.msra.mxu1 %v196_v32  ;;  %v8481_v45 = vand.u32 4294901760, %v4964_v24  ;;  %v33_v32 = vld [vmem:[%s5017_s20] sm:$0xff]  ;;  %v477_v15 = vand.u32 4294901760, %v476_v37  ;;  %v53_v37 = vld [vmem:[%s8339_s2 + $0x90] sm:$0xff] }
  0x2e   :  { %411 = vmatpush.msrb.mxu2 %v4847_v31  ;;  %466 = vmatpush.msrb.mxu3 %v465_v59  ;;  %v8364_v59 = vand.u32 4294901760, %v5030_v6  ;;  %v5062_v21 = vand.u32 4294901760, %v33_v32 }
  0x2f   :  { %317 = vmatpush.msrb.mxu0 %v8480_v0  ;;  %203 = vmatpush.msra.mxu1 %v202_v44  ;;  %v482_v22 = vsub.f32 %v4964_v24, %v8481_v45  ;;  %v8483_v0 = vand.u32 4294901760, %v4970_v23  ;;  %v8363_v45 = vand.u32 4294901760, %v5010_v60 }
  0x30   :  { %413 = vmatpush.msrb.mxu2 %v4876_v54  ;;  %v5046_v54 = vand.u32 4294901760, %v54_v14  ;;  %472 = vmatpush.msrb.mxu3 %v471_v2  ;;  %v5075_v2 = vand.u32 4294901760, %v53_v37 }
  0x31   :  { %321 = vmatpush.msrb.mxu0 %v8482_v7  ;;  %372 = vmatpush.msrb.mxu1 %v4665_v3  ;;  %v488_v44 = vsub.f32 %v4970_v23, %v8483_v0  ;;  %v8485_v3 = vand.u32 4294901760, %v4986_v47  ;;  %v483_v62 = vand.u32 4294901760, %v482_v22  ;;  %v5060_v0 = vsub.f32 %v55_v34, %v5032_v19 }
  0x32   :  { %415 = vmatpush.msrb.mxu2 %v4894_v12  ;;  %478 = vmatpush.msrb.mxu3 %v477_v15  ;;  %v500_v22 = vsub.f32 %v5010_v60, %v8363_v45  ;;  %v511_v34 = vand.u32 4294901760, %v5044_v48  ;;  %v506_v15 = vsub.f32 %v5030_v6, %v8364_v59  ;;  %v5089_v45 = vsub.f32 %v33_v32, %v5062_v21 }
  0x33   :  { %325 = vmatpush.msrb.mxu0 %v8484_v20  ;;  %374 = vmatpush.msrb.mxu1 %v4667_v4  ;;  %v494_v7 = vsub.f32 %v4986_v47, %v8485_v3  ;;  %v8486_v4 = vand.u32 4294901760, %v4732_v29  ;;  %v489_v20 = vand.u32 4294901760, %v488_v44  ;;  %v52_v3 = vld [vmem:[%s8339_s2 + $0x88] sm:$0xff]  ;;  %v5078_v29 = vsub.f32 %v54_v14, %v5046_v54 }
  0x34   :  { %417 = vmatpush.msrb.mxu2 %v4910_v42  ;;  %484 = vmatpush.msrb.mxu3 %v483_v62  ;;  %v5091_v14 = vand.u32 4294901760, %v52_v3  ;;  %v512_v32 = vsub.f32 %v5044_v48, %v511_v34  ;;  %v8489_v59 = vand.u32 4294901760, %v4788_v52  ;;  %v8490_v52 = vand.u32 4294901760, %v4793_v53 }
  0x35   :  { %329 = vmatpush.msrb.mxu0 %v8486_v4  ;;  %376 = vmatpush.msrb.mxu1 %v4669_v5  ;;  %v8487_v5 = vand.u32 4294901760, %v4759_v40  ;;  %v495_v44 = vand.u32 4294901760, %v494_v7  ;;  %v517_v4 = vand.u32 4294901760, %v5060_v0  ;;  %v51_v40 = vld [vmem:[%s8339_s2 + $0x80] sm:$0xff]  ;;  %v501_v7 = vand.u32 4294901760, %v500_v22 }
  0x36   :  { %419 = vmatpush.msrb.mxu2 %v4928_v51  ;;  %490 = vmatpush.msrb.mxu3 %v489_v20  ;;  %v523_v62 = vand.u32 4294901760, %v5078_v29  ;;  %v101_v22 = vand.u32 4294901760, %v5089_v45 }
  0x37   :  { %333 = vmatpush.msrb.mxu0 %v8487_v5  ;;  %378 = vmatpush.msrb.mxu1 %v4680_v9  ;;  %v8488_v9 = vand.u32 4294901760, %v4773_v46  ;;  %v5105_v5 = vsub.f32 %v53_v37, %v5075_v2  ;;  %v507_v46 = vand.u32 4294901760, %v506_v15  ;;  %v518_v20 = vsub.f32 %v5060_v0, %v517_v4 }
  0x38   :  { %421 = vmatpush.msrb.mxu2 %v4938_v61  ;;  %496 = vmatpush.msrb.mxu3 %v495_v44  ;;  %v5118_v37 = vsub.f32 %v52_v3, %v5091_v14  ;;  %v524_v44 = vsub.f32 %v5078_v29, %v523_v62  ;;  %v102_v3 = vsub.f32 %v5089_v45, %v101_v22 }
  0x39   :  { %337 = vmatpush.msrb.mxu0 %v8488_v9  ;;  %380 = vmatpush.msrb.mxu1 %v4682_v10  ;;  %v5110_v10 = vand.u32 4294901760, %v51_v40  ;;  %v529_v15 = vand.u32 4294901760, %v5105_v5  ;;  %v8491_v9 = vand.u32 4294901760, %v4821_v1 }
  0x3a   :  { %423 = vmatpush.msrb.mxu2 %v4953_v27  ;;  %502 = vmatpush.msrb.mxu3 %v501_v7 }
  0x3b   :  { %341 = vmatpush.msrb.mxu0 %v8489_v59  ;;  %382 = vmatpush.msrb.mxu1 %v4684_v11  ;;  %v34_v11 = vld [vmem:[%s5017_s20 + $0x8] sm:$0xff]  ;;  %v513_v59 = vand.u32 4294901760, %v512_v32  ;;  %v5133_v53 = vsub.f32 %v51_v40, %v5110_v10  ;;  %v535_v32 = vand.u32 4294901760, %v5118_v37  ;;  %v530_v1 = vsub.f32 %v5105_v5, %v529_v15 }
  0x3c   :  { %425 = vmatpush.msrb.mxu2 %v4980_v13  ;;  %508 = vmatpush.msrb.mxu3 %v507_v46  ;;  %v5137_v7 = vand.u32 4294901760, %v34_v11  ;;  %v8493_v40 = vand.u32 4294901760, %v4858_v39  ;;  %v8495_v39 = vand.u32 4294901760, %v4881_v55 }
  0x3d   :  { %345 = vmatpush.msrb.mxu0 %v8490_v52  ;;  %384 = vmatpush.msrb.mxu1 %v4703_v17  ;;  %v519_v17 = vand.u32 4294901760, %v518_v20  ;;  %v8492_v52 = vand.u32 4294901760, %v4841_v26  ;;  %v541_v46 = vand.u32 4294901760, %v5133_v53  ;;  %v103_v26 = vand.u32 4294901760, %v102_v3 }
  0x3e   :  { %427 = vmatpush.msrb.mxu2 %v4997_v36  ;;  %514 = vmatpush.msrb.mxu3 %v513_v59  ;;  %v5156_v20 = vsub.f32 %v34_v11, %v5137_v7  ;;  %v8494_v59 = vand.u32 4294901760, %v4874_v49 }
  0x3f   :  { %349 = vmatpush.msrb.mxu0 %v8491_v9  ;;  %386 = vmatpush.msrb.mxu1 %v4722_v25  ;;  %v525_v25 = vand.u32 4294901760, %v524_v44  ;;  %v542_v44 = vsub.f32 %v5133_v53, %v541_v46 }
  0x40   :  { %429 = vmatpush.msrb.mxu2 %v5012_v16  ;;  %520 = vmatpush.msrb.mxu3 %v519_v17  ;;  %v442_v11 = vand.u32 4294901760, %v5156_v20 }
  0x41   :  { %353 = vmatpush.msrb.mxu0 %v8492_v52  ;;  %388 = vmatpush.msrb.mxu1 %v4729_v28  ;;  %v536_v28 = vsub.f32 %v5118_v37, %v535_v32 }
  0x42   :  { %431 = vmatpush.msrb.mxu2 %v5032_v19  ;;  %526 = vmatpush.msrb.mxu3 %v525_v25 }
  0x43   :  { %357 = vmatpush.msrb.mxu0 %v8493_v40  ;;  %390 = vmatpush.msrb.mxu1 %v4750_v35  ;;  %v531_v35 = vand.u32 4294901760, %v530_v1  ;;  %v537_v49 = vand.u32 4294901760, %v536_v28 }
  0x44   :  { %433 = vmatpush.msrb.mxu2 %v5046_v54  ;;  %104 = vmatmul.f32.vlgmr.msra.gmra.mxu0 %v103_v26 }
  0x45   :  { %361 = vmatpush.msrb.mxu0 %v8494_v59  ;;  %392 = vmatpush.msrb.mxu1 %v4762_v41  ;;  %v543_v41 = vand.u32 4294901760, %v542_v44 }
  0x46   :  { %435 = vmatpush.msrb.mxu2 %v5075_v2  ;;  %532 = vmatpush.msrb.mxu3 %v531_v35 }
  0x47   :  { %365 = vmatpush.msrb.mxu0 %v8495_v39  ;;  %394 = vmatpush.msrb.mxu1 %v4784_v50  ;;  %v443_v50 = vsub.f32 %v5156_v20, %v442_v11 }
  0x48   :  { %437 = vmatpush.msrb.mxu2 %v5091_v14  ;;  %538 = vmatpush.msrb.mxu3 %v537_v49  ;;  %v4410_v49 = vld [vmem:[%s8339_s2 + $0x118] sm:$0xff] }
  0x49   :  { %552 = vmatpush.msra.mxu0 %v4866_v43  ;;  %396 = vmatpush.msrb.mxu1 %v4802_v57  ;;  %v8496_v57 = vand.u32 4294901760, %v4866_v43  ;;  %v444_v55 = vand.u32 4294901760, %v443_v50  ;;  %v8498_v43 = vand.u32 4294901760, %v4908_v38 }
  0x4a   :  { %259 = vmatmul.f32.vlgmr.msra.gmra.mxu2 %v5089_v45  ;;  %298 = vmatmul.f32.vlgmr.msra.gmra.mxu3 %v101_v22 }
  0x4b   :  { %555 = vmatpush.msra.mxu0 %v4884_v56  ;;  %398 = vmatpush.msrb.mxu1 %v4817_v63  ;;  %v8497_v63 = vand.u32 4294901760, %v4884_v56  ;;  %v8500_v56 = vld [vmem:[#allocation8_spill] sm:$0xff] }
  0x4c   :  { %439 = vmatpush.msrb.mxu2 %v5110_v10  ;;  %544 = vmatpush.msrb.mxu3 %v543_v41 }
  0x4d   :  { %558 = vmatpush.msra.mxu0 %v4908_v38  ;;  %400 = vmatpush.msrb.mxu1 %v4838_v18  ;;  %v8499_v18 = vand.u32 4294901760, %v4926_v58 }
  0x4e   :  { %646 = vmatpush.msra.mxu2 %v8496_v57  ;;  %205 = vmatmul.f32.vlgmr.msra.gmra.mxu1 %v5062_v21 }
  0x4f   :  { %561 = vmatpush.msra.mxu0 %v4926_v58  ;;  %713 = vmatpush.msra.mxu3 %v4832_v8  ;;  %v8502_v58 = vand.u32 4294901760, %v4964_v24 }
  0x50   :  { %650 = vmatpush.msra.mxu2 %v8497_v63  ;;  %402 = vmatpush.msrb.mxu1 %v4845_v30  ;;  %v8504_v30 = vand.u32 4294901760, %v4986_v47 }
  0x51   :  { %564 = vmatpush.msra.mxu0 %v4946_v33  ;;  %715 = vmatpush.msra.mxu3 %v4847_v31 }
  0x52   :  { %605 = vmatpush.msra.mxu1 %v4832_v8  ;;  %654 = vmatpush.msra.mxu2 %v8498_v43  ;;  %v8501_v8 = vand.u32 4294901760, %v4946_v33  ;;  %v8503_v33 = vand.u32 4294901760, %v4970_v23 }
  0x53   :  { %445 = vmatmul.f32.vlgmr.msrb.gmra.mxu2 %v444_v55  ;;  %567 = vmatpush.msra.mxu0 %v4964_v24  ;;  %v8505_v24 = vand.u32 4294901760, %v5010_v60  ;;  %v4409_v55 = vld [vmem:[%s8339_s2 + $0x110] sm:$0xff] }
  0x54   :  { %607 = vmatpush.msra.mxu1 %v4847_v31  ;;  %658 = vmatpush.msra.mxu2 %v8499_v18  ;;  %v8506_v31 = vand.u32 4294901760, %v5030_v6 }
  0x55   :  { %717 = vmatpush.msra.mxu3 %v8500_v56  ;;  %367 = vmatmul.f32.vlgmr.msrb.gmra.mxu0 %v5062_v21 }
  0x56   :  { %546 = vmatmul.f32.vlgmr.msrb.gmra.mxu3 %v5137_v7  ;;  %570 = vmatpush.msra.mxu0 %v4970_v23  ;;  %v4422_v23 = vld [vmem:[%s8339_s2 + $0x178] sm:$0xff] }
  0x57   :  { %609 = vmatpush.msra.mxu1 %v8500_v56  ;;  %662 = vmatpush.msra.mxu2 %v8501_v8  ;;  %v5238_v38 = vand.u32 4294901760, %v4422_v23  ;;  %v5410_v56 = vand.u32 4294901760, %v4410_v49 }
  0x58   :  { %719 = vmatpush.msra.mxu3 %v4894_v12  ;;  %404 = vmatmul.f32.vlgmr.msrb.gmra.mxu1 %v5062_v21 }
  0x59   :  { %573 = vmatpush.msra.mxu0 %v4986_v47  ;;  %611 = vmatpush.msra.mxu1 %v4894_v12  ;;  %v4420_v12 = vld [vmem:[%s8339_s2 + $0x168] sm:$0xff] }
  0x5a   :  { %666 = vmatpush.msra.mxu2 %v8502_v58  ;;  %721 = vmatpush.msra.mxu3 %v4910_v42  ;;  %v5258_v47 = vand.u32 4294901760, %v4420_v12 }
  0x5b   :  { %576 = vmatpush.msra.mxu0 %v5010_v60  ;;  %613 = vmatpush.msra.mxu1 %v4910_v42  ;;  %v4419_v42 = vld [vmem:[%s8339_s2 + $0x160] sm:$0xff] }
  0x5c   :  { %670 = vmatpush.msra.mxu2 %v8503_v33  ;;  %723 = vmatpush.msra.mxu3 %v4928_v51  ;;  %v4408_v33 = vld [vmem:[%s8339_s2 + $0x108] sm:$0xff] }
  0x5d   :  { %579 = vmatpush.msra.mxu0 %v5030_v6  ;;  %615 = vmatpush.msra.mxu1 %v4928_v51  ;;  %v4421_v51 = vld [vmem:[%s8339_s2 + $0x170] sm:$0xff] }
  0x5e   :  { %674 = vmatpush.msra.mxu2 %v8504_v30  ;;  %725 = vmatpush.msra.mxu3 %v4938_v61  ;;  %v4417_v6 = vld [vmem:[%s8339_s2 + $0x150] sm:$0xff] }
  0x5f   :  { %582 = vmatpush.msra.mxu0 %v5044_v48  ;;  %617 = vmatpush.msra.mxu1 %v4938_v61  ;;  %v5261_v61 = vsub.f32 %v4422_v23, %v5238_v38  ;;  %v5288_v48 = vsub.f32 %v4420_v12, %v5258_v47 }
  0x60   :  { %678 = vmatpush.msra.mxu2 %v8505_v24  ;;  %727 = vmatpush.msra.mxu3 %v4953_v27  ;;  %v5425_v24 = vand.u32 4294901760, %v4409_v55 }
  0x61   :  { %585 = vmatpush.msra.mxu0 %v5060_v0  ;;  %619 = vmatpush.msra.mxu1 %v4953_v27  ;;  %v5248_v27 = vand.u32 4294901760, %v4421_v51  ;;  %v834_v45 = vand.u32 4294901760, %v5261_v61  ;;  %v5298_v0 = vand.u32 4294901760, %v4417_v6 }
  0x62   :  { %682 = vmatpush.msra.mxu2 %v8506_v31  ;;  %729 = vmatpush.msra.mxu3 %v4980_v13  ;;  %v4438_v31 = vld [vmem:[%s8339_s2 + $0x1f8] sm:$0xff] }
  0x63   :  { %588 = vmatpush.msra.mxu0 %v5078_v29  ;;  %621 = vmatpush.msra.mxu1 %v4980_v13  ;;  %v5271_v13 = vand.u32 4294901760, %v4419_v42  ;;  %v5274_v60 = vsub.f32 %v4421_v51, %v5248_v27  ;;  %v835_v29 = vsub.f32 %v5261_v61, %v834_v45  ;;  %v5335_v9 = vsub.f32 %v4417_v6, %v5298_v0 }
  0x64   :  { %686 = vmatpush.msra.mxu2 %v511_v34  ;;  %731 = vmatpush.msra.mxu3 %v4997_v36  ;;  %v5442_v6 = vand.u32 4294901760, %v4408_v33 }
  0x65   :  { %591 = vmatpush.msra.mxu0 %v5105_v5  ;;  %623 = vmatpush.msra.mxu1 %v4997_v36  ;;  %v4418_v36 = vld [vmem:[%s8339_s2 + $0x158] sm:$0xff]  ;;  %v840_v21 = vand.u32 4294901760, %v5274_v60  ;;  %v5302_v34 = vsub.f32 %v4419_v42, %v5271_v13  ;;  %v836_v3 = vand.u32 4294901760, %v835_v29  ;;  %v4407_v42 = vld [vmem:[%s8339_s2 + $0x100] sm:$0xff] }
  0x66   :  { %690 = vmatpush.msra.mxu2 %v517_v4  ;;  %733 = vmatpush.msra.mxu3 %v5012_v16 }
  0x67   :  { %594 = vmatpush.msra.mxu0 %v5118_v37  ;;  %625 = vmatpush.msra.mxu1 %v5012_v16  ;;  %v5284_v16 = vand.u32 4294901760, %v4418_v36  ;;  %v841_v22 = vsub.f32 %v5274_v60, %v840_v21 }
  0x68   :  { %694 = vmatpush.msra.mxu2 %v523_v62  ;;  %735 = vmatpush.msra.mxu3 %v5032_v19  ;;  %v846_v62 = vand.u32 4294901760, %v5288_v48 }
  0x69   :  { %597 = vmatpush.msra.mxu0 %v5133_v53  ;;  %627 = vmatpush.msra.mxu1 %v5032_v19  ;;  %v4416_v19 = vld [vmem:[%s8339_s2 + $0x148] sm:$0xff]  ;;  %v5319_v5 = vsub.f32 %v4418_v36, %v5284_v16  ;;  %v4413_v53 = vld [vmem:[%s8339_s2 + $0x130] sm:$0xff]  ;;  %v842_v1 = vand.u32 4294901760, %v841_v22 }
  0x6a   :  { %698 = vmatpush.msra.mxu2 %v529_v15  ;;  %737 = vmatpush.msra.mxu3 %v5046_v54  ;;  %v5315_v4 = vand.u32 4294901760, %v4416_v19  ;;  %v852_v15 = vand.u32 4294901760, %v5302_v34  ;;  %v4437_v22 = vld [vmem:[%s8339_s2 + $0x1f0] sm:$0xff] }
  0x6b   :  { %600 = vmatmul.f32.vlgmr.msra.gmra.mxu0 %v5156_v20  ;;  %629 = vmatpush.msra.mxu1 %v5046_v54  ;;  %v4415_v54 = vld [vmem:[%s8339_s2 + $0x140] sm:$0xff]  ;;  %v858_v52 = vand.u32 4294901760, %v5319_v5 }
  0x6c   :  { %792 = vmatpush.msrb.mxu0 %v5238_v38  ;;  %702 = vmatpush.msra.mxu2 %v535_v32  ;;  %v5331_v37 = vand.u32 4294901760, %v4415_v54  ;;  %v847_v32 = vsub.f32 %v5288_v48, %v846_v62  ;;  %v5351_v25 = vsub.f32 %v4416_v19, %v5315_v4  ;;  %v853_v40 = vsub.f32 %v5302_v34, %v852_v15 }
  0x6d   :  { %739 = vmatpush.msra.mxu3 %v5075_v2  ;;  %631 = vmatpush.msra.mxu1 %v5075_v2  ;;  %v4414_v2 = vld [vmem:[%s8339_s2 + $0x138] sm:$0xff]  ;;  %v859_v35 = vsub.f32 %v5319_v5, %v858_v52 }
  0x6e   :  { %794 = vmatpush.msrb.mxu0 %v5248_v27  ;;  %706 = vmatpush.msra.mxu2 %v541_v46  ;;  %v5342_v17 = vand.u32 4294901760, %v4414_v2  ;;  %v8374_v46 = vand.u32 4294901760, %v5335_v9  ;;  %v5367_v26 = vsub.f32 %v4415_v54, %v5331_v37  ;;  %v848_v59 = vand.u32 4294901760, %v847_v32 }
  0x6f   :  { %741 = vmatpush.msra.mxu3 %v5091_v14  ;;  %708 = vmatmul.f32.vlgmr.msra.gmra.mxu2 %v5137_v7  ;;  %v8373_v20 = vand.u32 4294901760, %v5351_v25  ;;  %v860_v43 = vand.u32 4294901760, %v859_v35  ;;  %v5446_v54 = vsub.f32 %v4410_v49, %v5410_v56  ;;  %v5476_v35 = vsub.f32 %v4408_v33, %v5442_v6 }
  0x70   :  { %796 = vmatpush.msrb.mxu0 %v5258_v47  ;;  %935 = vmatpush.msrb.mxu2 %v5261_v61  ;;  %v5373_v28 = vsub.f32 %v4414_v2, %v5342_v17  ;;  %v865_v41 = vsub.f32 %v5335_v9, %v8374_v46  ;;  %v8372_v57 = vand.u32 4294901760, %v5367_v26  ;;  %v5453_v2 = vand.u32 4294901760, %v4438_v31 }
  0x71   :  { %633 = vmatpush.msra.mxu1 %v5091_v14  ;;  %743 = vmatpush.msra.mxu3 %v5110_v10  ;;  %v5355_v14 = vand.u32 4294901760, %v4413_v53  ;;  %v871_v18 = vsub.f32 %v5351_v25, %v8373_v20  ;;  %v5478_v49 = vand.u32 4294901760, %v4437_v22 }
  0x72   :  { %745 = vmatmul.f32.vlgmr.msra.gmra.mxu3 %v5137_v7  ;;  %798 = vmatpush.msrb.mxu0 %v5271_v13  ;;  %v4412_v7 = vld [vmem:[%s8339_s2 + $0x128] sm:$0xff]  ;;  %v8370_v63 = vand.u32 4294901760, %v5373_v28  ;;  %v866_v30 = vand.u32 4294901760, %v865_v41  ;;  %v877_v23 = vsub.f32 %v5367_v26, %v8372_v57 }
  0x73   :  { %938 = vmatpush.msrb.mxu2 %v5274_v60  ;;  %988 = vmatpush.msrb.mxu3 %v5238_v38  ;;  %v5382_v39 = vand.u32 4294901760, %v4412_v7  ;;  %v5388_v44 = vsub.f32 %v4413_v53, %v5355_v14  ;;  %v872_v36 = vand.u32 4294901760, %v871_v18 }
  0x74   :  { %635 = vmatpush.msra.mxu1 %v5110_v10  ;;  %800 = vmatpush.msrb.mxu0 %v5284_v16  ;;  %v4411_v10 = vld [vmem:[%s8339_s2 + $0x120] sm:$0xff]  ;;  %v883_v12 = vsub.f32 %v5373_v28, %v8370_v63  ;;  %v878_v53 = vand.u32 4294901760, %v877_v23  ;;  %v4434_v23 = vld [vmem:[%s8339_s2 + $0x1d8] sm:$0xff] }
  0x75   :  { %639 = vmatmul.f32.vlgmr.msra.gmra.mxu1 %v442_v11  ;;  %941 = vmatpush.msrb.mxu2 %v5288_v48  ;;  %v854_v11 = vand.u32 4294901760, %v853_v40  ;;  %v5397_v50 = vand.u32 4294901760, %v4411_v10  ;;  %v5413_v8 = vsub.f32 %v4412_v7, %v5382_v39  ;;  %v8369_v58 = vand.u32 4294901760, %v5388_v44  ;;  %v4436_v40 = vld [vmem:[%s8339_s2 + $0x1e8] sm:$0xff] }
  0x76   :  { %837 = vmatpush.msrb.mxu1 %v836_v3  ;;  %990 = vmatpush.msrb.mxu3 %v5248_v27  ;;  %v5459_v3 = vand.u32 4294901760, %v4407_v42  ;;  %v5463_v7 = vsub.f32 %v4409_v55, %v5425_v24  ;;  %v5486_v55 = vsub.f32 %v4438_v31, %v5453_v2 }
  0x77   :  { %802 = vmatpush.msrb.mxu0 %v5298_v0  ;;  %944 = vmatpush.msrb.mxu2 %v5302_v34  ;;  %v5428_v51 = vsub.f32 %v4411_v10, %v5397_v50  ;;  %v8367_v19 = vand.u32 4294901760, %v5413_v8  ;;  %v889_v29 = vsub.f32 %v5388_v44, %v8369_v58 }
  0x78   :  { %843 = vmatpush.msrb.mxu1 %v842_v1  ;;  %992 = vmatpush.msrb.mxu3 %v5258_v47  ;;  %v884_v1 = vand.u32 4294901760, %v883_v12  ;;  %v8368_v18 = vand.u32 4294901760, %v5463_v7  ;;  %v5494_v33 = vsub.f32 %v4407_v42, %v5459_v3 }
  0x79   :  { %804 = vmatpush.msrb.mxu0 %v5315_v4  ;;  %947 = vmatpush.msrb.mxu2 %v5319_v5  ;;  %v8365_v32 = vand.u32 4294901760, %v5428_v51  ;;  %v895_v10 = vsub.f32 %v5413_v8, %v8367_v19  ;;  %v890_v41 = vand.u32 4294901760, %v889_v29  ;;  %v5511_v29 = vsub.f32 %v4437_v22, %v5478_v49 }
  0x7a   :  { %849 = vmatpush.msrb.mxu1 %v848_v59  ;;  %994 = vmatpush.msrb.mxu3 %v5271_v13  ;;  %v8366_v59 = vand.u32 4294901760, %v5446_v54  ;;  %v913_v22 = vsub.f32 %v5463_v7, %v8368_v18 }
  0x7b   :  { %806 = vmatpush.msrb.mxu0 %v5331_v37  ;;  %950 = vmatpush.msrb.mxu2 %v5335_v9  ;;  %v896_v12 = vand.u32 4294901760, %v895_v10  ;;  %v8377_v58 = vand.u32 4294901760, %v5511_v29 }
  0x7c   :  { %855 = vmatpush.msrb.mxu1 %v854_v11  ;;  %996 = vmatpush.msrb.mxu3 %v5284_v16  ;;  %v4435_v11 = vld [vmem:[%s8339_s2 + $0x1e0] sm:$0xff]  ;;  %v907_v42 = vsub.f32 %v5446_v54, %v8366_v59  ;;  %v8376_v59 = vand.u32 4294901760, %v5494_v33 }
  0x7d   :  { %808 = vmatpush.msrb.mxu0 %v5342_v17  ;;  %953 = vmatpush.msrb.mxu2 %v5351_v25  ;;  %v5503_v31 = vand.u32 4294901760, %v4435_v11 }
  0x7e   :  { %861 = vmatpush.msrb.mxu1 %v860_v43  ;;  %998 = vmatpush.msrb.mxu3 %v5298_v0  ;;  %v901_v43 = vsub.f32 %v5428_v51, %v8365_v32  ;;  %v5516_v32 = vand.u32 4294901760, %v4434_v23  ;;  %v908_v18 = vand.u32 4294901760, %v907_v42  ;;  %v4431_v42 = vld [vmem:[%s8339_s2 + $0x1c0] sm:$0xff]  ;;  %v925_v57 = vsub.f32 %v5494_v33, %v8376_v59 }
  0x7f   :  { %810 = vmatpush.msrb.mxu0 %v5355_v14  ;;  %956 = vmatpush.msrb.mxu2 %v5367_v26 }
  0x80   :  { %867 = vmatpush.msrb.mxu1 %v866_v30  ;;  %1000 = vmatpush.msrb.mxu3 %v5315_v4  ;;  %v5496_v30 = vand.u32 4294901760, %v4436_v40  ;;  %v902_v10 = vand.u32 4294901760, %v901_v43  ;;  %v4432_v43 = vld [vmem:[%s8339_s2 + $0x1c8] sm:$0xff] }
  0x81   :  { %812 = vmatpush.msrb.mxu0 %v5382_v39  ;;  %959 = vmatpush.msrb.mxu2 %v5373_v28  ;;  %v5562_v46 = vand.u32 4294901760, %v4432_v43 }
  0x82   :  { %873 = vmatpush.msrb.mxu1 %v872_v36  ;;  %1002 = vmatpush.msrb.mxu3 %v5331_v37  ;;  %v8371_v36 = vand.u32 4294901760, %v5476_v35  ;;  %v5527_v19 = vsub.f32 %v4436_v40, %v5496_v30 }
  0x83   :  { %814 = vmatpush.msrb.mxu0 %v5397_v50  ;;  %962 = vmatpush.msrb.mxu2 %v5388_v44  ;;  %v5592_v60 = vsub.f32 %v4432_v43, %v5562_v46 }
  0x84   :  { %879 = vmatpush.msrb.mxu1 %v878_v53  ;;  %1004 = vmatpush.msrb.mxu3 %v5342_v17  ;;  %v8375_v53 = vand.u32 4294901760, %v5486_v55  ;;  %v919_v40 = vsub.f32 %v5476_v35, %v8371_v36  ;;  %v914_v36 = vand.u32 4294901760, %v913_v22  ;;  %v8378_v20 = vand.u32 4294901760, %v5527_v19 }
  0x85   :  { %816 = vmatpush.msrb.mxu0 %v5410_v56  ;;  %965 = vmatpush.msrb.mxu2 %v5413_v8 }
  0x86   :  { %885 = vmatpush.msrb.mxu1 %v884_v1  ;;  %1006 = vmatpush.msrb.mxu3 %v5355_v14  ;;  %v4433_v1 = vld [vmem:[%s8339_s2 + $0x1d0] sm:$0xff]  ;;  %v920_v22 = vand.u32 4294901760, %v919_v40 }
  0x87   :  { %818 = vmatpush.msrb.mxu0 %v5425_v24  ;;  %968 = vmatpush.msrb.mxu2 %v5428_v51  ;;  %v5544_v63 = vand.u32 4294901760, %v4433_v1  ;;  %v4429_v40 = vld [vmem:[%s8339_s2 + $0x1b0] sm:$0xff] }
  0x88   :  { %891 = vmatpush.msrb.mxu1 %v890_v41  ;;  %1008 = vmatpush.msrb.mxu3 %v5382_v39  ;;  %v5534_v41 = vsub.f32 %v4435_v11, %v5503_v31  ;;  %v1176_v11 = vsub.f32 %v5486_v55, %v8375_v53  ;;  %v1182_v53 = vsub.f32 %v5511_v29, %v8377_v58  ;;  %v926_v58 = vand.u32 4294901760, %v925_v57  ;;  %v4428_v57 = vld [vmem:[%s8339_s2 + $0x1a8] sm:$0xff] }
  0x89   :  { %820 = vmatpush.msrb.mxu0 %v5442_v6  ;;  %971 = vmatpush.msrb.mxu2 %v5446_v54  ;;  %v5576_v61 = vsub.f32 %v4433_v1, %v5544_v63  ;;  %v1188_v1 = vsub.f32 %v5527_v19, %v8378_v20  ;;  %v5611_v48 = vand.u32 4294901760, %v4429_v40 }
  0x8a   :  { %897 = vmatpush.msrb.mxu1 %v896_v12  ;;  %1010 = vmatpush.msrb.mxu3 %v5397_v50  ;;  %v5552_v12 = vsub.f32 %v4434_v23, %v5516_v32  ;;  %v8381_v23 = vand.u32 4294901760, %v5534_v41  ;;  %v1177_v59 = vand.u32 4294901760, %v1176_v11  ;;  %v1183_v43 = vand.u32 4294901760, %v1182_v53  ;;  %v4427_v53 = vld [vmem:[%s8339_s2 + $0x1a0] sm:$0xff] }
  0x8b   :  { %822 = vmatpush.msrb.mxu0 %v5459_v3  ;;  %974 = vmatpush.msrb.mxu2 %v5463_v7  ;;  %v8380_v11 = vand.u32 4294901760, %v5576_v61  ;;  %v1189_v34 = vand.u32 4294901760, %v1188_v1  ;;  %v5645_v1 = vsub.f32 %v4429_v40, %v5611_v48  ;;  %v5647_v5 = vand.u32 4294901760, %v4427_v53 }
  0x8c   :  { %903 = vmatpush.msrb.mxu1 %v902_v10  ;;  %1012 = vmatpush.msrb.mxu3 %v5410_v56  ;;  %v4430_v10 = vld [vmem:[%s8339_s2 + $0x1b8] sm:$0xff] }
  0x8d   :  { %1029 = vmatpush.msra.mxu0 %v834_v45  ;;  %977 = vmatpush.msrb.mxu2 %v5476_v35  ;;  %v5578_v45 = vand.u32 4294901760, %v4431_v42 }
  0x8e   :  { %909 = vmatpush.msrb.mxu1 %v908_v18  ;;  %1014 = vmatpush.msrb.mxu3 %v5425_v24  ;;  %v8379_v18 = vand.u32 4294901760, %v5552_v12 }
  0x8f   :  { %1033 = vmatpush.msra.mxu0 %v840_v21  ;;  %980 = vmatpush.msrb.mxu2 %v5494_v33  ;;  %v5594_v21 = vand.u32 4294901760, %v4430_v10  ;;  %v5609_v20 = vsub.f32 %v4431_v42, %v5578_v45 }
  0x90   :  { %915 = vmatpush.msrb.mxu1 %v914_v36  ;;  %1016 = vmatpush.msrb.mxu3 %v5442_v6  ;;  %v1194_v36 = vsub.f32 %v5534_v41, %v8381_v23 }
  0x91   :  { %1037 = vmatpush.msra.mxu0 %v846_v62  ;;  %1133 = vmatpush.msra.mxu2 %v5453_v2  ;;  %v1200_v62 = vsub.f32 %v5552_v12, %v8379_v18  ;;  %v5629_v42 = vsub.f32 %v4430_v10, %v5594_v21  ;;  %v8383_v10 = vand.u32 4294901760, %v5609_v20 }
  0x92   :  { %921 = vmatpush.msrb.mxu1 %v920_v22  ;;  %1018 = vmatpush.msrb.mxu3 %v5459_v3  ;;  %v5631_v22 = vand.u32 4294901760, %v4428_v57  ;;  %v1195_v18 = vand.u32 4294901760, %v1194_v36 }
  0x93   :  { %1041 = vmatpush.msra.mxu0 %v852_v15  ;;  %1135 = vmatpush.msra.mxu2 %v5478_v49  ;;  %v8382_v15 = vand.u32 4294901760, %v5592_v60  ;;  %v1201_v36 = vand.u32 4294901760, %v1200_v62 }
  0x94   :  { %1178 = vmatpush.msra.mxu3 %v1177_v59  ;;  %927 = vmatpush.msrb.mxu1 %v926_v58  ;;  %v4426_v59 = vld [vmem:[%s8339_s2 + $0x198] sm:$0xff]  ;;  %v1206_v58 = vsub.f32 %v5576_v61, %v8380_v11  ;;  %v1223_v11 = vand.u32 4294901760, %v5629_v42  ;;  %v5659_v40 = vsub.f32 %v4428_v57, %v5631_v22  ;;  %v1218_v57 = vsub.f32 %v5609_v20, %v8383_v10 }
  0x95   :  { %1045 = vmatpush.msra.mxu0 %v858_v52  ;;  %1137 = vmatpush.msra.mxu2 %v5496_v30  ;;  %v8507_v52 = vand.u32 4294901760, %v5335_v9  ;;  %v5661_v23 = vand.u32 4294901760, %v4426_v59  ;;  %v4425_v9 = vld [vmem:[%s8339_s2 + $0x190] sm:$0xff] }
  0x96   :  { %1096 = vmatpush.msra.mxu1 %v5238_v38  ;;  %1184 = vmatpush.msra.mxu3 %v1183_v43  ;;  %v756_v38 = vld [vmem:[%s5625_s5] sm:$0xff]  ;;  %v1212_v43 = vsub.f32 %v5592_v60, %v8382_v15  ;;  %v5677_v15 = vsub.f32 %v4427_v53, %v5647_v5  ;;  %v1224_v53 = vsub.f32 %v5629_v42, %v1223_v11 }
  0x97   :  { %1049 = vmatpush.msra.mxu0 %v8507_v52  ;;  %1139 = vmatpush.msra.mxu2 %v5503_v31  ;;  %v5669_v62 = vand.u32 4294901760, %v756_v38  ;;  %v8384_v52 = vand.u32 4294901760, %v5645_v1  ;;  %v5693_v10 = vsub.f32 %v4426_v59, %v5661_v23 }
  0x98   :  { %1098 = vmatpush.msra.mxu1 %v5248_v27  ;;  %1190 = vmatpush.msra.mxu3 %v1189_v34  ;;  %v8508_v27 = vand.u32 4294901760, %v5351_v25  ;;  %v1207_v34 = vand.u32 4294901760, %v1206_v58  ;;  %v4424_v25 = vld [vmem:[%s8339_s2 + $0x188] sm:$0xff]  ;;  %v1213_v58 = vand.u32 4294901760, %v1212_v43  ;;  %v1219_v43 = vand.u32 4294901760, %v1218_v57 }
  0x99   :  { %1141 = vmatpush.msra.mxu2 %v5516_v32  ;;  %v1241_v59 = vand.u32 4294901760, %v5677_v15  ;;  %929 = vmatmul.f32.vlgmr.msrb.gmra.mxu1 %v5669_v62 }
  0x9a   :  { %1053 = vmatpush.msra.mxu0 %v8508_v27  ;;  %1100 = vmatpush.msra.mxu1 %v5258_v47  ;;  %v8509_v47 = vand.u32 4294901760, %v5367_v26  ;;  %v8385_v27 = vand.u32 4294901760, %v5659_v40  ;;  %v8510_v26 = vand.u32 4294901760, %v5373_v28  ;;  %v1230_v28 = vsub.f32 %v5645_v1, %v8384_v52 }
  0x9b   :  { %1196 = vmatpush.msra.mxu3 %v1195_v18  ;;  %v5685_v18 = vand.u32 4294901760, %v4425_v9  ;;  %1143 = vmatpush.msra.mxu2 %v5544_v63 }
  0x9c   :  { %1057 = vmatpush.msra.mxu0 %v8509_v47  ;;  %1102 = vmatpush.msra.mxu1 %v5271_v13  ;;  %v5699_v13 = vsub.f32 %v756_v38, %v5669_v62  ;;  %v5701_v47 = vand.u32 4294901760, %v4424_v25  ;;  %v1236_v57 = vsub.f32 %v5659_v40, %v8385_v27  ;;  %v8513_v27 = vand.u32 4294901760, %v5428_v51 }
  0x9d   :  { %1202 = vmatpush.msra.mxu3 %v1201_v36  ;;  %v4423_v36 = vld [vmem:[%s8339_s2 + $0x180] sm:$0xff]  ;;  %1145 = vmatpush.msra.mxu2 %v5562_v46  ;;  %v5715_v38 = vsub.f32 %v4425_v9, %v5685_v18 }
  0x9e   :  { %1061 = vmatpush.msra.mxu0 %v8510_v26  ;;  %1104 = vmatpush.msra.mxu1 %v5284_v16  ;;  %v8511_v16 = vand.u32 4294901760, %v5388_v44  ;;  %v1247_v26 = vand.u32 4294901760, %v5693_v10  ;;  %v5722_v52 = vand.u32 4294901760, %v4423_v36  ;;  %v8512_v44 = vand.u32 4294901760, %v5413_v8 }
  0x9f   :  { %1208 = vmatpush.msra.mxu3 %v1207_v34  ;;  %1147 = vmatpush.msra.mxu2 %v5578_v45  ;;  %v1225_v34 = vand.u32 4294901760, %v1224_v53  ;;  %v5729_v9 = vsub.f32 %v4424_v25, %v5701_v47  ;;  %v1242_v53 = vsub.f32 %v5677_v15, %v1241_v59  ;;  %v1237_v8 = vand.u32 4294901760, %v1236_v57 }
  0xa0   :  { %1065 = vmatpush.msra.mxu0 %v8511_v16  ;;  %1106 = vmatpush.msra.mxu1 %v5298_v0  ;;  %v825_v0 = vand.u32 4294901760, %v5699_v13  ;;  %v757_v16 = vld [vmem:[%s5625_s5 + $0x8] sm:$0xff]  ;;  %v1248_v25 = vsub.f32 %v5693_v10, %v1247_v26  ;;  %v8515_v57 = vand.u32 4294901760, %v5463_v7 }
  0xa1   :  { %1214 = vmatpush.msra.mxu3 %v1213_v58  ;;  %1149 = vmatpush.msra.mxu2 %v5594_v21  ;;  %v1231_v58 = vand.u32 4294901760, %v1230_v28  ;;  %v8514_v28 = vand.u32 4294901760, %v5446_v54  ;;  %v1259_v51 = vand.u32 4294901760, %v5729_v9 }
  0xa2   :  { %1069 = vmatpush.msra.mxu0 %v8512_v44  ;;  %1108 = vmatpush.msra.mxu1 %v5315_v4  ;;  %v1253_v4 = vand.u32 4294901760, %v5715_v38  ;;  %v8516_v44 = vand.u32 4294901760, %v5476_v35 }
  0xa3   :  { %1220 = vmatpush.msra.mxu3 %v1219_v43  ;;  %1151 = vmatpush.msra.mxu2 %v5611_v48  ;;  %v5745_v43 = vsub.f32 %v4423_v36, %v5722_v52 }
  0xa4   :  { %1073 = vmatpush.msra.mxu0 %v8513_v27  ;;  %1110 = vmatpush.msra.mxu1 %v5331_v37  ;;  %v826_v37 = vsub.f32 %v5699_v13, %v825_v0  ;;  %v5752_v27 = vand.u32 4294901760, %v757_v16  ;;  %v1254_v54 = vsub.f32 %v5715_v38, %v1253_v4 }
  0xa5   :  { %1226 = vmatpush.msra.mxu3 %v1225_v34  ;;  %1153 = vmatpush.msra.mxu2 %v5631_v22  ;;  %v1243_v34 = vand.u32 4294901760, %v1242_v53  ;;  %v1265_v36 = vand.u32 4294901760, %v5745_v43  ;;  %v8517_v53 = vand.u32 4294901760, %v5494_v33  ;;  %v8518_v33 = vand.u32 4294901760, %v5486_v55 }
  0xa6   :  { %1077 = vmatpush.msra.mxu0 %v8514_v28  ;;  %1112 = vmatpush.msra.mxu1 %v5342_v17  ;;  %v1249_v17 = vand.u32 4294901760, %v1248_v25  ;;  %v5770_v7 = vsub.f32 %v757_v16, %v5752_v27  ;;  %v1255_v35 = vand.u32 4294901760, %v1254_v54 }
  0xa7   :  { %1232 = vmatpush.msra.mxu3 %v1231_v58  ;;  %1155 = vmatpush.msra.mxu2 %v5647_v5  ;;  %v827_v58 = vand.u32 4294901760, %v826_v37 }
  0xa8   :  { %1081 = vmatpush.msra.mxu0 %v8515_v57  ;;  %1114 = vmatpush.msra.mxu1 %v5355_v14  ;;  %v1260_v14 = vsub.f32 %v5729_v9, %v1259_v51 }
  0xa9   :  { %1238 = vmatpush.msra.mxu3 %v1237_v8  ;;  %1157 = vmatpush.msra.mxu2 %v5661_v23  ;;  %v1166_v8 = vand.u32 4294901760, %v5770_v7 }
  0xaa   :  { %1085 = vmatpush.msra.mxu0 %v8516_v44  ;;  %1116 = vmatpush.msra.mxu1 %v5382_v39  ;;  %v1266_v39 = vsub.f32 %v5745_v43, %v1265_v36  ;;  %v1261_v16 = vand.u32 4294901760, %v1260_v14 }
  0xab   :  { %1244 = vmatpush.msra.mxu3 %v1243_v34  ;;  %1159 = vmatpush.msra.mxu2 %v5685_v18 }
  0xac   :  { %1089 = vmatpush.msra.mxu0 %v8517_v53  ;;  %1118 = vmatpush.msra.mxu1 %v5397_v50  ;;  %v1267_v50 = vand.u32 4294901760, %v1266_v39  ;;  %v4446_v39 = vld [vmem:[%s8339_s2 + $0x220] sm:$0xff] }
  0xad   :  { %1250 = vmatpush.msra.mxu3 %v1249_v17  ;;  %828 = vmatmul.f32.vlgmr.msrb.gmra.mxu0 %v827_v58 }
  0xae   :  { %1120 = vmatpush.msra.mxu1 %v5410_v56  ;;  %1276 = vmatpush.msrb.mxu0 %v5486_v55  ;;  %v1167_v56 = vsub.f32 %v5770_v7, %v1166_v8  ;;  %v8520_v55 = vand.u32 4294901760, %v5527_v19 }
  0xaf   :  { %1161 = vmatpush.msra.mxu2 %v5701_v47  ;;  %1256 = vmatpush.msra.mxu3 %v1255_v35 }
  0xb0   :  { %983 = vmatmul.f32.vlgmr.msrb.gmra.mxu2 %v5699_v13  ;;  %1279 = vmatpush.msrb.mxu0 %v5511_v29  ;;  %v1168_v13 = vand.u32 4294901760, %v1167_v56 }
  0xb1   :  { %1122 = vmatpush.msra.mxu1 %v5425_v24  ;;  %1163 = vmatpush.msra.mxu2 %v5722_v52  ;;  %v8519_v24 = vand.u32 4294901760, %v5511_v29 }
  0xb2   :  { %1262 = vmatpush.msra.mxu3 %v1261_v16  ;;  %1282 = vmatpush.msrb.mxu0 %v5527_v19  ;;  %v8522_v19 = vand.u32 4294901760, %v5552_v12 }
  0xb3   :  { %1022 = vmatmul.f32.vlgmr.msrb.gmra.mxu3 %v825_v0  ;;  %1370 = vmatpush.msrb.mxu2 %v8518_v33  ;;  %v4445_v33 = vld [vmem:[%s8339_s2 + $0x218] sm:$0xff] }
  0xb4   :  { %1124 = vmatpush.msra.mxu1 %v5442_v6  ;;  %1268 = vmatpush.msra.mxu3 %v1267_v50  ;;  %v8521_v6 = vand.u32 4294901760, %v5534_v41 }
  0xb5   :  { %1285 = vmatpush.msrb.mxu0 %v5534_v41  ;;  %1374 = vmatpush.msrb.mxu2 %v8519_v24  ;;  %v4454_v41 = vld [vmem:[%s8339_s2 + $0x260] sm:$0xff] }
  0xb6   :  { %1437 = vmatpush.msrb.mxu3 %v5453_v2  ;;  %1126 = vmatpush.msra.mxu1 %v5459_v3  ;;  %v8524_v3 = vand.u32 4294901760, %v5592_v60 }
  0xb7   :  { %1288 = vmatpush.msrb.mxu0 %v5552_v12  ;;  %1378 = vmatpush.msrb.mxu2 %v8520_v55  ;;  %v6006_v55 = vand.u32 4294901760, %v4446_v39 }
  0xb8   :  { %1329 = vmatpush.msrb.mxu1 %v5453_v2  ;;  %1439 = vmatpush.msrb.mxu3 %v5478_v49  ;;  %v8523_v2 = vand.u32 4294901760, %v5576_v61 }
  0xb9   :  { %1169 = vmatmul.f32.vlgmr.msra.gmra.mxu2 %v1168_v13  ;;  %1291 = vmatpush.msrb.mxu0 %v5576_v61 }
  0xba   :  { %1331 = vmatpush.msrb.mxu1 %v5478_v49  ;;  %1382 = vmatpush.msrb.mxu2 %v8521_v6  ;;  %v8525_v49 = vand.u32 4294901760, %v5609_v20 }
  0xbb   :  { %1441 = vmatpush.msrb.mxu3 %v5496_v30  ;;  %1091 = vmatmul.f32.vlgmr.msra.gmra.mxu0 %v5669_v62 }
  0xbc   :  { %1270 = vmatmul.f32.vlgmr.msra.gmra.mxu3 %v5752_v27  ;;  %1294 = vmatpush.msrb.mxu0 %v5592_v60  ;;  %v5883_v60 = vand.u32 4294901760, %v4454_v41 }
  0xbd   :  { %1333 = vmatpush.msrb.mxu1 %v5496_v30  ;;  %1386 = vmatpush.msrb.mxu2 %v8522_v19  ;;  %v4455_v30 = vld [vmem:[%s8339_s2 + $0x268] sm:$0xff] }
  0xbe   :  { %1443 = vmatpush.msrb.mxu3 %v5503_v31  ;;  %1128 = vmatmul.f32.vlgmr.msra.gmra.mxu1 %v5669_v62  ;;  %v5870_v12 = vand.u32 4294901760, %v4455_v30 }
  0xbf   :  { %1297 = vmatpush.msrb.mxu0 %v5609_v20  ;;  %1335 = vmatpush.msrb.mxu1 %v5503_v31  ;;  %v4456_v20 = vld [vmem:[%s8339_s2 + $0x270] sm:$0xff]  ;;  %v8527_v31 = vand.u32 4294901760, %v5659_v40 }
  0xc0   :  { %1390 = vmatpush.msrb.mxu2 %v8523_v2  ;;  %1445 = vmatpush.msrb.mxu3 %v5516_v32  ;;  %v5860_v29 = vand.u32 4294901760, %v4456_v20 }
  0xc1   :  { %1300 = vmatpush.msrb.mxu0 %v5629_v42  ;;  %1337 = vmatpush.msrb.mxu1 %v5516_v32  ;;  %v4457_v32 = vld [vmem:[%s8339_s2 + $0x278] sm:$0xff]  ;;  %v5900_v42 = vsub.f32 %v4455_v30, %v5870_v12 }
  0xc2   :  { %1394 = vmatpush.msrb.mxu2 %v8524_v3  ;;  %1447 = vmatpush.msrb.mxu3 %v5544_v63  ;;  %v6014_v3 = vand.u32 4294901760, %v4445_v33 }
  0xc3   :  { %1303 = vmatpush.msrb.mxu0 %v5645_v1  ;;  %1339 = vmatpush.msrb.mxu1 %v5544_v63  ;;  %v8526_v63 = vand.u32 4294901760, %v5645_v1 }
  0xc4   :  { %1398 = vmatpush.msrb.mxu2 %v8525_v49  ;;  %1449 = vmatpush.msrb.mxu3 %v5562_v46 }
  0xc5   :  { %1306 = vmatpush.msrb.mxu0 %v5659_v40  ;;  %1341 = vmatpush.msrb.mxu1 %v5562_v46  ;;  %v5850_v46 = vand.u32 4294901760, %v4457_v32 }
  0xc6   :  { %1402 = vmatpush.msrb.mxu2 %v1223_v11  ;;  %1451 = vmatpush.msrb.mxu3 %v5578_v45  ;;  %v4452_v11 = vld [vmem:[%s8339_s2 + $0x250] sm:$0xff] }
  0xc7   :  { %1309 = vmatpush.msrb.mxu0 %v5677_v15  ;;  %1343 = vmatpush.msrb.mxu1 %v5578_v45  ;;  %v5873_v61 = vsub.f32 %v4457_v32, %v5850_v46  ;;  %v4453_v45 = vld [vmem:[%s8339_s2 + $0x258] sm:$0xff]  ;;  %v4444_v32 = vld [vmem:[%s8339_s2 + $0x210] sm:$0xff] }
  0xc8   :  { %1406 = vmatpush.msrb.mxu2 %v8526_v63  ;;  %1453 = vmatpush.msrb.mxu3 %v5594_v21 }
  0xc9   :  { %1312 = vmatpush.msrb.mxu0 %v5693_v10  ;;  %1345 = vmatpush.msrb.mxu1 %v5594_v21  ;;  %v5886_v21 = vsub.f32 %v4456_v20, %v5860_v29  ;;  %v1558_v15 = vand.u32 4294901760, %v5873_v61  ;;  %v4451_v10 = vld [vmem:[%s8339_s2 + $0x248] sm:$0xff] }
  0xca   :  { %1410 = vmatpush.msrb.mxu2 %v8527_v31  ;;  %1455 = vmatpush.msrb.mxu3 %v5611_v48 }
  0xcb   :  { %1315 = vmatpush.msrb.mxu0 %v5715_v38  ;;  %1347 = vmatpush.msrb.mxu1 %v5611_v48  ;;  %v5896_v48 = vand.u32 4294901760, %v4453_v45  ;;  %v1564_v1 = vand.u32 4294901760, %v5886_v21  ;;  %v206_v40 = vpop.f32.mrf.mxu1  ;;  %v1559_v62 = vsub.f32 %v5873_v61, %v1558_v15  ;;  %v8399_v38 = vand.u32 4294901760, %v5900_v42 }
  0xcc   :  { %1414 = vmatpush.msrb.mxu2 %v1241_v59  ;;  %1457 = vmatpush.msrb.mxu3 %v5631_v22  ;;  %v5927_v59 = vand.u32 4294901760, %v4451_v10 }
  0xcd   :  { %1318 = vmatpush.msrb.mxu0 %v5729_v9  ;;  %1349 = vmatpush.msrb.mxu1 %v5631_v22  ;;  %v5904_v22 = vand.u32 4294901760, %v4452_v11  ;;  %v105_v9 = vpop.f32.mrf.mxu0  ;;  %v1560_v34 = vand.u32 4294901760, %v1559_v62  ;;  %v260_v57 = vpop.f32.mrf.mxu2  ;;  %v1571_v54 = vsub.f32 %v5900_v42, %v8399_v38  ;;  %v6043_v62 = vsub.f32 %v4446_v39, %v6006_v55 }
  0xce   :  { %1418 = vmatpush.msrb.mxu2 %v1247_v26  ;;  %1459 = vmatpush.msrb.mxu3 %v5647_v5  ;;  %v4449_v26 = vld [vmem:[%s8339_s2 + $0x238] sm:$0xff]  ;;  %v207_v28 = vadd.f32 %v206_v40, %v105_v9  ;;  %v5963_v17 = vsub.f32 %v4451_v10, %v5927_v59  ;;  %v299_v16 = vpop.f32.mrf.mxu3 }
  0xcf   :  { %1321 = vmatpush.msrb.mxu0 %v5745_v43  ;;  %1351 = vmatpush.msrb.mxu1 %v5647_v5  ;;  %v5914_v5 = vsub.f32 %v4454_v41, %v5883_v60  ;;  %v5939_v0 = vsub.f32 %v4452_v11, %v5904_v22  ;;  %v5951_v37 = vand.u32 4294901760, %v4449_v26  ;;  %v1572_v50 = vand.u32 4294901760, %v1571_v54  ;;  %v4473_v11 = vld [vmem:[%s8339_s2 + $0x2f8] sm:$0xff] }
  0xd0   :  { %1422 = vmatpush.msrb.mxu2 %v1253_v4  ;;  %1461 = vmatpush.msrb.mxu3 %v5661_v23  ;;  %v1565_v4 = vsub.f32 %v5886_v21, %v1564_v1  ;;  %v261_v35 = vadd.f32 %v260_v57, %v207_v28  ;;  %v8392_v56 = vand.u32 4294901760, %v5963_v17  ;;  %v6054_v28 = vsub.f32 %v4445_v33, %v6014_v3 }
  0xd1   :  { %1324 = vmatmul.f32.vlgmr.msrb.gmra.mxu0 %v5770_v7  ;;  %1353 = vmatpush.msrb.mxu1 %v5661_v23  ;;  %v4450_v23 = vld [vmem:[%s8339_s2 + $0x240] sm:$0xff]  ;;  %v8398_v43 = vand.u32 4294901760, %v5914_v5 }
  0xd2   :  { %1516 = vmatpush.msra.mxu0 %v5850_v46  ;;  %1426 = vmatpush.msrb.mxu2 %v1259_v51  ;;  %v5946_v25 = vand.u32 4294901760, %v4450_v23  ;;  %v4448_v51 = vld [vmem:[%s8339_s2 + $0x230] sm:$0xff]  ;;  %v1566_v44 = vand.u32 4294901760, %v1565_v4  ;;  %v300_v2 = vadd.f32 %v299_v16, %v261_v35  ;;  %v1595_v30 = vsub.f32 %v5963_v17, %v8392_v56 }
  0xd3   :  { %1463 = vmatpush.msrb.mxu3 %v5685_v18  ;;  %1355 = vmatpush.msrb.mxu1 %v5685_v18  ;;  %v5931_v18 = vsub.f32 %v4453_v45, %v5896_v48  ;;  %v1577_v58 = vsub.f32 %v5914_v5, %v8398_v43  ;;  %v5976_v14 = vand.u32 4294901760, %v4448_v51  ;;  %v4443_v45 = vld [vmem:[%s8339_s2 + $0x208] sm:$0xff]  ;;  %v8386_v16 = vand.u32 4294901760, %v6043_v62 }
  0xd4   :  { %1518 = vmatpush.msra.mxu0 %v5860_v29  ;;  %1430 = vmatpush.msrb.mxu2 %v1265_v36  ;;  %v8393_v36 = vand.u32 4294901760, %v5939_v0  ;;  %v5979_v53 = vsub.f32 %v4450_v23, %v5946_v25  ;;  %v6039_v23 = vand.u32 4294901760, %v4444_v32  ;;  %v6057_v57 = vand.u32 4294901760, %v4443_v45 }
  0xd5   :  { %1465 = vmatpush.msrb.mxu3 %v5701_v47  ;;  %1432 = vmatmul.f32.vlgmr.msrb.gmra.mxu2 %v5752_v27  ;;  %v1578_v13 = vand.u32 4294901760, %v1577_v58  ;;  %v6010_v19 = vsub.f32 %v4448_v51, %v5976_v14  ;;  %v368_v20 = vpop.f32.mrf.mxu0  ;;  %v405_v51 = vpop.f32.mrf.mxu1  ;;  %v4472_v58 = vld [vmem:[%s8339_s2 + $0x2f0] sm:$0xff] }
  0xd6   :  { %1520 = vmatpush.msra.mxu0 %v5870_v12  ;;  %1659 = vmatpush.msra.mxu2 %v5873_v61  ;;  %v1589_v24 = vsub.f32 %v5939_v0, %v8393_v36  ;;  %v8391_v6 = vand.u32 4294901760, %v5979_v53  ;;  %v369_v9 = vadd.f32 %v368_v20, %v300_v2  ;;  %v446_v2 = vpop.f32.mrf.mxu2  ;;  %v6088_v20 = vsub.f32 %v4443_v45, %v6057_v57 }
  0xd7   :  { %1357 = vmatpush.msrb.mxu1 %v5701_v47  ;;  %1467 = vmatpush.msrb.mxu3 %v5722_v52  ;;  %v8397_v47 = vand.u32 4294901760, %v5931_v18  ;;  %v8388_v40 = vand.u32 4294901760, %v6010_v19 }
  0xd8   :  { %1469 = vmatmul.f32.vlgmr.msrb.gmra.mxu3 %v5752_v27  ;;  %1522 = vmatpush.msra.mxu0 %v5883_v60  ;;  %v4447_v27 = vld [vmem:[%s8339_s2 + $0x228] sm:$0xff]  ;;  %v1590_v41 = vand.u32 4294901760, %v1589_v24  ;;  %v1601_v10 = vsub.f32 %v5979_v53, %v8391_v6  ;;  %v8389_v24 = vand.u32 4294901760, %v6054_v28 }
  0xd9   :  { %1662 = vmatpush.msra.mxu2 %v5886_v21  ;;  %1712 = vmatpush.msra.mxu3 %v5850_v46  ;;  %v1583_v7 = vsub.f32 %v5931_v18, %v8397_v47  ;;  %v1613_v39 = vsub.f32 %v6010_v19, %v8388_v40 }
  0xda   :  { %1359 = vmatpush.msrb.mxu1 %v5722_v52  ;;  %1524 = vmatpush.msra.mxu0 %v5896_v48  ;;  %v5985_v52 = vsub.f32 %v4449_v26, %v5951_v37  ;;  %v4442_v26 = vld [vmem:[%s8339_s2 + $0x200] sm:$0xff]  ;;  %v1602_v35 = vand.u32 4294901760, %v1601_v10 }
  0xdb   :  { %1363 = vmatmul.f32.vlgmr.msrb.gmra.mxu1 %v1166_v8  ;;  %1665 = vmatpush.msra.mxu2 %v5900_v42  ;;  %v5994_v8 = vand.u32 4294901760, %v4447_v27  ;;  %v1584_v63 = vand.u32 4294901760, %v1583_v7  ;;  %v406_v7 = vadd.f32 %v405_v51, %v369_v9  ;;  %v1614_v45 = vand.u32 4294901760, %v1613_v39  ;;  %v4469_v51 = vld [vmem:[%s8339_s2 + $0x2d8] sm:$0xff]  ;;  %v547_v39 = vpop.f32.mrf.mxu3 }
  0xdc   :  { %1561 = vmatpush.msra.mxu1 %v1560_v34  ;;  %1714 = vmatpush.msra.mxu3 %v5860_v29  ;;  %v8390_v49 = vand.u32 4294901760, %v5985_v52  ;;  %v1596_v34 = vand.u32 4294901760, %v1595_v30  ;;  %v6093_v30 = vand.u32 4294901760, %v4472_v58 }
  0xdd   :  { %1526 = vmatpush.msra.mxu0 %v5904_v22  ;;  %1668 = vmatpush.msra.mxu2 %v5914_v5  ;;  %v6025_v31 = vsub.f32 %v4447_v27, %v5994_v8  ;;  %v6060_v27 = vand.u32 4294901760, %v4473_v11 }
  0xde   :  { %1567 = vmatpush.msra.mxu1 %v1566_v44  ;;  %1716 = vmatpush.msra.mxu3 %v5870_v12  ;;  %v1607_v4 = vsub.f32 %v5985_v52, %v8390_v49  ;;  %v6064_v44 = vand.u32 4294901760, %v4442_v26 }
  0xdf   :  { %1528 = vmatpush.msra.mxu0 %v5927_v59  ;;  %1671 = vmatpush.msra.mxu2 %v5931_v18  ;;  %v8387_v54 = vand.u32 4294901760, %v6025_v31 }
  0xe0   :  { %1573 = vmatpush.msra.mxu1 %v1572_v50  ;;  %1718 = vmatpush.msra.mxu3 %v5883_v60  ;;  %v6075_v50 = vsub.f32 %v4444_v32, %v6039_v23  ;;  %v1608_v33 = vand.u32 4294901760, %v1607_v4  ;;  %v6101_v10 = vsub.f32 %v4442_v26, %v6064_v44  ;;  %v1631_v26 = vsub.f32 %v6054_v28, %v8389_v24 }
  0xe1   :  { %1530 = vmatpush.msra.mxu0 %v5946_v25  ;;  %1674 = vmatpush.msra.mxu2 %v5939_v0  ;;  %v1619_v32 = vsub.f32 %v6025_v31, %v8387_v54  ;;  %v8396_v54 = vand.u32 4294901760, %v6088_v20  ;;  %v6129_v24 = vand.u32 4294901760, %v4469_v51 }
  0xe2   :  { %1579 = vmatpush.msra.mxu1 %v1578_v13  ;;  %1720 = vmatpush.msra.mxu3 %v5896_v48  ;;  %v4471_v13 = vld [vmem:[%s8339_s2 + $0x2e8] sm:$0xff]  ;;  %v8394_v9 = vand.u32 4294901760, %v6075_v50  ;;  %v1632_v36 = vand.u32 4294901760, %v1631_v26 }
  0xe3   :  { %1532 = vmatpush.msra.mxu0 %v5951_v37  ;;  %1677 = vmatpush.msra.mxu2 %v5963_v17  ;;  %v6108_v4 = vand.u32 4294901760, %v4471_v13 }
  0xe4   :  { %1585 = vmatpush.msra.mxu1 %v1584_v63  ;;  %1722 = vmatpush.msra.mxu3 %v5904_v22  ;;  %v6091_v63 = vsub.f32 %v4473_v11, %v6060_v27  ;;  %v1625_v11 = vsub.f32 %v6043_v62, %v8386_v16  ;;  %v1620_v16 = vand.u32 4294901760, %v1619_v32 }
  0xe5   :  { %1534 = vmatpush.msra.mxu0 %v5976_v14  ;;  %1680 = vmatpush.msra.mxu2 %v5979_v53  ;;  %v6139_v6 = vsub.f32 %v4471_v13, %v6108_v4  ;;  %v1643_v13 = vsub.f32 %v6088_v20, %v8396_v54 }
  0xe6   :  { %1591 = vmatpush.msra.mxu1 %v1590_v41  ;;  %1724 = vmatpush.msra.mxu3 %v5927_v59  ;;  %v4470_v41 = vld [vmem:[%s8339_s2 + $0x2e0] sm:$0xff]  ;;  %v8395_v40 = vand.u32 4294901760, %v6091_v63  ;;  %v1626_v32 = vand.u32 4294901760, %v1625_v11  ;;  %v4467_v11 = vld [vmem:[%s8339_s2 + $0x2c8] sm:$0xff] }
  0xe7   :  { %1536 = vmatpush.msra.mxu0 %v5994_v8  ;;  %1683 = vmatpush.msra.mxu2 %v5985_v52  ;;  %v8402_v43 = vand.u32 4294901760, %v6139_v6 }
  0xe8   :  { %1597 = vmatpush.msra.mxu1 %v1596_v34  ;;  %1726 = vmatpush.msra.mxu3 %v5946_v25  ;;  %v447_v34 = vadd.f32 %v446_v2, %v406_v7  ;;  %v6124_v7 = vsub.f32 %v4472_v58, %v6093_v30  ;;  %v8400_v2 = vand.u32 4294901760, %v6101_v10  ;;  %v601_v49 = vpop.f32.mrf.mxu0  ;;  %v1637_v58 = vsub.f32 %v6075_v50, %v8394_v9 }
  0xe9   :  { %1538 = vmatpush.msra.mxu0 %v6006_v55  ;;  %1686 = vmatpush.msra.mxu2 %v6010_v19  ;;  %v6167_v9 = vsub.f32 %v4469_v51, %v6129_v24  ;;  %v1912_v21 = vsub.f32 %v6139_v6, %v8402_v43 }
  0xea   :  { %1603 = vmatpush.msra.mxu1 %v1602_v35  ;;  %1728 = vmatpush.msra.mxu3 %v5951_v37  ;;  %v6118_v35 = vand.u32 4294901760, %v4470_v41  ;;  %v548_v56 = vadd.f32 %v547_v39, %v447_v34  ;;  %v1900_v34 = vsub.f32 %v6091_v63, %v8395_v40  ;;  %v8401_v26 = vand.u32 4294901760, %v6124_v7  ;;  %v4466_v40 = vld [vmem:[%s8339_s2 + $0x2c0] sm:$0xff] }
  0xeb   :  { %1540 = vmatpush.msra.mxu0 %v6014_v3  ;;  %1689 = vmatpush.msra.mxu2 %v6025_v31  ;;  %v1638_v54 = vand.u32 4294901760, %v1637_v58  ;;  %v1644_v58 = vand.u32 4294901760, %v1643_v13  ;;  %v8530_v13 = vand.u32 4294901760, %v5914_v5  ;;  %v1913_v5 = vand.u32 4294901760, %v1912_v21 }
  0xec   :  { %1609 = vmatpush.msra.mxu1 %v1608_v33  ;;  %1730 = vmatpush.msra.mxu3 %v5976_v14  ;;  %v4468_v33 = vld [vmem:[%s8339_s2 + $0x2d0] sm:$0xff] }
  0xed   :  { %1542 = vmatpush.msra.mxu0 %v6039_v23  ;;  %1692 = vmatpush.msra.mxu2 %v6043_v62  ;;  %v6159_v39 = vand.u32 4294901760, %v4468_v33 }
  0xee   :  { %1615 = vmatpush.msra.mxu1 %v1614_v45  ;;  %1732 = vmatpush.msra.mxu3 %v5994_v8  ;;  %v6146_v45 = vsub.f32 %v4470_v41, %v6118_v35  ;;  %v602_v41 = vadd.f32 %v601_v49, %v548_v56  ;;  %v6174_v56 = vand.u32 4294901760, %v4467_v11 }
  0xef   :  { %1544 = vmatpush.msra.mxu0 %v6057_v57  ;;  %1695 = vmatpush.msra.mxu2 %v6054_v28  ;;  %v6188_v61 = vsub.f32 %v4468_v33, %v6159_v39 }
  0xf0   :  { %1621 = vmatpush.msra.mxu1 %v1620_v16  ;;  %1734 = vmatpush.msra.mxu3 %v6006_v55  ;;  %v1649_v16 = vsub.f32 %v6101_v10, %v8400_v2  ;;  %v1906_v2 = vsub.f32 %v6124_v7, %v8401_v26  ;;  %v4464_v26 = vld [vmem:[%s8339_s2 + $0x2b0] sm:$0xff] }
  0xf1   :  { %1546 = vmatpush.msra.mxu0 %v6064_v44  ;;  %1698 = vmatpush.msra.mxu2 %v6075_v50  ;;  %v8403_v43 = vand.u32 4294901760, %v6188_v61 }
  0xf2   :  { %1627 = vmatpush.msra.mxu1 %v1626_v32  ;;  %1736 = vmatpush.msra.mxu3 %v6014_v3  ;;  %v640_v47 = vpop.f32.mrf.mxu1  ;;  %v709_v38 = vpop.f32.mrf.mxu2  ;;  %v4465_v32 = vld [vmem:[%s8339_s2 + $0x2b8] sm:$0xff] }
  0xf3   :  { %1753 = vmatpush.msrb.mxu0 %v1558_v15  ;;  %1701 = vmatpush.msra.mxu2 %v6088_v20  ;;  %v641_v49 = vadd.f32 %v640_v47, %v602_v41  ;;  %v6190_v15 = vand.u32 4294901760, %v4466_v40  ;;  %v1901_v47 = vand.u32 4294901760, %v1900_v34  ;;  %v6206_v33 = vand.u32 4294901760, %v4465_v32 }
  0xf4   :  { %1633 = vmatpush.msra.mxu1 %v1632_v36  ;;  %1738 = vmatpush.msra.mxu3 %v6039_v23  ;;  %v1650_v36 = vand.u32 4294901760, %v1649_v16 }
  0xf5   :  { %1757 = vmatpush.msrb.mxu0 %v1564_v1  ;;  %1704 = vmatpush.msra.mxu2 %v6101_v10  ;;  %v710_v41 = vadd.f32 %v709_v38, %v641_v49  ;;  %v746_v51 = vpop.f32.mrf.mxu3  ;;  %v6204_v1 = vsub.f32 %v4467_v11, %v6174_v56  ;;  %v8528_v38 = vand.u32 4294901760, %v5900_v42  ;;  %v4463_v49 = vld [vmem:[%s8339_s2 + $0x2a8] sm:$0xff]  ;;  %v1907_v11 = vand.u32 4294901760, %v1906_v2  ;;  %v4462_v2 = vld [vmem:[%s8339_s2 + $0x2a0] sm:$0xff] }
  0xf6   :  { %1639 = vmatpush.msra.mxu1 %v1638_v54  ;;  %1740 = vmatpush.msra.mxu3 %v6057_v57  ;;  %v8529_v54 = vand.u32 4294901760, %v6146_v45  ;;  %v6221_v42 = vsub.f32 %v4466_v40, %v6190_v15 }
  0xf7   :  { %1761 = vmatpush.msrb.mxu0 %v8528_v38  ;;  %1857 = vmatpush.msrb.mxu2 %v6060_v27  ;;  %v747_v16 = vadd.f32 %v746_v51, %v710_v41  ;;  %v6223_v38 = vand.u32 4294901760, %v4464_v26  ;;  %v8531_v51 = vand.u32 4294901760, %v6167_v9  ;;  %v8404_v40 = vand.u32 4294901760, %v6204_v1 }
  0xf8   :  { %v1918_v34 = vsub.f32 %v6146_v45, %v8529_v54  ;;  %1645 = vmatpush.msra.mxu1 %v1644_v58  ;;  %1742 = vmatpush.msra.mxu3 %v6064_v44  ;;  %v6242_v41 = vsub.f32 %v4465_v32, %v6206_v33  ;;  %v8532_v54 = vand.u32 4294901760, %v5931_v18  ;;  %v1930_v32 = vsub.f32 %v6188_v61, %v8403_v43 }
  0xf9   :  { %1765 = vmatpush.msrb.mxu0 %v8530_v13  ;;  %1859 = vmatpush.msrb.mxu2 %v6093_v30  ;;  %750 = vst.msk [vmem:[#allocation5] sm:$0xff] %vm749_vm0, %v747_v16  ;;  %v1924_v58 = vsub.f32 %v6167_v9, %v8531_v51  ;;  %v6244_v13 = vand.u32 4294901760, %v4463_v49  ;;  %v6258_v21 = vsub.f32 %v4464_v26, %v6223_v38  ;;  %v6260_v18 = vand.u32 4294901760, %v4462_v2 }
  0xfa   :  { %1902 = vmatpush.msrb.mxu3 %v1901_v47  ;;  %1651 = vmatpush.msra.mxu1 %v1650_v36  ;;  %v1919_v16 = vand.u32 4294901760, %v1918_v34  ;;  %v4461_v47 = vld [vmem:[%s8339_s2 + $0x298] sm:$0xff]  ;;  %v8405_v36 = vand.u32 4294901760, %v6221_v42  ;;  %v8533_v34 = vand.u32 4294901760, %v5939_v0  ;;  %v4460_v0 = vld [vmem:[%s8339_s2 + $0x290] sm:$0xff] }
  0xfb   :  { %1769 = vmatpush.msrb.mxu0 %v8532_v54  ;;  %1861 = vmatpush.msrb.mxu2 %v6108_v4  ;;  %v1925_v51 = vand.u32 4294901760, %v1924_v58  ;;  %v1947_v54 = vand.u32 4294901760, %v6242_v41  ;;  %v6272_v26 = vsub.f32 %v4463_v49, %v6244_v13  ;;  %v6274_v43 = vand.u32 4294901760, %v4461_v47 }
  0xfc   :  { %1820 = vmatpush.msrb.mxu1 %v5850_v46  ;;  %1908 = vmatpush.msrb.mxu3 %v1907_v11  ;;  %v1480_v46 = vld [vmem:[%s6238_s18] sm:$0xff]  ;;  %v1936_v11 = vsub.f32 %v6204_v1, %v8404_v40  ;;  %v1942_v49 = vsub.f32 %v6221_v42, %v8405_v36  ;;  %v6290_v40 = vsub.f32 %v4462_v2, %v6260_v18 }
  0xfd   :  { %1773 = vmatpush.msrb.mxu0 %v8533_v34  ;;  %1863 = vmatpush.msrb.mxu2 %v6118_v35  ;;  %v6282_v58 = vand.u32 4294901760, %v1480_v46  ;;  %v8406_v34 = vand.u32 4294901760, %v6258_v21  ;;  %v1948_v2 = vsub.f32 %v6242_v41, %v1947_v54  ;;  %v6306_v36 = vsub.f32 %v4461_v47, %v6274_v43 }
  0xfe   :  { %1822 = vmatpush.msrb.mxu1 %v5860_v29  ;;  %1914 = vmatpush.msrb.mxu3 %v1913_v5  ;;  %v8534_v29 = vand.u32 4294901760, %v5963_v17  ;;  %v1931_v5 = vand.u32 4294901760, %v1930_v32  ;;  %v4459_v17 = vld [vmem:[%s8339_s2 + $0x288] sm:$0xff]  ;;  %v1937_v32 = vand.u32 4294901760, %v1936_v11  ;;  %v1943_v11 = vand.u32 4294901760, %v1942_v49 }
  0xff   :  { %1865 = vmatpush.msrb.mxu2 %v6129_v24  ;;  %v1965_v47 = vand.u32 4294901760, %v6290_v40  ;;  %1653 = vmatmul.f32.vlgmr.msra.gmra.mxu1 %v6282_v58 }
 0x100   :  { %1777 = vmatpush.msrb.mxu0 %v8534_v29  ;;  %1824 = vmatpush.msrb.mxu1 %v5870_v12  ;;  %v8535_v12 = vand.u32 4294901760, %v5979_v53  ;;  %v8407_v29 = vand.u32 4294901760, %v6272_v26  ;;  %v8536_v53 = vand.u32 4294901760, %v5985_v52  ;;  %v1954_v52 = vsub.f32 %v6258_v21, %v8406_v34 }
 0x101   :  { %1920 = vmatpush.msrb.mxu3 %v1919_v16  ;;  %v6298_v16 = vand.u32 4294901760, %v4460_v0  ;;  %1867 = vmatpush.msrb.mxu2 %v6159_v39 }
 0x102   :  { %1781 = vmatpush.msrb.mxu0 %v8535_v12  ;;  %1826 = vmatpush.msrb.mxu1 %v5883_v60  ;;  %v6312_v60 = vsub.f32 %v1480_v46, %v6282_v58  ;;  %v6314_v12 = vand.u32 4294901760, %v4459_v17  ;;  %v1960_v49 = vsub.f32 %v6272_v26, %v8407_v29  ;;  %v8539_v29 = vand.u32 4294901760, %v6043_v62 }
 0x103   :  { %1926 = vmatpush.msrb.mxu3 %v1925_v51  ;;  %v4458_v51 = vld [vmem:[%s8339_s2 + $0x280] sm:$0xff]  ;;  %1869 = vmatpush.msrb.mxu2 %v6174_v56  ;;  %v6328_v46 = vsub.f32 %v4460_v0, %v6298_v16 }
 0x104   :  { %1785 = vmatpush.msrb.mxu0 %v8536_v53  ;;  %1828 = vmatpush.msrb.mxu1 %v5896_v48  ;;  %v8537_v48 = vand.u32 4294901760, %v6010_v19  ;;  %v1971_v53 = vand.u32 4294901760, %v6306_v36  ;;  %v6335_v34 = vand.u32 4294901760, %v4458_v51  ;;  %v8538_v19 = vand.u32 4294901760, %v6025_v31 }
 0x105   :  { %1932 = vmatpush.msrb.mxu3 %v1931_v5  ;;  %1871 = vmatpush.msrb.mxu2 %v6190_v15  ;;  %v1949_v5 = vand.u32 4294901760, %v1948_v2  ;;  %v6342_v0 = vsub.f32 %v4459_v17, %v6314_v12  ;;  %v1966_v2 = vsub.f32 %v6290_v40, %v1965_v47  ;;  %v1961_v31 = vand.u32 4294901760, %v1960_v49 }
 0x106   :  { %1789 = vmatpush.msrb.mxu0 %v8537_v48  ;;  %1830 = vmatpush.msrb.mxu1 %v5904_v22  ;;  %v1549_v22 = vand.u32 4294901760, %v6312_v60  ;;  %v1481_v48 = vld [vmem:[%s6238_s18 + $0x8] sm:$0xff]  ;;  %v1972_v17 = vsub.f32 %v6306_v36, %v1971_v53  ;;  %v8541_v49 = vand.u32 4294901760, %v6075_v50 }
 0x107   :  { %1938 = vmatpush.msrb.mxu3 %v1937_v32  ;;  %1873 = vmatpush.msrb.mxu2 %v6206_v33  ;;  %v1955_v32 = vand.u32 4294901760, %v1954_v52  ;;  %v8540_v52 = vand.u32 4294901760, %v6054_v28  ;;  %v1983_v62 = vand.u32 4294901760, %v6342_v0 }
 0x108   :  { %1793 = vmatpush.msrb.mxu0 %v8538_v19  ;;  %1832 = vmatpush.msrb.mxu1 %v5927_v59  ;;  %v1977_v59 = vand.u32 4294901760, %v6328_v46  ;;  %v8542_v19 = vand.u32 4294901760, %v6088_v20 }
 0x109   :  { %1944 = vmatpush.msrb.mxu3 %v1943_v11  ;;  %1875 = vmatpush.msrb.mxu2 %v6223_v38  ;;  %v6358_v11 = vsub.f32 %v4458_v51, %v6335_v34 }
 0x10a   :  { %1797 = vmatpush.msrb.mxu0 %v8539_v29  ;;  %1834 = vmatpush.msrb.mxu1 %v5946_v25  ;;  %v1550_v25 = vsub.f32 %v6312_v60, %v1549_v22  ;;  %v6365_v29 = vand.u32 4294901760, %v1481_v48  ;;  %v1978_v28 = vsub.f32 %v6328_v46, %v1977_v59 }
 0x10b   :  { %1950 = vmatpush.msrb.mxu3 %v1949_v5  ;;  %1877 = vmatpush.msrb.mxu2 %v6244_v13  ;;  %v1967_v5 = vand.u32 4294901760, %v1966_v2  ;;  %v1989_v51 = vand.u32 4294901760, %v6358_v11  ;;  %v8543_v2 = vand.u32 4294901760, %v6101_v10  ;;  %v8544_v10 = vand.u32 4294901760, %v6091_v63 }
 0x10c   :  { %1801 = vmatpush.msrb.mxu0 %v8540_v52  ;;  %1836 = vmatpush.msrb.mxu1 %v5951_v37  ;;  %v1973_v37 = vand.u32 4294901760, %v1972_v17  ;;  %v6383_v50 = vsub.f32 %v1481_v48, %v6365_v29  ;;  %v1979_v20 = vand.u32 4294901760, %v1978_v28  ;;  %v4483_v52 = vld [vmem:[%s8339_s2 + $0x330] sm:$0xff] }
 0x10d   :  { %1956 = vmatpush.msrb.mxu3 %v1955_v32  ;;  %1879 = vmatpush.msrb.mxu2 %v6260_v18  ;;  %v1551_v32 = vand.u32 4294901760, %v1550_v25 }
 0x10e   :  { %1805 = vmatpush.msrb.mxu0 %v8541_v49  ;;  %1838 = vmatpush.msrb.mxu1 %v5976_v14  ;;  %v1984_v14 = vsub.f32 %v6342_v0, %v1983_v62 }
 0x10f   :  { %1962 = vmatpush.msrb.mxu3 %v1961_v31  ;;  %1881 = vmatpush.msrb.mxu2 %v6274_v43  ;;  %v1890_v31 = vand.u32 4294901760, %v6383_v50 }
 0x110   :  { %1809 = vmatpush.msrb.mxu0 %v8542_v19  ;;  %1840 = vmatpush.msrb.mxu1 %v5994_v8  ;;  %v1990_v8 = vsub.f32 %v6358_v11, %v1989_v51  ;;  %v1985_v48 = vand.u32 4294901760, %v1984_v14 }
 0x111   :  { %1968 = vmatpush.msrb.mxu3 %v1967_v5  ;;  %1883 = vmatpush.msrb.mxu2 %v6298_v16 }
 0x112   :  { %1813 = vmatpush.msrb.mxu0 %v8543_v2  ;;  %1842 = vmatpush.msrb.mxu1 %v6006_v55  ;;  %v1991_v55 = vand.u32 4294901760, %v1990_v8  ;;  %v4481_v8 = vld [vmem:[%s8339_s2 + $0x320] sm:$0xff] }
 0x113   :  { %1974 = vmatpush.msrb.mxu3 %v1973_v37  ;;  %1552 = vmatmul.f32.vlgmr.msra.gmra.mxu0 %v1551_v32 }
 0x114   :  { %1844 = vmatpush.msrb.mxu1 %v6014_v3  ;;  %2000 = vmatpush.msra.mxu0 %v6091_v63  ;;  %v1891_v3 = vsub.f32 %v6383_v50, %v1890_v31  ;;  %v8546_v63 = vand.u32 4294901760, %v6139_v6 }
 0x115   :  { %1885 = vmatpush.msrb.mxu2 %v6314_v12  ;;  %1980 = vmatpush.msrb.mxu3 %v1979_v20 }
 0x116   :  { %1707 = vmatmul.f32.vlgmr.msra.gmra.mxu2 %v6312_v60  ;;  %2003 = vmatpush.msra.mxu0 %v6124_v7  ;;  %v1892_v60 = vand.u32 4294901760, %v1891_v3 }
 0x117   :  { %1846 = vmatpush.msrb.mxu1 %v6039_v23  ;;  %1887 = vmatpush.msrb.mxu2 %v6335_v34  ;;  %v8545_v23 = vand.u32 4294901760, %v6124_v7  ;;  %v4490_v7 = vld [vmem:[%s8339_s2 + $0x368] sm:$0xff] }
 0x118   :  { %1986 = vmatpush.msrb.mxu3 %v1985_v48  ;;  %2006 = vmatpush.msra.mxu0 %v6139_v6  ;;  %v8548_v6 = vand.u32 4294901760, %v6167_v9 }
 0x119   :  { %1746 = vmatmul.f32.vlgmr.msra.gmra.mxu3 %v1549_v22  ;;  %2094 = vmatpush.msra.mxu2 %v8544_v10 }
 0x11a   :  { %1848 = vmatpush.msrb.mxu1 %v6057_v57  ;;  %1992 = vmatpush.msrb.mxu3 %v1991_v55  ;;  %v8547_v57 = vand.u32 4294901760, %v6146_v45 }
 0x11b   :  { %2009 = vmatpush.msra.mxu0 %v6146_v45  ;;  %2098 = vmatpush.msra.mxu2 %v8545_v23  ;;  %v8553_v45 = vand.u32 4294901760, %v6272_v26  ;;  %v4480_v23 = vld [vmem:[%s8339_s2 + $0x318] sm:$0xff] }
 0x11c   :  { %2161 = vmatpush.msra.mxu3 %v6060_v27  ;;  %1850 = vmatpush.msrb.mxu1 %v6064_v44  ;;  %v8550_v44 = vand.u32 4294901760, %v6204_v1 }
 0x11d   :  { %2012 = vmatpush.msra.mxu0 %v6167_v9  ;;  %2102 = vmatpush.msra.mxu2 %v8546_v63  ;;  %v4491_v9 = vld [vmem:[%s8339_s2 + $0x370] sm:$0xff] }
 0x11e   :  { %2053 = vmatpush.msra.mxu1 %v6060_v27  ;;  %2163 = vmatpush.msra.mxu3 %v6093_v30  ;;  %v8549_v27 = vand.u32 4294901760, %v6188_v61 }
 0x11f   :  { %1893 = vmatmul.f32.vlgmr.msrb.gmra.mxu2 %v1892_v60  ;;  %2015 = vmatpush.msra.mxu0 %v6188_v61  ;;  %v6483_v61 = vand.u32 4294901760, %v4490_v7 }
 0x120   :  { %2055 = vmatpush.msra.mxu1 %v6093_v30  ;;  %2106 = vmatpush.msra.mxu2 %v8547_v57  ;;  %v8551_v30 = vand.u32 4294901760, %v6221_v42  ;;  %v6622_v57 = vand.u32 4294901760, %v4481_v8 }
 0x121   :  { %2165 = vmatpush.msra.mxu3 %v6108_v4  ;;  %1815 = vmatmul.f32.vlgmr.msrb.gmra.mxu0 %v6282_v58 }
 0x122   :  { %1994 = vmatmul.f32.vlgmr.msrb.gmra.mxu3 %v6365_v29  ;;  %2018 = vmatpush.msra.mxu0 %v6204_v1  ;;  %v4488_v1 = vld [vmem:[%s8339_s2 + $0x358] sm:$0xff] }
 0x123   :  { %2057 = vmatpush.msra.mxu1 %v6108_v4  ;;  %2110 = vmatpush.msra.mxu2 %v8548_v6  ;;  %v8552_v4 = vand.u32 4294901760, %v6258_v21 }
 0x124   :  { %2167 = vmatpush.msra.mxu3 %v6118_v35  ;;  %1852 = vmatmul.f32.vlgmr.msrb.gmra.mxu1 %v6282_v58 }
 0x125   :  { %2021 = vmatpush.msra.mxu0 %v6221_v42  ;;  %2059 = vmatpush.msra.mxu1 %v6118_v35 }
 0x126   :  { %2114 = vmatpush.msra.mxu2 %v8549_v27  ;;  %2169 = vmatpush.msra.mxu3 %v6129_v24 }
 0x127   :  { %2024 = vmatpush.msra.mxu0 %v6242_v41  ;;  %2061 = vmatpush.msra.mxu1 %v6129_v24  ;;  %v4492_v24 = vld [vmem:[%s8339_s2 + $0x378] sm:$0xff] }
 0x128   :  { %2118 = vmatpush.msra.mxu2 %v8550_v44  ;;  %2171 = vmatpush.msra.mxu3 %v6159_v39  ;;  %v6463_v35 = vand.u32 4294901760, %v4492_v24 }
 0x129   :  { %2027 = vmatpush.msra.mxu0 %v6258_v21  ;;  %2063 = vmatpush.msra.mxu1 %v6159_v39  ;;  %v6473_v39 = vand.u32 4294901760, %v4491_v9 }
 0x12a   :  { %2122 = vmatpush.msra.mxu2 %v8551_v30  ;;  %2173 = vmatpush.msra.mxu3 %v6174_v56  ;;  %v829_v22 = vpop.f32.mrf.mxu0  ;;  %v4479_v30 = vld [vmem:[%s8339_s2 + $0x310] sm:$0xff] }
 0x12b   :  { %2030 = vmatpush.msra.mxu0 %v6272_v26  ;;  %2065 = vmatpush.msra.mxu1 %v6174_v56  ;;  %v4489_v56 = vld [vmem:[%s8339_s2 + $0x360] sm:$0xff]  ;;  %v6499_v42 = vsub.f32 %v4491_v9, %v6473_v39  ;;  %v930_v26 = vpop.f32.mrf.mxu1 }
 0x12c   :  { %2126 = vmatpush.msra.mxu2 %v1947_v54  ;;  %2175 = vmatpush.msra.mxu3 %v6190_v15  ;;  %v931_v25 = vadd.f32 %v930_v26, %v829_v22  ;;  %v6653_v26 = vsub.f32 %v4481_v8, %v6622_v57 }
 0x12d   :  { %2033 = vmatpush.msra.mxu0 %v6290_v40  ;;  %2067 = vmatpush.msra.mxu1 %v6190_v15  ;;  %v6486_v15 = vsub.f32 %v4492_v24, %v6463_v35  ;;  %v6509_v40 = vand.u32 4294901760, %v4488_v1 }
 0x12e   :  { %2130 = vmatpush.msra.mxu2 %v8552_v4  ;;  %2177 = vmatpush.msra.mxu3 %v6206_v33 }
 0x12f   :  { %2036 = vmatpush.msra.mxu0 %v6306_v36  ;;  %2069 = vmatpush.msra.mxu1 %v6206_v33  ;;  %v6496_v33 = vand.u32 4294901760, %v4489_v56  ;;  %v2282_v41 = vand.u32 4294901760, %v6486_v15  ;;  %v4486_v36 = vld [vmem:[%s8339_s2 + $0x348] sm:$0xff] }
 0x130   :  { %2134 = vmatpush.msra.mxu2 %v8553_v45  ;;  %2179 = vmatpush.msra.mxu3 %v6223_v38 }
 0x131   :  { %2039 = vmatpush.msra.mxu0 %v6328_v46  ;;  %2071 = vmatpush.msra.mxu1 %v6223_v38  ;;  %v4487_v38 = vld [vmem:[%s8339_s2 + $0x350] sm:$0xff]  ;;  %v6527_v54 = vsub.f32 %v4489_v56, %v6496_v33  ;;  %v2283_v58 = vsub.f32 %v6486_v15, %v2282_v41 }
 0x132   :  { %2138 = vmatpush.msra.mxu2 %v1965_v47  ;;  %2181 = vmatpush.msra.mxu3 %v6244_v13  ;;  %v6523_v21 = vand.u32 4294901760, %v4487_v38  ;;  %v6540_v47 = vand.u32 4294901760, %v4486_v36 }
 0x133   :  { %2042 = vmatpush.msra.mxu0 %v6342_v0  ;;  %2073 = vmatpush.msra.mxu1 %v6244_v13  ;;  %v6513_v13 = vsub.f32 %v4490_v7, %v6483_v61  ;;  %v8419_v17 = vand.u32 4294901760, %v6527_v54  ;;  %v2284_v5 = vand.u32 4294901760, %v2283_v58  ;;  %v984_v49 = vpop.f32.mrf.mxu2  ;;  %v6635_v7 = vand.u32 4294901760, %v4480_v23  ;;  %v4508_v58 = vld [vmem:[%s8339_s2 + $0x3f8] sm:$0xff] }
 0x134   :  { %2142 = vmatpush.msra.mxu2 %v1971_v53  ;;  %2183 = vmatpush.msra.mxu3 %v6260_v18  ;;  %v4484_v53 = vld [vmem:[%s8339_s2 + $0x338] sm:$0xff]  ;;  %v985_v20 = vadd.f32 %v984_v49, %v931_v25 }
 0x135   :  { %2045 = vmatpush.msra.mxu0 %v6358_v11  ;;  %2075 = vmatpush.msra.mxu1 %v6260_v18  ;;  %v2288_v18 = vand.u32 4294901760, %v6499_v42  ;;  %v8422_v46 = vand.u32 4294901760, %v6513_v13  ;;  %v6560_v11 = vsub.f32 %v4487_v38, %v6523_v21  ;;  %v2301_v32 = vsub.f32 %v6527_v54, %v8419_v17 }
 0x136   :  { %2146 = vmatpush.msra.mxu2 %v1977_v59  ;;  %2185 = vmatpush.msra.mxu3 %v6274_v43  ;;  %v1023_v48 = vpop.f32.mrf.mxu3 }
 0x137   :  { %2048 = vmatmul.f32.vlgmr.msra.gmra.mxu0 %v6383_v50  ;;  %2077 = vmatpush.msra.mxu1 %v6274_v43  ;;  %v4485_v43 = vld [vmem:[%s8339_s2 + $0x340] sm:$0xff]  ;;  %v2289_v0 = vsub.f32 %v6499_v42, %v2288_v18  ;;  %v2295_v28 = vsub.f32 %v6513_v13, %v8422_v46  ;;  %v8416_v14 = vand.u32 4294901760, %v6560_v11  ;;  %v2302_v60 = vand.u32 4294901760, %v2301_v32  ;;  %v4507_v32 = vld [vmem:[%s8339_s2 + $0x3f0] sm:$0xff] }
 0x138   :  { %2240 = vmatpush.msrb.mxu0 %v6463_v35  ;;  %2150 = vmatpush.msra.mxu2 %v1983_v62  ;;  %v6556_v59 = vand.u32 4294901760, %v4485_v43  ;;  %v6567_v62 = vand.u32 4294901760, %v4484_v53  ;;  %v1024_v27 = vadd.f32 %v1023_v48, %v985_v20  ;;  %v1092_v24 = vpop.f32.mrf.mxu0  ;;  %v8408_v48 = vand.u32 4294901760, %v6653_v26 }
 0x139   :  { %2187 = vmatpush.msra.mxu3 %v6298_v16  ;;  %2079 = vmatpush.msra.mxu1 %v6298_v16  ;;  %v6544_v16 = vsub.f32 %v4488_v1, %v6509_v40  ;;  %v2290_v19 = vand.u32 4294901760, %v2289_v0  ;;  %v2296_v55 = vand.u32 4294901760, %v2295_v28  ;;  %v2313_v63 = vsub.f32 %v6560_v11, %v8416_v14  ;;  %v4478_v1 = vld [vmem:[%s8339_s2 + $0x308] sm:$0xff]  ;;  %v4477_v0 = vld [vmem:[%s8339_s2 + $0x300] sm:$0xff] }
 0x13a   :  { %2242 = vmatpush.msrb.mxu0 %v6473_v39  ;;  %2154 = vmatpush.msra.mxu2 %v1989_v51  ;;  %v6576_v51 = vsub.f32 %v4486_v36, %v6540_v47  ;;  %v6592_v2 = vsub.f32 %v4485_v43, %v6556_v59  ;;  %v6650_v43 = vand.u32 4294901760, %v4479_v30  ;;  %v6671_v28 = vsub.f32 %v4480_v23, %v6635_v7 }
 0x13b   :  { %2189 = vmatpush.msra.mxu3 %v6314_v12  ;;  %2156 = vmatmul.f32.vlgmr.msra.gmra.mxu2 %v6365_v29  ;;  %v8418_v37 = vand.u32 4294901760, %v6544_v16  ;;  %v2314_v38 = vand.u32 4294901760, %v2313_v63  ;;  %v6684_v8 = vand.u32 4294901760, %v4477_v0 }
 0x13c   :  { %2244 = vmatpush.msrb.mxu0 %v6483_v61  ;;  %2383 = vmatpush.msrb.mxu2 %v6486_v15  ;;  %v8414_v3 = vand.u32 4294901760, %v6576_v51  ;;  %v8413_v6 = vand.u32 4294901760, %v6592_v2  ;;  %v1170_v63 = vpop.f32.mrf.mxu2 }
 0x13d   :  { %2081 = vmatpush.msra.mxu1 %v6314_v12  ;;  %2191 = vmatpush.msra.mxu3 %v6335_v34  ;;  %v6580_v12 = vand.u32 4294901760, %v4483_v52  ;;  %v2307_v50 = vsub.f32 %v6544_v16, %v8418_v37 }
 0x13e   :  { %2193 = vmatmul.f32.vlgmr.msra.gmra.mxu3 %v6365_v29  ;;  %2246 = vmatpush.msrb.mxu0 %v6496_v33  ;;  %v4482_v29 = vld [vmem:[%s8339_s2 + $0x328] sm:$0xff]  ;;  %v2319_v4 = vsub.f32 %v6576_v51, %v8414_v3  ;;  %v2325_v36 = vsub.f32 %v6592_v2, %v8413_v6 }
 0x13f   :  { %2386 = vmatpush.msrb.mxu2 %v6499_v42  ;;  %2436 = vmatpush.msrb.mxu3 %v6463_v35  ;;  %v6613_v10 = vsub.f32 %v4483_v52, %v6580_v12  ;;  %v2308_v9 = vand.u32 4294901760, %v2307_v50  ;;  %v1129_v52 = vpop.f32.mrf.mxu1 }
 0x140   :  { %2083 = vmatpush.msra.mxu1 %v6335_v34  ;;  %2248 = vmatpush.msrb.mxu0 %v6509_v40  ;;  %v6598_v34 = vsub.f32 %v4484_v53, %v6567_v62  ;;  %v1093_v53 = vadd.f32 %v1092_v24, %v1024_v27  ;;  %v2320_v25 = vand.u32 4294901760, %v2319_v4  ;;  %v2326_v20 = vand.u32 4294901760, %v2325_v36  ;;  %v4505_v4 = vld [vmem:[%s8339_s2 + $0x3e0] sm:$0xff] }
 0x141   :  { %2087 = vmatmul.f32.vlgmr.msra.gmra.mxu1 %v1890_v31  ;;  %2389 = vmatpush.msrb.mxu2 %v6513_v13  ;;  %v6607_v31 = vand.u32 4294901760, %v4482_v29  ;;  %v8410_v56 = vand.u32 4294901760, %v6613_v10 }
 0x142   :  { %2285 = vmatpush.msrb.mxu1 %v2284_v5  ;;  %2438 = vmatpush.msrb.mxu3 %v6473_v39  ;;  %v8412_v44 = vand.u32 4294901760, %v6598_v34  ;;  %v6667_v5 = vand.u32 4294901760, %v4478_v1  ;;  %v1130_v50 = vadd.f32 %v1129_v52, %v1093_v53 }
 0x143   :  { %2250 = vmatpush.msrb.mxu0 %v6523_v21  ;;  %2392 = vmatpush.msrb.mxu2 %v6527_v54  ;;  %v6638_v45 = vsub.f32 %v4482_v29, %v6607_v31  ;;  %v2337_v29 = vsub.f32 %v6613_v10, %v8410_v56 }
 0x144   :  { %2291 = vmatpush.msrb.mxu1 %v2290_v19  ;;  %2440 = vmatpush.msrb.mxu3 %v6483_v61  ;;  %v2331_v22 = vsub.f32 %v6598_v34, %v8412_v44  ;;  %v6678_v19 = vand.u32 4294901760, %v4508_v58  ;;  %v6701_v24 = vsub.f32 %v4478_v1, %v6667_v5  ;;  %v2349_v1 = vsub.f32 %v6653_v26, %v8408_v48 }
 0x145   :  { %2252 = vmatpush.msrb.mxu0 %v6540_v47  ;;  %2395 = vmatpush.msrb.mxu2 %v6544_v16  ;;  %v8409_v49 = vand.u32 4294901760, %v6638_v45 }
 0x146   :  { %2297 = vmatpush.msrb.mxu1 %v2296_v55  ;;  %2442 = vmatpush.msrb.mxu3 %v6496_v33  ;;  %v6688_v55 = vsub.f32 %v4479_v30, %v6650_v43  ;;  %v2332_v23 = vand.u32 4294901760, %v2331_v22  ;;  %v8411_v30 = vand.u32 4294901760, %v6671_v28  ;;  %v6711_v36 = vsub.f32 %v4508_v58, %v6678_v19 }
 0x147   :  { %2254 = vmatpush.msrb.mxu0 %v6556_v59  ;;  %2398 = vmatpush.msrb.mxu2 %v6560_v11  ;;  %v2343_v27 = vsub.f32 %v6638_v45, %v8409_v49  ;;  %v6719_v22 = vsub.f32 %v4477_v0, %v6684_v8  ;;  %v1171_v58 = vadd.f32 %v1170_v63, %v1130_v50  ;;  %v8417_v49 = vand.u32 4294901760, %v6701_v24 }
 0x148   :  { %2303 = vmatpush.msrb.mxu1 %v2302_v60  ;;  %2444 = vmatpush.msrb.mxu3 %v6509_v40  ;;  %v4506_v60 = vld [vmem:[%s8339_s2 + $0x3e8] sm:$0xff]  ;;  %v8415_v53 = vand.u32 4294901760, %v6688_v55  ;;  %v2355_v0 = vsub.f32 %v6671_v28, %v8411_v30  ;;  %v8420_v50 = vand.u32 4294901760, %v6711_v36 }
 0x149   :  { %2256 = vmatpush.msrb.mxu0 %v6567_v62  ;;  %2401 = vmatpush.msrb.mxu2 %v6576_v51  ;;  %v6721_v52 = vand.u32 4294901760, %v4506_v60  ;;  %v2344_v48 = vand.u32 4294901760, %v2343_v27  ;;  %v2350_v27 = vand.u32 4294901760, %v2349_v1  ;;  %v8421_v44 = vand.u32 4294901760, %v6719_v22  ;;  %v4502_v1 = vld [vmem:[%s8339_s2 + $0x3c8] sm:$0xff] }
 0x14a   :  { %2309 = vmatpush.msrb.mxu1 %v2308_v9  ;;  %2446 = vmatpush.msrb.mxu3 %v6523_v21  ;;  %v6703_v9 = vand.u32 4294901760, %v4507_v32 }
 0x14b   :  { %2258 = vmatpush.msrb.mxu0 %v6580_v12  ;;  %2404 = vmatpush.msrb.mxu2 %v6592_v2  ;;  %v6752_v6 = vsub.f32 %v4506_v60, %v6721_v52  ;;  %v2367_v60 = vsub.f32 %v6701_v24, %v8417_v49  ;;  %v2373_v37 = vsub.f32 %v6719_v22, %v8421_v44 }
 0x14c   :  { %2315 = vmatpush.msrb.mxu1 %v2314_v38  ;;  %2448 = vmatpush.msrb.mxu3 %v6540_v47  ;;  %v2338_v38 = vand.u32 4294901760, %v2337_v29  ;;  %v6728_v29 = vand.u32 4294901760, %v4505_v4  ;;  %v6736_v56 = vsub.f32 %v4507_v32, %v6703_v9  ;;  %v2361_v32 = vsub.f32 %v6688_v55, %v8415_v53 }
 0x14d   :  { %2260 = vmatpush.msrb.mxu0 %v6607_v31  ;;  %2407 = vmatpush.msrb.mxu2 %v6598_v34  ;;  %v2356_v53 = vand.u32 4294901760, %v2355_v0  ;;  %v4501_v0 = vld [vmem:[%s8339_s2 + $0x3c0] sm:$0xff]  ;;  %v2368_v44 = vand.u32 4294901760, %v2367_v60  ;;  %v8555_v60 = vand.u32 4294901760, %v6527_v54 }
 0x14e   :  { %2321 = vmatpush.msrb.mxu1 %v2320_v25  ;;  %2450 = vmatpush.msrb.mxu3 %v6556_v59  ;;  %v4504_v25 = vld [vmem:[%s8339_s2 + $0x3d8] sm:$0xff]  ;;  %v1325_v30 = vpop.f32.mrf.mxu0  ;;  %v2362_v49 = vand.u32 4294901760, %v2361_v32 }
 0x14f   :  { %2262 = vmatpush.msrb.mxu0 %v6622_v57  ;;  %2410 = vmatpush.msrb.mxu2 %v6613_v10  ;;  %v6741_v63 = vand.u32 4294901760, %v4504_v25  ;;  %v4500_v32 = vld [vmem:[%s8339_s2 + $0x3b8] sm:$0xff] }
 0x150   :  { %2327 = vmatpush.msrb.mxu1 %v2326_v20  ;;  %2452 = vmatpush.msrb.mxu3 %v6567_v62  ;;  %v1271_v20 = vpop.f32.mrf.mxu3 }
 0x151   :  { %2264 = vmatpush.msrb.mxu0 %v6635_v7  ;;  %2413 = vmatpush.msrb.mxu2 %v6638_v45  ;;  %v1272_v3 = vadd.f32 %v1271_v20, %v1171_v58  ;;  %v8423_v58 = vand.u32 4294901760, %v6736_v56  ;;  %v6777_v14 = vsub.f32 %v4504_v25, %v6741_v63 }
 0x152   :  { %2333 = vmatpush.msrb.mxu1 %v2332_v23  ;;  %2454 = vmatpush.msrb.mxu3 %v6580_v12  ;;  %v4503_v23 = vld [vmem:[%s8339_s2 + $0x3d0] sm:$0xff] }
 0x153   :  { %2266 = vmatpush.msrb.mxu0 %v6650_v43  ;;  %2416 = vmatpush.msrb.mxu2 %v6653_v26  ;;  %v6769_v20 = vand.u32 4294901760, %v4503_v23  ;;  %v2630_v46 = vsub.f32 %v6736_v56, %v8423_v58  ;;  %v4499_v58 = vld [vmem:[%s8339_s2 + $0x3b0] sm:$0xff] }
 0x154   :  { %2339 = vmatpush.msrb.mxu1 %v2338_v38  ;;  %2456 = vmatpush.msrb.mxu3 %v6607_v31  ;;  %v6759_v38 = vsub.f32 %v4505_v4, %v6728_v29  ;;  %v1326_v4 = vadd.f32 %v1325_v30, %v1272_v3  ;;  %v8424_v30 = vand.u32 4294901760, %v6752_v6 }
 0x155   :  { %2268 = vmatpush.msrb.mxu0 %v6667_v5  ;;  %2419 = vmatpush.msrb.mxu2 %v6671_v28  ;;  %v6801_v15 = vsub.f32 %v4503_v23, %v6769_v20  ;;  %v2374_v23 = vand.u32 4294901760, %v2373_v37 }
 0x156   :  { %2345 = vmatpush.msrb.mxu1 %v2344_v48  ;;  %2458 = vmatpush.msrb.mxu3 %v6622_v57  ;;  %v2624_v48 = vsub.f32 %v6711_v36, %v8420_v50  ;;  %v6787_v50 = vand.u32 4294901760, %v4502_v1  ;;  %v2636_v42 = vsub.f32 %v6752_v6, %v8424_v30 }
 0x157   :  { %2270 = vmatpush.msrb.mxu0 %v6684_v8  ;;  %2422 = vmatpush.msrb.mxu2 %v6688_v55  ;;  %v8425_v30 = vand.u32 4294901760, %v6801_v15 }
 0x158   :  { %2351 = vmatpush.msrb.mxu1 %v2350_v27  ;;  %2460 = vmatpush.msrb.mxu3 %v6635_v7  ;;  %v1364_v3 = vpop.f32.mrf.mxu1  ;;  %v1433_v17 = vpop.f32.mrf.mxu2  ;;  %v8426_v27 = vand.u32 4294901760, %v6759_v38  ;;  %v2637_v54 = vand.u32 4294901760, %v2636_v42 }
 0x159   :  { %2477 = vmatpush.msra.mxu0 %v2282_v41  ;;  %2425 = vmatpush.msrb.mxu2 %v6701_v24  ;;  %v1365_v25 = vadd.f32 %v1364_v3, %v1326_v4  ;;  %v6803_v41 = vand.u32 4294901760, %v4501_v0  ;;  %v2625_v4 = vand.u32 4294901760, %v2624_v48  ;;  %v6819_v48 = vand.u32 4294901760, %v4500_v32 }
 0x15a   :  { %2357 = vmatpush.msrb.mxu1 %v2356_v53  ;;  %2462 = vmatpush.msrb.mxu3 %v6650_v43 }
 0x15b   :  { %2481 = vmatpush.msra.mxu0 %v2288_v18  ;;  %2428 = vmatpush.msrb.mxu2 %v6719_v22  ;;  %v1434_v53 = vadd.f32 %v1433_v17, %v1365_v25  ;;  %v1470_v3 = vpop.f32.mrf.mxu3  ;;  %v6817_v18 = vsub.f32 %v4502_v1, %v6787_v50  ;;  %v8554_v17 = vand.u32 4294901760, %v6513_v13  ;;  %v4498_v25 = vld [vmem:[%s8339_s2 + $0x3a8] sm:$0xff]  ;;  %v2631_v1 = vand.u32 4294901760, %v2630_v46  ;;  %v4497_v46 = vld [vmem:[%s8339_s2 + $0x3a0] sm:$0xff] }
 0x15c   :  { %2363 = vmatpush.msrb.mxu1 %v2362_v49  ;;  %2464 = vmatpush.msrb.mxu3 %v6667_v5  ;;  %v2642_v49 = vsub.f32 %v6759_v38, %v8426_v27  ;;  %v6834_v13 = vsub.f32 %v4501_v0, %v6803_v41 }
 0x15d   :  { %2485 = vmatpush.msra.mxu0 %v8554_v17  ;;  %2581 = vmatpush.msra.mxu2 %v6678_v19  ;;  %v1471_v37 = vadd.f32 %v1470_v3, %v1434_v53  ;;  %v6836_v17 = vand.u32 4294901760, %v4499_v58  ;;  %v8556_v53 = vand.u32 4294901760, %v6777_v14  ;;  %v8427_v0 = vand.u32 4294901760, %v6817_v18 }
 0x15e   :  { %2369 = vmatpush.msrb.mxu1 %v2368_v44  ;;  %2466 = vmatpush.msrb.mxu3 %v6684_v8  ;;  %v6855_v3 = vsub.f32 %v4500_v32, %v6819_v48  ;;  %v2654_v32 = vsub.f32 %v6801_v15, %v8425_v30 }
 0x15f   :  { %2489 = vmatpush.msra.mxu0 %v8555_v60  ;;  %2583 = vmatpush.msra.mxu2 %v6703_v9  ;;  %1474 = vst.msk [vmem:[#allocation5 + $0x8] sm:$0xff] %vm749_vm0, %v1471_v37  ;;  %v2648_v44 = vsub.f32 %v6777_v14, %v8556_v53  ;;  %v6857_v60 = vand.u32 4294901760, %v4498_v25  ;;  %v8557_v37 = vand.u32 4294901760, %v6544_v16  ;;  %v2643_v53 = vand.u32 4294901760, %v2642_v49 }
 0x160   :  { %2626 = vmatpush.msra.mxu3 %v2625_v4  ;;  %2375 = vmatpush.msrb.mxu1 %v2374_v23  ;;  %v4496_v4 = vld [vmem:[%s8339_s2 + $0x398] sm:$0xff]  ;;  %v8428_v23 = vand.u32 4294901760, %v6834_v13  ;;  %v6871_v42 = vsub.f32 %v4499_v58, %v6836_v17  ;;  %v6873_v16 = vand.u32 4294901760, %v4497_v46  ;;  %v8558_v49 = vand.u32 4294901760, %v6560_v11  ;;  %v4495_v11 = vld [vmem:[%s8339_s2 + $0x390] sm:$0xff] }
 0x161   :  { %2493 = vmatpush.msra.mxu0 %v8557_v37  ;;  %2585 = vmatpush.msra.mxu2 %v6721_v52  ;;  %v2649_v37 = vand.u32 4294901760, %v2648_v44  ;;  %v2671_v30 = vand.u32 4294901760, %v6855_v3  ;;  %v6885_v58 = vsub.f32 %v4498_v25, %v6857_v60  ;;  %v6887_v27 = vand.u32 4294901760, %v4496_v4 }
 0x162   :  { %2544 = vmatpush.msra.mxu1 %v6463_v35  ;;  %2632 = vmatpush.msra.mxu3 %v2631_v1  ;;  %v2204_v35 = vld [vmem:[%s6851_s30] sm:$0xff]  ;;  %v2660_v1 = vsub.f32 %v6817_v18, %v8427_v0  ;;  %v2666_v25 = vsub.f32 %v6834_v13, %v8428_v23  ;;  %v6903_v0 = vsub.f32 %v4497_v46, %v6873_v16 }
 0x163   :  { %2497 = vmatpush.msra.mxu0 %v8558_v49  ;;  %2587 = vmatpush.msra.mxu2 %v6728_v29  ;;  %v6895_v44 = vand.u32 4294901760, %v2204_v35  ;;  %v8429_v49 = vand.u32 4294901760, %v6871_v42  ;;  %v2672_v46 = vsub.f32 %v6855_v3, %v2671_v30  ;;  %v6919_v23 = vsub.f32 %v4496_v4, %v6887_v27 }
 0x164   :  { %2546 = vmatpush.msra.mxu1 %v6473_v39  ;;  %2638 = vmatpush.msra.mxu3 %v2637_v54  ;;  %v8559_v39 = vand.u32 4294901760, %v6576_v51  ;;  %v2655_v54 = vand.u32 4294901760, %v2654_v32  ;;  %v4494_v51 = vld [vmem:[%s8339_s2 + $0x388] sm:$0xff]  ;;  %v2661_v32 = vand.u32 4294901760, %v2660_v1  ;;  %v2667_v1 = vand.u32 4294901760, %v2666_v25 }
 0x165   :  { %2589 = vmatpush.msra.mxu2 %v6741_v63  ;;  %v2689_v4 = vand.u32 4294901760, %v6903_v0  ;;  %2377 = vmatmul.f32.vlgmr.msrb.gmra.mxu1 %v6895_v44 }
 0x166   :  { %2501 = vmatpush.msra.mxu0 %v8559_v39  ;;  %2548 = vmatpush.msra.mxu1 %v6483_v61  ;;  %v8560_v61 = vand.u32 4294901760, %v6592_v2  ;;  %v8430_v39 = vand.u32 4294901760, %v6885_v58  ;;  %v8561_v2 = vand.u32 4294901760, %v6598_v34  ;;  %v2678_v34 = vsub.f32 %v6871_v42, %v8429_v49 }
 0x167   :  { %2644 = vmatpush.msra.mxu3 %v2643_v53  ;;  %v6911_v53 = vand.u32 4294901760, %v4495_v11  ;;  %2591 = vmatpush.msra.mxu2 %v6769_v20 }
 0x168   :  { %2505 = vmatpush.msra.mxu0 %v8560_v61  ;;  %2550 = vmatpush.msra.mxu1 %v6496_v33  ;;  %v6925_v33 = vsub.f32 %v2204_v35, %v6895_v44  ;;  %v6927_v61 = vand.u32 4294901760, %v4494_v51  ;;  %v2684_v25 = vsub.f32 %v6885_v58, %v8430_v39  ;;  %v8564_v39 = vand.u32 4294901760, %v6653_v26 }
 0x169   :  { %2650 = vmatpush.msra.mxu3 %v2649_v37  ;;  %v4493_v37 = vld [vmem:[%s8339_s2 + $0x380] sm:$0xff]  ;;  %2593 = vmatpush.msra.mxu2 %v6787_v50  ;;  %v6941_v35 = vsub.f32 %v4495_v11, %v6911_v53 }
 0x16a   :  { %2509 = vmatpush.msra.mxu0 %v8561_v2  ;;  %2552 = vmatpush.msra.mxu1 %v6509_v40  ;;  %v8562_v40 = vand.u32 4294901760, %v6613_v10  ;;  %v2695_v2 = vand.u32 4294901760, %v6919_v23  ;;  %v6948_v49 = vand.u32 4294901760, %v4493_v37  ;;  %v8563_v10 = vand.u32 4294901760, %v6638_v45 }
 0x16b   :  { %2656 = vmatpush.msra.mxu3 %v2655_v54  ;;  %2595 = vmatpush.msra.mxu2 %v6803_v41  ;;  %v2673_v54 = vand.u32 4294901760, %v2672_v46  ;;  %v6955_v11 = vsub.f32 %v4494_v51, %v6927_v61  ;;  %v2690_v46 = vsub.f32 %v6903_v0, %v2689_v4  ;;  %v2685_v45 = vand.u32 4294901760, %v2684_v25 }
 0x16c   :  { %2513 = vmatpush.msra.mxu0 %v8562_v40  ;;  %2554 = vmatpush.msra.mxu1 %v6523_v21  ;;  %v2273_v21 = vand.u32 4294901760, %v6925_v33  ;;  %v2205_v40 = vld [vmem:[%s6851_s30 + $0x8] sm:$0xff]  ;;  %v2696_v51 = vsub.f32 %v6919_v23, %v2695_v2  ;;  %v8566_v25 = vand.u32 4294901760, %v6688_v55 }
 0x16d   :  { %2662 = vmatpush.msra.mxu3 %v2661_v32  ;;  %2597 = vmatpush.msra.mxu2 %v6819_v48  ;;  %v2679_v32 = vand.u32 4294901760, %v2678_v34  ;;  %v8565_v34 = vand.u32 4294901760, %v6671_v28  ;;  %v2707_v26 = vand.u32 4294901760, %v6955_v11 }
 0x16e   :  { %2517 = vmatpush.msra.mxu0 %v8563_v10  ;;  %2556 = vmatpush.msra.mxu1 %v6540_v47  ;;  %v2701_v47 = vand.u32 4294901760, %v6941_v35  ;;  %v8567_v10 = vand.u32 4294901760, %v6701_v24 }
 0x16f   :  { %2668 = vmatpush.msra.mxu3 %v2667_v1  ;;  %2599 = vmatpush.msra.mxu2 %v6836_v17  ;;  %v6971_v1 = vsub.f32 %v4493_v37, %v6948_v49 }
 0x170   :  { %2521 = vmatpush.msra.mxu0 %v8564_v39  ;;  %2558 = vmatpush.msra.mxu1 %v6556_v59  ;;  %v2274_v59 = vsub.f32 %v6925_v33, %v2273_v21  ;;  %v6978_v39 = vand.u32 4294901760, %v2205_v40  ;;  %v2702_v28 = vsub.f32 %v6941_v35, %v2701_v47 }
 0x171   :  { %2674 = vmatpush.msra.mxu3 %v2673_v54  ;;  %2601 = vmatpush.msra.mxu2 %v6857_v60  ;;  %v2691_v54 = vand.u32 4294901760, %v2690_v46  ;;  %v2713_v37 = vand.u32 4294901760, %v6971_v1  ;;  %v8568_v46 = vand.u32 4294901760, %v6719_v22  ;;  %v8569_v22 = vand.u32 4294901760, %v6711_v36 }
 0x172   :  { %2525 = vmatpush.msra.mxu0 %v8565_v34  ;;  %2560 = vmatpush.msra.mxu1 %v6567_v62  ;;  %v2697_v62 = vand.u32 4294901760, %v2696_v51  ;;  %v6996_v55 = vsub.f32 %v2205_v40, %v6978_v39  ;;  %v2703_v24 = vand.u32 4294901760, %v2702_v28  ;;  %v4518_v34 = vld [vmem:[%s8339_s2 + $0x430] sm:$0xff] }
 0x173   :  { %2680 = vmatpush.msra.mxu3 %v2679_v32  ;;  %2603 = vmatpush.msra.mxu2 %v6873_v16  ;;  %v2275_v32 = vand.u32 4294901760, %v2274_v59 }
 0x174   :  { %2529 = vmatpush.msra.mxu0 %v8566_v25  ;;  %2562 = vmatpush.msra.mxu1 %v6580_v12  ;;  %v2708_v12 = vsub.f32 %v6955_v11, %v2707_v26 }
 0x175   :  { %2686 = vmatpush.msra.mxu3 %v2685_v45  ;;  %2605 = vmatpush.msra.mxu2 %v6887_v27  ;;  %v2614_v45 = vand.u32 4294901760, %v6996_v55 }
 0x176   :  { %2533 = vmatpush.msra.mxu0 %v8567_v10  ;;  %2564 = vmatpush.msra.mxu1 %v6607_v31  ;;  %v2714_v31 = vsub.f32 %v6971_v1, %v2713_v37  ;;  %v2709_v40 = vand.u32 4294901760, %v2708_v12 }
 0x177   :  { %2692 = vmatpush.msra.mxu3 %v2691_v54  ;;  %2607 = vmatpush.msra.mxu2 %v6911_v53 }
 0x178   :  { %2537 = vmatpush.msra.mxu0 %v8568_v46  ;;  %2566 = vmatpush.msra.mxu1 %v6622_v57  ;;  %v2715_v57 = vand.u32 4294901760, %v2714_v31  ;;  %v4516_v31 = vld [vmem:[%s8339_s2 + $0x420] sm:$0xff] }
 0x179   :  { %2698 = vmatpush.msra.mxu3 %v2697_v62  ;;  %2276 = vmatmul.f32.vlgmr.msrb.gmra.mxu0 %v2275_v32 }
 0x17a   :  { %2568 = vmatpush.msra.mxu1 %v6635_v7  ;;  %2724 = vmatpush.msrb.mxu0 %v6711_v36  ;;  %v2615_v7 = vsub.f32 %v6996_v55, %v2614_v45  ;;  %v8571_v36 = vand.u32 4294901760, %v6752_v6 }
 0x17b   :  { %2609 = vmatpush.msra.mxu2 %v6927_v61  ;;  %2704 = vmatpush.msra.mxu3 %v2703_v24 }
 0x17c   :  { %2431 = vmatmul.f32.vlgmr.msrb.gmra.mxu2 %v6925_v33  ;;  %2727 = vmatpush.msrb.mxu0 %v6736_v56  ;;  %v2616_v33 = vand.u32 4294901760, %v2615_v7 }
 0x17d   :  { %2570 = vmatpush.msra.mxu1 %v6650_v43  ;;  %2611 = vmatpush.msra.mxu2 %v6948_v49  ;;  %v8570_v43 = vand.u32 4294901760, %v6736_v56  ;;  %v8572_v56 = vand.u32 4294901760, %v6759_v38 }
 0x17e   :  { %2710 = vmatpush.msra.mxu3 %v2709_v40  ;;  %2730 = vmatpush.msrb.mxu0 %v6752_v6  ;;  %v8573_v6 = vand.u32 4294901760, %v6777_v14 }
 0x17f   :  { %2470 = vmatmul.f32.vlgmr.msrb.gmra.mxu3 %v2273_v21  ;;  %2818 = vmatpush.msrb.mxu2 %v8569_v22 }
 0x180   :  { %2572 = vmatpush.msra.mxu1 %v6667_v5  ;;  %2716 = vmatpush.msra.mxu3 %v2715_v57  ;;  %v8574_v5 = vand.u32 4294901760, %v6801_v15 }
 0x181   :  { %2733 = vmatpush.msrb.mxu0 %v6759_v38  ;;  %2822 = vmatpush.msrb.mxu2 %v8570_v43  ;;  %v4515_v43 = vld [vmem:[%s8339_s2 + $0x418] sm:$0xff] }
 0x182   :  { %2885 = vmatpush.msrb.mxu3 %v6678_v19  ;;  %2574 = vmatpush.msra.mxu1 %v6684_v8  ;;  %v4527_v8 = vld [vmem:[%s8339_s2 + $0x478] sm:$0xff] }
 0x183   :  { %2736 = vmatpush.msrb.mxu0 %v6777_v14  ;;  %2826 = vmatpush.msrb.mxu2 %v8571_v36  ;;  %v8575_v14 = vand.u32 4294901760, %v6817_v18 }
 0x184   :  { %2777 = vmatpush.msrb.mxu1 %v6678_v19  ;;  %2887 = vmatpush.msrb.mxu3 %v6703_v9  ;;  %v8576_v19 = vand.u32 4294901760, %v6834_v13 }
 0x185   :  { %2617 = vmatmul.f32.vlgmr.msra.gmra.mxu2 %v2616_v33  ;;  %2739 = vmatpush.msrb.mxu0 %v6801_v15 }
 0x186   :  { %2779 = vmatpush.msrb.mxu1 %v6703_v9  ;;  %2830 = vmatpush.msrb.mxu2 %v8572_v56  ;;  %v4526_v9 = vld [vmem:[%s8339_s2 + $0x470] sm:$0xff]  ;;  %v7235_v56 = vand.u32 4294901760, %v4516_v31 }
 0x187   :  { %2889 = vmatpush.msrb.mxu3 %v6721_v52  ;;  %2539 = vmatmul.f32.vlgmr.msra.gmra.mxu0 %v6895_v44  ;;  %v7086_v38 = vand.u32 4294901760, %v4526_v9 }
 0x188   :  { %2718 = vmatmul.f32.vlgmr.msra.gmra.mxu3 %v6978_v39  ;;  %2742 = vmatpush.msrb.mxu0 %v6817_v18 }
 0x189   :  { %2781 = vmatpush.msrb.mxu1 %v6721_v52  ;;  %2834 = vmatpush.msrb.mxu2 %v8573_v6  ;;  %v8577_v52 = vand.u32 4294901760, %v6871_v42 }
 0x18a   :  { %2891 = vmatpush.msrb.mxu3 %v6728_v29  ;;  %2576 = vmatmul.f32.vlgmr.msra.gmra.mxu1 %v6895_v44 }
 0x18b   :  { %2745 = vmatpush.msrb.mxu0 %v6834_v13  ;;  %2783 = vmatpush.msrb.mxu1 %v6728_v29  ;;  %v7076_v29 = vand.u32 4294901760, %v4527_v8  ;;  %v4522_v13 = vld [vmem:[%s8339_s2 + $0x450] sm:$0xff] }
 0x18c   :  { %2838 = vmatpush.msrb.mxu2 %v8574_v5  ;;  %2893 = vmatpush.msrb.mxu3 %v6741_v63 }
 0x18d   :  { %2748 = vmatpush.msrb.mxu0 %v6855_v3  ;;  %2785 = vmatpush.msrb.mxu1 %v6741_v63  ;;  %v8578_v63 = vand.u32 4294901760, %v6885_v58  ;;  %v7099_v15 = vsub.f32 %v4527_v8, %v7076_v29 }
 0x18e   :  { %2842 = vmatpush.msrb.mxu2 %v8575_v14  ;;  %2895 = vmatpush.msrb.mxu3 %v6769_v20 }
 0x18f   :  { %2751 = vmatpush.msrb.mxu0 %v6871_v42  ;;  %2787 = vmatpush.msrb.mxu1 %v6769_v20  ;;  %v4524_v20 = vld [vmem:[%s8339_s2 + $0x460] sm:$0xff] }
 0x190   :  { %2846 = vmatpush.msrb.mxu2 %v8576_v19  ;;  %2897 = vmatpush.msrb.mxu3 %v6787_v50  ;;  %v7109_v18 = vand.u32 4294901760, %v4524_v20  ;;  %v1553_v21 = vpop.f32.mrf.mxu0  ;;  %v4514_v19 = vld [vmem:[%s8339_s2 + $0x410] sm:$0xff] }
 0x191   :  { %2754 = vmatpush.msrb.mxu0 %v6885_v58  ;;  %2789 = vmatpush.msrb.mxu1 %v6787_v50  ;;  %v4525_v50 = vld [vmem:[%s8339_s2 + $0x468] sm:$0xff]  ;;  %v1654_v58 = vpop.f32.mrf.mxu1 }
 0x192   :  { %2850 = vmatpush.msrb.mxu2 %v2671_v30  ;;  %2899 = vmatpush.msrb.mxu3 %v6803_v41  ;;  %v7096_v30 = vand.u32 4294901760, %v4525_v50  ;;  %v1655_v59 = vadd.f32 %v1654_v58, %v1553_v21  ;;  %v7266_v58 = vsub.f32 %v4516_v31, %v7235_v56 }
 0x193   :  { %2757 = vmatpush.msrb.mxu0 %v6903_v0  ;;  %2791 = vmatpush.msrb.mxu1 %v6803_v41  ;;  %v4523_v41 = vld [vmem:[%s8339_s2 + $0x458] sm:$0xff]  ;;  %v3006_v0 = vand.u32 4294901760, %v7099_v15 }
 0x194   :  { %2854 = vmatpush.msrb.mxu2 %v8577_v52  ;;  %2901 = vmatpush.msrb.mxu3 %v6819_v48  ;;  %v7126_v3 = vsub.f32 %v4525_v50, %v7096_v30  ;;  %v7248_v50 = vand.u32 4294901760, %v4515_v43 }
 0x195   :  { %2760 = vmatpush.msrb.mxu0 %v6919_v23  ;;  %2793 = vmatpush.msrb.mxu1 %v6819_v48  ;;  %v7112_v48 = vsub.f32 %v4526_v9, %v7086_v38  ;;  %v7136_v23 = vand.u32 4294901760, %v4522_v13  ;;  %v3007_v44 = vsub.f32 %v7099_v15, %v3006_v0 }
 0x196   :  { %2858 = vmatpush.msrb.mxu2 %v8578_v63  ;;  %2903 = vmatpush.msrb.mxu3 %v6836_v17 }
 0x197   :  { %2763 = vmatpush.msrb.mxu0 %v6941_v35  ;;  %2795 = vmatpush.msrb.mxu1 %v6836_v17  ;;  %v7122_v17 = vand.u32 4294901760, %v4523_v41  ;;  %v3012_v42 = vand.u32 4294901760, %v7112_v48  ;;  %v8445_v35 = vand.u32 4294901760, %v7126_v3  ;;  %v3008_v54 = vand.u32 4294901760, %v3007_v44  ;;  %v4543_v44 = vld [vmem:[%s8339_s2 + $0x4f8] sm:$0xff] }
 0x198   :  { %2862 = vmatpush.msrb.mxu2 %v2689_v4  ;;  %2905 = vmatpush.msrb.mxu3 %v6857_v60 }
 0x199   :  { %2766 = vmatpush.msrb.mxu0 %v6955_v11  ;;  %2797 = vmatpush.msrb.mxu1 %v6857_v60  ;;  %v4521_v60 = vld [vmem:[%s8339_s2 + $0x448] sm:$0xff]  ;;  %v3013_v11 = vsub.f32 %v7112_v48, %v3012_v42  ;;  %v1708_v25 = vpop.f32.mrf.mxu2  ;;  %v3019_v28 = vsub.f32 %v7126_v3, %v8445_v35 }
 0x19a   :  { %2866 = vmatpush.msrb.mxu2 %v2695_v2  ;;  %2907 = vmatpush.msrb.mxu3 %v6873_v16  ;;  %v7153_v4 = vand.u32 4294901760, %v4521_v60  ;;  %v4519_v2 = vld [vmem:[%s8339_s2 + $0x438] sm:$0xff]  ;;  %v1709_v24 = vadd.f32 %v1708_v25, %v1655_v59 }
 0x19b   :  { %2769 = vmatpush.msrb.mxu0 %v6971_v1  ;;  %2799 = vmatpush.msrb.mxu1 %v6873_v16  ;;  %v7140_v16 = vsub.f32 %v4524_v20, %v7109_v18  ;;  %v7173_v1 = vsub.f32 %v4522_v13, %v7136_v23  ;;  %v3014_v10 = vand.u32 4294901760, %v3013_v11  ;;  %v3020_v57 = vand.u32 4294901760, %v3019_v28  ;;  %v4512_v11 = vld [vmem:[%s8339_s2 + $0x400] sm:$0xff] }
 0x19c   :  { %2870 = vmatpush.msrb.mxu2 %v2701_v47  ;;  %2909 = vmatpush.msrb.mxu3 %v6887_v27  ;;  %v1747_v40 = vpop.f32.mrf.mxu3  ;;  %v7284_v28 = vsub.f32 %v4515_v43, %v7248_v50  ;;  %v7297_v31 = vand.u32 4294901760, %v4512_v11 }
 0x19d   :  { %2772 = vmatmul.f32.vlgmr.msrb.gmra.mxu0 %v6996_v55  ;;  %2801 = vmatpush.msrb.mxu1 %v6887_v27  ;;  %v4520_v27 = vld [vmem:[%s8339_s2 + $0x440] sm:$0xff]  ;;  %v8442_v51 = vand.u32 4294901760, %v7140_v16  ;;  %v8439_v12 = vand.u32 4294901760, %v7173_v1  ;;  %v1748_v5 = vadd.f32 %v1747_v40, %v1709_v24  ;;  %v8431_v40 = vand.u32 4294901760, %v7266_v58 }
 0x19e   :  { %2964 = vmatpush.msra.mxu0 %v7076_v29  ;;  %2874 = vmatpush.msrb.mxu2 %v2707_v26  ;;  %v7169_v47 = vand.u32 4294901760, %v4520_v27  ;;  %v7180_v26 = vand.u32 4294901760, %v4519_v2  ;;  %v1816_v8 = vpop.f32.mrf.mxu0 }
 0x19f   :  { %2911 = vmatpush.msrb.mxu3 %v6911_v53  ;;  %2803 = vmatpush.msrb.mxu1 %v6911_v53  ;;  %v7157_v53 = vsub.f32 %v4523_v41, %v7122_v17  ;;  %v3025_v32 = vsub.f32 %v7140_v16, %v8442_v51  ;;  %v3037_v36 = vsub.f32 %v7173_v1, %v8439_v12  ;;  %v4513_v41 = vld [vmem:[%s8339_s2 + $0x408] sm:$0xff] }
 0x1a0   :  { %2966 = vmatpush.msra.mxu0 %v7086_v38  ;;  %2878 = vmatpush.msrb.mxu2 %v2713_v37  ;;  %v7189_v37 = vsub.f32 %v4521_v60, %v7153_v4  ;;  %v7205_v46 = vsub.f32 %v4520_v27, %v7169_v47  ;;  %v7263_v27 = vand.u32 4294901760, %v4514_v19 }
 0x1a1   :  { %2913 = vmatpush.msrb.mxu3 %v6927_v61  ;;  %2880 = vmatmul.f32.vlgmr.msrb.gmra.mxu2 %v6978_v39  ;;  %v8441_v62 = vand.u32 4294901760, %v7157_v53  ;;  %v3026_v33 = vand.u32 4294901760, %v3025_v32  ;;  %v3038_v13 = vand.u32 4294901760, %v3037_v36  ;;  %v4542_v32 = vld [vmem:[%s8339_s2 + $0x4f0] sm:$0xff] }
 0x1a2   :  { %2968 = vmatpush.msra.mxu0 %v7096_v30  ;;  %3107 = vmatpush.msra.mxu2 %v7099_v15  ;;  %v8437_v7 = vand.u32 4294901760, %v7189_v37  ;;  %v8436_v6 = vand.u32 4294901760, %v7205_v46  ;;  %v1894_v36 = vpop.f32.mrf.mxu2 }
 0x1a3   :  { %2805 = vmatpush.msrb.mxu1 %v6927_v61  ;;  %2915 = vmatpush.msrb.mxu3 %v6948_v49  ;;  %v7193_v61 = vand.u32 4294901760, %v4518_v34  ;;  %v3031_v55 = vsub.f32 %v7157_v53, %v8441_v62 }
 0x1a4   :  { %2917 = vmatmul.f32.vlgmr.msrb.gmra.mxu3 %v6978_v39  ;;  %2970 = vmatpush.msra.mxu0 %v7109_v18  ;;  %v4517_v39 = vld [vmem:[%s8339_s2 + $0x428] sm:$0xff]  ;;  %v3043_v52 = vsub.f32 %v7189_v37, %v8437_v7  ;;  %v3049_v60 = vsub.f32 %v7205_v46, %v8436_v6 }
 0x1a5   :  { %3110 = vmatpush.msra.mxu2 %v7112_v48  ;;  %3160 = vmatpush.msra.mxu3 %v7076_v29  ;;  %v7226_v22 = vsub.f32 %v4518_v34, %v7193_v61  ;;  %v3032_v9 = vand.u32 4294901760, %v3031_v55  ;;  %v1853_v34 = vpop.f32.mrf.mxu1 }
 0x1a6   :  { %2807 = vmatpush.msrb.mxu1 %v6948_v49  ;;  %2972 = vmatpush.msra.mxu0 %v7122_v17  ;;  %v7211_v49 = vsub.f32 %v4519_v2, %v7180_v26  ;;  %v1817_v2 = vadd.f32 %v1816_v8, %v1748_v5  ;;  %v3044_v59 = vand.u32 4294901760, %v3043_v52  ;;  %v3050_v24 = vand.u32 4294901760, %v3049_v60  ;;  %v4540_v52 = vld [vmem:[%s8339_s2 + $0x4e0] sm:$0xff] }
 0x1a7   :  { %2811 = vmatmul.f32.vlgmr.msrb.gmra.mxu1 %v2614_v45  ;;  %3113 = vmatpush.msra.mxu2 %v7126_v3  ;;  %v7220_v45 = vand.u32 4294901760, %v4517_v39  ;;  %v8433_v20 = vand.u32 4294901760, %v7226_v22 }
 0x1a8   :  { %3009 = vmatpush.msra.mxu1 %v3008_v54  ;;  %3162 = vmatpush.msra.mxu3 %v7086_v38  ;;  %v8435_v14 = vand.u32 4294901760, %v7211_v49  ;;  %v7280_v54 = vand.u32 4294901760, %v4513_v41  ;;  %v1854_v55 = vadd.f32 %v1853_v34, %v1817_v2 }
 0x1a9   :  { %2974 = vmatpush.msra.mxu0 %v7136_v23  ;;  %3116 = vmatpush.msra.mxu2 %v7140_v16  ;;  %v7251_v63 = vsub.f32 %v4517_v39, %v7220_v45  ;;  %v3061_v39 = vsub.f32 %v7226_v22, %v8433_v20 }
 0x1aa   :  { %3015 = vmatpush.msra.mxu1 %v3014_v10  ;;  %3164 = vmatpush.msra.mxu3 %v7096_v30  ;;  %v3055_v21 = vsub.f32 %v7211_v49, %v8435_v14  ;;  %v7291_v10 = vand.u32 4294901760, %v4543_v44  ;;  %v7314_v8 = vsub.f32 %v4513_v41, %v7280_v54  ;;  %v3073_v41 = vsub.f32 %v7266_v58, %v8431_v40 }
 0x1ab   :  { %2976 = vmatpush.msra.mxu0 %v7153_v4  ;;  %3119 = vmatpush.msra.mxu2 %v7157_v53  ;;  %v8432_v25 = vand.u32 4294901760, %v7251_v63 }
 0x1ac   :  { %3021 = vmatpush.msra.mxu1 %v3020_v57  ;;  %3166 = vmatpush.msra.mxu3 %v7109_v18  ;;  %v7301_v57 = vsub.f32 %v4514_v19, %v7263_v27  ;;  %v3056_v43 = vand.u32 4294901760, %v3055_v21  ;;  %v8434_v19 = vand.u32 4294901760, %v7284_v28  ;;  %v7324_v60 = vsub.f32 %v4543_v44, %v7291_v10 }
 0x1ad   :  { %2978 = vmatpush.msra.mxu0 %v7169_v47  ;;  %3122 = vmatpush.msra.mxu2 %v7173_v1  ;;  %v3067_v5 = vsub.f32 %v7251_v63, %v8432_v25  ;;  %v7332_v21 = vsub.f32 %v4512_v11, %v7297_v31  ;;  %v1895_v44 = vadd.f32 %v1894_v36, %v1854_v55  ;;  %v8440_v25 = vand.u32 4294901760, %v7314_v8 }
 0x1ae   :  { %3027 = vmatpush.msra.mxu1 %v3026_v33  ;;  %3168 = vmatpush.msra.mxu3 %v7122_v17  ;;  %v4541_v33 = vld [vmem:[%s8339_s2 + $0x4e8] sm:$0xff]  ;;  %v8438_v2 = vand.u32 4294901760, %v7301_v57  ;;  %v3079_v11 = vsub.f32 %v7284_v28, %v8434_v19  ;;  %v8443_v55 = vand.u32 4294901760, %v7324_v60 }
 0x1af   :  { %2980 = vmatpush.msra.mxu0 %v7180_v26  ;;  %3125 = vmatpush.msra.mxu2 %v7189_v37  ;;  %v7334_v34 = vand.u32 4294901760, %v4541_v33  ;;  %v3068_v40 = vand.u32 4294901760, %v3067_v5  ;;  %v3074_v5 = vand.u32 4294901760, %v3073_v41  ;;  %v8444_v14 = vand.u32 4294901760, %v7332_v21  ;;  %v4537_v41 = vld [vmem:[%s8339_s2 + $0x4c8] sm:$0xff] }
 0x1b0   :  { %3033 = vmatpush.msra.mxu1 %v3032_v9  ;;  %3170 = vmatpush.msra.mxu3 %v7136_v23  ;;  %v7316_v9 = vand.u32 4294901760, %v4542_v32 }
 0x1b1   :  { %2982 = vmatpush.msra.mxu0 %v7193_v61  ;;  %3128 = vmatpush.msra.mxu2 %v7205_v46  ;;  %v7365_v6 = vsub.f32 %v4541_v33, %v7334_v34  ;;  %v3091_v33 = vsub.f32 %v7314_v8, %v8440_v25  ;;  %v3097_v62 = vsub.f32 %v7332_v21, %v8444_v14 }
 0x1b2   :  { %3039 = vmatpush.msra.mxu1 %v3038_v13  ;;  %3172 = vmatpush.msra.mxu3 %v7153_v4  ;;  %v3062_v13 = vand.u32 4294901760, %v3061_v39  ;;  %v7341_v39 = vand.u32 4294901760, %v4540_v52  ;;  %v7349_v20 = vsub.f32 %v4542_v32, %v7316_v9  ;;  %v3085_v32 = vsub.f32 %v7301_v57, %v8438_v2 }
 0x1b3   :  { %2984 = vmatpush.msra.mxu0 %v7220_v45  ;;  %3131 = vmatpush.msra.mxu2 %v7211_v49  ;;  %v3080_v2 = vand.u32 4294901760, %v3079_v11  ;;  %v4536_v11 = vld [vmem:[%s8339_s2 + $0x4c0] sm:$0xff]  ;;  %v3092_v14 = vand.u32 4294901760, %v3091_v33  ;;  %v8580_v33 = vand.u32 4294901760, %v7140_v16 }
 0x1b4   :  { %3045 = vmatpush.msra.mxu1 %v3044_v59  ;;  %3174 = vmatpush.msra.mxu3 %v7169_v47  ;;  %v4539_v59 = vld [vmem:[%s8339_s2 + $0x4d8] sm:$0xff]  ;;  %v2049_v19 = vpop.f32.mrf.mxu0  ;;  %v3086_v25 = vand.u32 4294901760, %v3085_v32 }
 0x1b5   :  { %2986 = vmatpush.msra.mxu0 %v7235_v56  ;;  %3134 = vmatpush.msra.mxu2 %v7226_v22  ;;  %v7354_v36 = vand.u32 4294901760, %v4539_v59  ;;  %v4535_v32 = vld [vmem:[%s8339_s2 + $0x4b8] sm:$0xff] }
 0x1b6   :  { %3051 = vmatpush.msra.mxu1 %v3050_v24  ;;  %3176 = vmatpush.msra.mxu3 %v7180_v26  ;;  %v1995_v24 = vpop.f32.mrf.mxu3 }
 0x1b7   :  { %2988 = vmatpush.msra.mxu0 %v7248_v50  ;;  %3137 = vmatpush.msra.mxu2 %v7251_v63  ;;  %v1996_v7 = vadd.f32 %v1995_v24, %v1895_v44  ;;  %v8446_v44 = vand.u32 4294901760, %v7349_v20  ;;  %v7390_v12 = vsub.f32 %v4539_v59, %v7354_v36 }
 0x1b8   :  { %3057 = vmatpush.msra.mxu1 %v3056_v43  ;;  %3178 = vmatpush.msra.mxu3 %v7193_v61  ;;  %v4538_v43 = vld [vmem:[%s8339_s2 + $0x4d0] sm:$0xff] }
 0x1b9   :  { %2990 = vmatpush.msra.mxu0 %v7263_v27  ;;  %3140 = vmatpush.msra.mxu2 %v7266_v58  ;;  %v7382_v24 = vand.u32 4294901760, %v4538_v43  ;;  %v3354_v35 = vsub.f32 %v7349_v20, %v8446_v44  ;;  %v4534_v44 = vld [vmem:[%s8339_s2 + $0x4b0] sm:$0xff] }
 0x1ba   :  { %3063 = vmatpush.msra.mxu1 %v3062_v13  ;;  %3180 = vmatpush.msra.mxu3 %v7220_v45  ;;  %v7372_v13 = vsub.f32 %v4540_v52, %v7341_v39  ;;  %v2050_v52 = vadd.f32 %v2049_v19, %v1996_v7  ;;  %v8447_v19 = vand.u32 4294901760, %v7365_v6 }
 0x1bb   :  { %2992 = vmatpush.msra.mxu0 %v7280_v54  ;;  %3143 = vmatpush.msra.mxu2 %v7284_v28  ;;  %v7414_v15 = vsub.f32 %v4538_v43, %v7382_v24  ;;  %v3098_v43 = vand.u32 4294901760, %v3097_v62 }
 0x1bc   :  { %3069 = vmatpush.msra.mxu1 %v3068_v40  ;;  %3182 = vmatpush.msra.mxu3 %v7235_v56  ;;  %v3348_v40 = vsub.f32 %v7324_v60, %v8443_v55  ;;  %v7400_v55 = vand.u32 4294901760, %v4537_v41  ;;  %v3360_v48 = vsub.f32 %v7365_v6, %v8447_v19 }
 0x1bd   :  { %2994 = vmatpush.msra.mxu0 %v7297_v31  ;;  %3146 = vmatpush.msra.mxu2 %v7301_v57  ;;  %v8448_v19 = vand.u32 4294901760, %v7414_v15 }
 0x1be   :  { %3075 = vmatpush.msra.mxu1 %v3074_v5  ;;  %3184 = vmatpush.msra.mxu3 %v7248_v50  ;;  %v2088_v7 = vpop.f32.mrf.mxu1  ;;  %v2157_v51 = vpop.f32.mrf.mxu2  ;;  %v8449_v5 = vand.u32 4294901760, %v7372_v13  ;;  %v3361_v16 = vand.u32 4294901760, %v3360_v48 }
 0x1bf   :  { %3201 = vmatpush.msrb.mxu0 %v3006_v0  ;;  %3149 = vmatpush.msra.mxu2 %v7314_v8  ;;  %v2089_v59 = vadd.f32 %v2088_v7, %v2050_v52  ;;  %v7416_v0 = vand.u32 4294901760, %v4536_v11  ;;  %v3349_v52 = vand.u32 4294901760, %v3348_v40  ;;  %v7432_v40 = vand.u32 4294901760, %v4535_v32 }
 0x1c0   :  { %3081 = vmatpush.msra.mxu1 %v3080_v2  ;;  %3186 = vmatpush.msra.mxu3 %v7263_v27 }
 0x1c1   :  { %3205 = vmatpush.msrb.mxu0 %v3012_v42  ;;  %3152 = vmatpush.msra.mxu2 %v7332_v21  ;;  %v2158_v2 = vadd.f32 %v2157_v51, %v2089_v59  ;;  %v2194_v7 = vpop.f32.mrf.mxu3  ;;  %v7430_v42 = vsub.f32 %v4537_v41, %v7400_v55  ;;  %v8579_v51 = vand.u32 4294901760, %v7126_v3  ;;  %v4533_v59 = vld [vmem:[%s8339_s2 + $0x4a8] sm:$0xff]  ;;  %v3355_v41 = vand.u32 4294901760, %v3354_v35  ;;  %v4532_v35 = vld [vmem:[%s8339_s2 + $0x4a0] sm:$0xff] }
 0x1c2   :  { %3087 = vmatpush.msra.mxu1 %v3086_v25  ;;  %3188 = vmatpush.msra.mxu3 %v7280_v54  ;;  %v3366_v25 = vsub.f32 %v7372_v13, %v8449_v5  ;;  %v7447_v3 = vsub.f32 %v4536_v11, %v7416_v0 }
 0x1c3   :  { %3209 = vmatpush.msrb.mxu0 %v8579_v51  ;;  %3305 = vmatpush.msrb.mxu2 %v7291_v10  ;;  %v2195_v62 = vadd.f32 %v2194_v7, %v2158_v2  ;;  %v7449_v51 = vand.u32 4294901760, %v4534_v44  ;;  %v8581_v2 = vand.u32 4294901760, %v7390_v12  ;;  %v8450_v11 = vand.u32 4294901760, %v7430_v42 }
 0x1c4   :  { %3093 = vmatpush.msra.mxu1 %v3092_v14  ;;  %3190 = vmatpush.msra.mxu3 %v7297_v31  ;;  %v7468_v7 = vsub.f32 %v4535_v32, %v7432_v40  ;;  %v3378_v32 = vsub.f32 %v7414_v15, %v8448_v19 }
 0x1c5   :  { %3213 = vmatpush.msrb.mxu0 %v8580_v33  ;;  %3307 = vmatpush.msrb.mxu2 %v7316_v9  ;;  %2198 = vst.msk [vmem:[#allocation5 + $0x10] sm:$0xff] %vm749_vm0, %v2195_v62  ;;  %v3372_v14 = vsub.f32 %v7390_v12, %v8581_v2  ;;  %v7470_v33 = vand.u32 4294901760, %v4533_v59  ;;  %v8582_v62 = vand.u32 4294901760, %v7157_v53  ;;  %v3367_v2 = vand.u32 4294901760, %v3366_v25 }
 0x1c6   :  { %3350 = vmatpush.msrb.mxu3 %v3349_v52  ;;  %3099 = vmatpush.msra.mxu1 %v3098_v43  ;;  %v4531_v52 = vld [vmem:[%s8339_s2 + $0x498] sm:$0xff]  ;;  %v8451_v43 = vand.u32 4294901760, %v7447_v3  ;;  %v7484_v48 = vsub.f32 %v4534_v44, %v7449_v51  ;;  %v7486_v53 = vand.u32 4294901760, %v4532_v35  ;;  %v8583_v25 = vand.u32 4294901760, %v7173_v1  ;;  %v4530_v1 = vld [vmem:[%s8339_s2 + $0x490] sm:$0xff] }
 0x1c7   :  { %3217 = vmatpush.msrb.mxu0 %v8582_v62  ;;  %3309 = vmatpush.msrb.mxu2 %v7334_v34  ;;  %v3373_v62 = vand.u32 4294901760, %v3372_v14  ;;  %v3395_v19 = vand.u32 4294901760, %v7468_v7  ;;  %v7498_v44 = vsub.f32 %v4533_v59, %v7470_v33  ;;  %v7500_v5 = vand.u32 4294901760, %v4531_v52 }
 0x1c8   :  { %3268 = vmatpush.msrb.mxu1 %v7076_v29  ;;  %3356 = vmatpush.msrb.mxu3 %v3355_v41  ;;  %v2928_v29 = vld [vmem:[%s7464_s16] sm:$0xff]  ;;  %v3384_v41 = vsub.f32 %v7430_v42, %v8450_v11  ;;  %v3390_v59 = vsub.f32 %v7447_v3, %v8451_v43  ;;  %v7516_v11 = vsub.f32 %v4532_v35, %v7486_v53 }
 0x1c9   :  { %3221 = vmatpush.msrb.mxu0 %v8583_v25  ;;  %3311 = vmatpush.msrb.mxu2 %v7341_v39  ;;  %v7508_v14 = vand.u32 4294901760, %v2928_v29  ;;  %v8452_v25 = vand.u32 4294901760, %v7484_v48  ;;  %v3396_v35 = vsub.f32 %v7468_v7, %v3395_v19  ;;  %v7532_v43 = vsub.f32 %v4531_v52, %v7500_v5 }
 0x1ca   :  { %3270 = vmatpush.msrb.mxu1 %v7086_v38  ;;  %3362 = vmatpush.msrb.mxu3 %v3361_v16  ;;  %v8584_v38 = vand.u32 4294901760, %v7189_v37  ;;  %v3379_v16 = vand.u32 4294901760, %v3378_v32  ;;  %v4529_v37 = vld [vmem:[%s8339_s2 + $0x488] sm:$0xff]  ;;  %v3385_v32 = vand.u32 4294901760, %v3384_v41  ;;  %v3391_v41 = vand.u32 4294901760, %v3390_v59 }
 0x1cb   :  { %3313 = vmatpush.msrb.mxu2 %v7354_v36  ;;  %v3413_v52 = vand.u32 4294901760, %v7516_v11  ;;  %3101 = vmatmul.f32.vlgmr.msra.gmra.mxu1 %v7508_v14 }
 0x1cc   :  { %3225 = vmatpush.msrb.mxu0 %v8584_v38  ;;  %3272 = vmatpush.msrb.mxu1 %v7096_v30  ;;  %v8585_v30 = vand.u32 4294901760, %v7205_v46  ;;  %v8453_v38 = vand.u32 4294901760, %v7498_v44  ;;  %v8586_v46 = vand.u32 4294901760, %v7211_v49  ;;  %v3402_v49 = vsub.f32 %v7484_v48, %v8452_v25 }
 0x1cd   :  { %3368 = vmatpush.msrb.mxu3 %v3367_v2  ;;  %v7524_v2 = vand.u32 4294901760, %v4530_v1  ;;  %3315 = vmatpush.msrb.mxu2 %v7382_v24 }
 0x1ce   :  { %3229 = vmatpush.msrb.mxu0 %v8585_v30  ;;  %3274 = vmatpush.msrb.mxu1 %v7109_v18  ;;  %v7538_v18 = vsub.f32 %v2928_v29, %v7508_v14  ;;  %v7540_v30 = vand.u32 4294901760, %v4529_v37  ;;  %v3408_v59 = vsub.f32 %v7498_v44, %v8453_v38  ;;  %v8589_v38 = vand.u32 4294901760, %v7266_v58 }
 0x1cf   :  { %3374 = vmatpush.msrb.mxu3 %v3373_v62  ;;  %v4528_v62 = vld [vmem:[%s8339_s2 + $0x480] sm:$0xff]  ;;  %3317 = vmatpush.msrb.mxu2 %v7400_v55  ;;  %v7554_v29 = vsub.f32 %v4530_v1, %v7524_v2 }
 0x1d0   :  { %3233 = vmatpush.msrb.mxu0 %v8586_v46  ;;  %3276 = vmatpush.msrb.mxu1 %v7122_v17  ;;  %v8587_v17 = vand.u32 4294901760, %v7226_v22  ;;  %v3419_v46 = vand.u32 4294901760, %v7532_v43  ;;  %v7561_v25 = vand.u32 4294901760, %v4528_v62  ;;  %v8588_v22 = vand.u32 4294901760, %v7251_v63 }
 0x1d1   :  { %3380 = vmatpush.msrb.mxu3 %v3379_v16  ;;  %3319 = vmatpush.msrb.mxu2 %v7416_v0  ;;  %v3397_v16 = vand.u32 4294901760, %v3396_v35  ;;  %v7568_v1 = vsub.f32 %v4529_v37, %v7540_v30  ;;  %v3414_v35 = vsub.f32 %v7516_v11, %v3413_v52  ;;  %v3409_v63 = vand.u32 4294901760, %v3408_v59 }
 0x1d2   :  { %3237 = vmatpush.msrb.mxu0 %v8587_v17  ;;  %3278 = vmatpush.msrb.mxu1 %v7136_v23  ;;  %v2997_v23 = vand.u32 4294901760, %v7538_v18  ;;  %v2929_v17 = vld [vmem:[%s7464_s16 + $0x8] sm:$0xff]  ;;  %v3420_v37 = vsub.f32 %v7532_v43, %v3419_v46  ;;  %v8591_v59 = vand.u32 4294901760, %v7301_v57 }
 0x1d3   :  { %3386 = vmatpush.msrb.mxu3 %v3385_v32  ;;  %3321 = vmatpush.msrb.mxu2 %v7432_v40  ;;  %v3403_v32 = vand.u32 4294901760, %v3402_v49  ;;  %v8590_v49 = vand.u32 4294901760, %v7284_v28  ;;  %v3431_v58 = vand.u32 4294901760, %v7568_v1 }
 0x1d4   :  { %3241 = vmatpush.msrb.mxu0 %v8588_v22  ;;  %3280 = vmatpush.msrb.mxu1 %v7153_v4  ;;  %v3425_v4 = vand.u32 4294901760, %v7554_v29  ;;  %v8592_v22 = vand.u32 4294901760, %v7314_v8 }
 0x1d5   :  { %3392 = vmatpush.msrb.mxu3 %v3391_v41  ;;  %3323 = vmatpush.msrb.mxu2 %v7449_v51  ;;  %v7584_v41 = vsub.f32 %v4528_v62, %v7561_v25 }
 0x1d6   :  { %3245 = vmatpush.msrb.mxu0 %v8589_v38  ;;  %3282 = vmatpush.msrb.mxu1 %v7169_v47  ;;  %v2998_v47 = vsub.f32 %v7538_v18, %v2997_v23  ;;  %v7591_v38 = vand.u32 4294901760, %v2929_v17  ;;  %v3426_v28 = vsub.f32 %v7554_v29, %v3425_v4 }
 0x1d7   :  { %3398 = vmatpush.msrb.mxu3 %v3397_v16  ;;  %3325 = vmatpush.msrb.mxu2 %v7470_v33  ;;  %v3415_v16 = vand.u32 4294901760, %v3414_v35  ;;  %v3437_v62 = vand.u32 4294901760, %v7584_v41  ;;  %v8593_v35 = vand.u32 4294901760, %v7332_v21  ;;  %v8594_v21 = vand.u32 4294901760, %v7324_v60 }
 0x1d8   :  { %3249 = vmatpush.msrb.mxu0 %v8590_v49  ;;  %3284 = vmatpush.msrb.mxu1 %v7180_v26  ;;  %v3421_v26 = vand.u32 4294901760, %v3420_v37  ;;  %v7609_v57 = vsub.f32 %v2929_v17, %v7591_v38  ;;  %v3427_v8 = vand.u32 4294901760, %v3426_v28  ;;  %v4553_v49 = vld [vmem:[%s8339_s2 + $0x530] sm:$0xff] }
 0x1d9   :  { %3404 = vmatpush.msrb.mxu3 %v3403_v32  ;;  %3327 = vmatpush.msrb.mxu2 %v7486_v53  ;;  %v2999_v32 = vand.u32 4294901760, %v2998_v47 }
 0x1da   :  { %3253 = vmatpush.msrb.mxu0 %v8591_v59  ;;  %3286 = vmatpush.msrb.mxu1 %v7193_v61  ;;  %v3432_v61 = vsub.f32 %v7568_v1, %v3431_v58 }
 0x1db   :  { %3410 = vmatpush.msrb.mxu3 %v3409_v63  ;;  %3329 = vmatpush.msrb.mxu2 %v7500_v5  ;;  %v3338_v63 = vand.u32 4294901760, %v7609_v57 }
 0x1dc   :  { %3257 = vmatpush.msrb.mxu0 %v8592_v22  ;;  %3288 = vmatpush.msrb.mxu1 %v7220_v45  ;;  %v3438_v45 = vsub.f32 %v7584_v41, %v3437_v62  ;;  %v3433_v17 = vand.u32 4294901760, %v3432_v61 }
 0x1dd   :  { %3416 = vmatpush.msrb.mxu3 %v3415_v16  ;;  %3331 = vmatpush.msrb.mxu2 %v7524_v2 }
 0x1de   :  { %3261 = vmatpush.msrb.mxu0 %v8593_v35  ;;  %3290 = vmatpush.msrb.mxu1 %v7235_v56  ;;  %v3439_v56 = vand.u32 4294901760, %v3438_v45  ;;  %v4551_v45 = vld [vmem:[%s8339_s2 + $0x520] sm:$0xff] }
 0x1df   :  { %3422 = vmatpush.msrb.mxu3 %v3421_v26  ;;  %3000 = vmatmul.f32.vlgmr.msra.gmra.mxu0 %v2999_v32 }
 0x1e0   :  { %3292 = vmatpush.msrb.mxu1 %v7248_v50  ;;  %3448 = vmatpush.msra.mxu0 %v7324_v60  ;;  %v3339_v50 = vsub.f32 %v7609_v57, %v3338_v63  ;;  %v8596_v60 = vand.u32 4294901760, %v7365_v6 }
 0x1e1   :  { %3333 = vmatpush.msrb.mxu2 %v7540_v30  ;;  %3428 = vmatpush.msrb.mxu3 %v3427_v8 }
 0x1e2   :  { %3155 = vmatmul.f32.vlgmr.msra.gmra.mxu2 %v7538_v18  ;;  %3451 = vmatpush.msra.mxu0 %v7349_v20  ;;  %v3340_v18 = vand.u32 4294901760, %v3339_v50 }
 0x1e3   :  { %3294 = vmatpush.msrb.mxu1 %v7263_v27  ;;  %3335 = vmatpush.msrb.mxu2 %v7561_v25  ;;  %v8595_v27 = vand.u32 4294901760, %v7349_v20  ;;  %v8597_v20 = vand.u32 4294901760, %v7372_v13 }
 0x1e4   :  { %3434 = vmatpush.msrb.mxu3 %v3433_v17  ;;  %3454 = vmatpush.msra.mxu0 %v7365_v6  ;;  %v8598_v6 = vand.u32 4294901760, %v7390_v12 }
 0x1e5   :  { %3194 = vmatmul.f32.vlgmr.msra.gmra.mxu3 %v2997_v23  ;;  %3542 = vmatpush.msra.mxu2 %v8594_v21 }
 0x1e6   :  { %3296 = vmatpush.msrb.mxu1 %v7280_v54  ;;  %3440 = vmatpush.msrb.mxu3 %v3439_v56  ;;  %v8599_v54 = vand.u32 4294901760, %v7414_v15 }
 0x1e7   :  { %3457 = vmatpush.msra.mxu0 %v7372_v13  ;;  %3546 = vmatpush.msra.mxu2 %v8595_v27  ;;  %v4550_v27 = vld [vmem:[%s8339_s2 + $0x518] sm:$0xff] }
 0x1e8   :  { %3609 = vmatpush.msra.mxu3 %v7291_v10  ;;  %3298 = vmatpush.msrb.mxu1 %v7297_v31  ;;  %v4562_v31 = vld [vmem:[%s8339_s2 + $0x578] sm:$0xff] }
 0x1e9   :  { %3460 = vmatpush.msra.mxu0 %v7390_v12  ;;  %3550 = vmatpush.msra.mxu2 %v8596_v60  ;;  %v8600_v12 = vand.u32 4294901760, %v7430_v42 }
 0x1ea   :  { %3501 = vmatpush.msra.mxu1 %v7291_v10  ;;  %3611 = vmatpush.msra.mxu3 %v7316_v9  ;;  %v8601_v10 = vand.u32 4294901760, %v7447_v3 }
 0x1eb   :  { %3341 = vmatmul.f32.vlgmr.msrb.gmra.mxu2 %v3340_v18  ;;  %3463 = vmatpush.msra.mxu0 %v7414_v15 }
 0x1ec   :  { %3503 = vmatpush.msra.mxu1 %v7316_v9  ;;  %3554 = vmatpush.msra.mxu2 %v8597_v20  ;;  %v4561_v9 = vld [vmem:[%s8339_s2 + $0x570] sm:$0xff]  ;;  %v7848_v20 = vand.u32 4294901760, %v4551_v45 }
 0x1ed   :  { %3613 = vmatpush.msra.mxu3 %v7334_v34  ;;  %3263 = vmatmul.f32.vlgmr.msrb.gmra.mxu0 %v7508_v14  ;;  %v7699_v13 = vand.u32 4294901760, %v4561_v9 }
 0x1ee   :  { %3442 = vmatmul.f32.vlgmr.msrb.gmra.mxu3 %v7591_v38  ;;  %3466 = vmatpush.msra.mxu0 %v7430_v42 }
 0x1ef   :  { %3505 = vmatpush.msra.mxu1 %v7334_v34  ;;  %3558 = vmatpush.msra.mxu2 %v8598_v6  ;;  %v8602_v34 = vand.u32 4294901760, %v7484_v48 }
 0x1f0   :  { %3615 = vmatpush.msra.mxu3 %v7341_v39  ;;  %3300 = vmatmul.f32.vlgmr.msrb.gmra.mxu1 %v7508_v14 }
 0x1f1   :  { %3469 = vmatpush.msra.mxu0 %v7447_v3  ;;  %3507 = vmatpush.msra.mxu1 %v7341_v39  ;;  %v7689_v39 = vand.u32 4294901760, %v4562_v31  ;;  %v4557_v3 = vld [vmem:[%s8339_s2 + $0x550] sm:$0xff] }
 0x1f2   :  { %3562 = vmatpush.msra.mxu2 %v8599_v54  ;;  %3617 = vmatpush.msra.mxu3 %v7354_v36 }
 0x1f3   :  { %3472 = vmatpush.msra.mxu0 %v7468_v7  ;;  %3509 = vmatpush.msra.mxu1 %v7354_v36  ;;  %v8603_v36 = vand.u32 4294901760, %v7498_v44  ;;  %v7712_v15 = vsub.f32 %v4562_v31, %v7689_v39 }
 0x1f4   :  { %3566 = vmatpush.msra.mxu2 %v8600_v12  ;;  %3619 = vmatpush.msra.mxu3 %v7382_v24 }
 0x1f5   :  { %3475 = vmatpush.msra.mxu0 %v7484_v48  ;;  %3511 = vmatpush.msra.mxu1 %v7382_v24  ;;  %v4559_v24 = vld [vmem:[%s8339_s2 + $0x560] sm:$0xff] }
 0x1f6   :  { %3570 = vmatpush.msra.mxu2 %v8601_v10  ;;  %3621 = vmatpush.msra.mxu3 %v7400_v55  ;;  %v7722_v42 = vand.u32 4294901760, %v4559_v24  ;;  %v2277_v23 = vpop.f32.mrf.mxu0  ;;  %v4549_v10 = vld [vmem:[%s8339_s2 + $0x510] sm:$0xff] }
 0x1f7   :  { %3478 = vmatpush.msra.mxu0 %v7498_v44  ;;  %3513 = vmatpush.msra.mxu1 %v7400_v55  ;;  %v4560_v55 = vld [vmem:[%s8339_s2 + $0x568] sm:$0xff]  ;;  %v2378_v44 = vpop.f32.mrf.mxu1 }
 0x1f8   :  { %3574 = vmatpush.msra.mxu2 %v3395_v19  ;;  %3623 = vmatpush.msra.mxu3 %v7416_v0  ;;  %v7709_v19 = vand.u32 4294901760, %v4560_v55  ;;  %v2379_v47 = vadd.f32 %v2378_v44, %v2277_v23  ;;  %v7879_v44 = vsub.f32 %v4551_v45, %v7848_v20 }
 0x1f9   :  { %3481 = vmatpush.msra.mxu0 %v7516_v11  ;;  %3515 = vmatpush.msra.mxu1 %v7416_v0  ;;  %v4558_v0 = vld [vmem:[%s8339_s2 + $0x558] sm:$0xff]  ;;  %v3730_v11 = vand.u32 4294901760, %v7712_v15 }
 0x1fa   :  { %3578 = vmatpush.msra.mxu2 %v8602_v34  ;;  %3625 = vmatpush.msra.mxu3 %v7432_v40  ;;  %v7739_v7 = vsub.f32 %v4560_v55, %v7709_v19  ;;  %v7861_v55 = vand.u32 4294901760, %v4550_v27 }
 0x1fb   :  { %3484 = vmatpush.msra.mxu0 %v7532_v43  ;;  %3517 = vmatpush.msra.mxu1 %v7432_v40  ;;  %v7725_v40 = vsub.f32 %v4561_v9, %v7699_v13  ;;  %v7749_v43 = vand.u32 4294901760, %v4557_v3  ;;  %v3731_v14 = vsub.f32 %v7712_v15, %v3730_v11 }
 0x1fc   :  { %3582 = vmatpush.msra.mxu2 %v8603_v36  ;;  %3627 = vmatpush.msra.mxu3 %v7449_v51 }
 0x1fd   :  { %3487 = vmatpush.msra.mxu0 %v7554_v29  ;;  %3519 = vmatpush.msra.mxu1 %v7449_v51  ;;  %v7735_v51 = vand.u32 4294901760, %v4558_v0  ;;  %v3736_v48 = vand.u32 4294901760, %v7725_v40  ;;  %v8468_v29 = vand.u32 4294901760, %v7739_v7  ;;  %v3732_v16 = vand.u32 4294901760, %v3731_v14  ;;  %v4578_v14 = vld [vmem:[%s8339_s2 + $0x5f8] sm:$0xff] }
 0x1fe   :  { %3586 = vmatpush.msra.mxu2 %v3413_v52  ;;  %3629 = vmatpush.msra.mxu3 %v7470_v33 }
 0x1ff   :  { %3490 = vmatpush.msra.mxu0 %v7568_v1  ;;  %3521 = vmatpush.msra.mxu1 %v7470_v33  ;;  %v4556_v33 = vld [vmem:[%s8339_s2 + $0x548] sm:$0xff]  ;;  %v3737_v1 = vsub.f32 %v7725_v40, %v3736_v48  ;;  %v2432_v59 = vpop.f32.mrf.mxu2  ;;  %v3743_v28 = vsub.f32 %v7739_v7, %v8468_v29 }
 0x200   :  { %3590 = vmatpush.msra.mxu2 %v3419_v46  ;;  %3631 = vmatpush.msra.mxu3 %v7486_v53  ;;  %v7766_v52 = vand.u32 4294901760, %v4556_v33  ;;  %v4554_v46 = vld [vmem:[%s8339_s2 + $0x538] sm:$0xff]  ;;  %v2433_v8 = vadd.f32 %v2432_v59, %v2379_v47 }
 0x201   :  { %3493 = vmatpush.msra.mxu0 %v7584_v41  ;;  %3523 = vmatpush.msra.mxu1 %v7486_v53  ;;  %v7753_v53 = vsub.f32 %v4559_v24, %v7722_v42  ;;  %v7786_v41 = vsub.f32 %v4557_v3, %v7749_v43  ;;  %v3738_v22 = vand.u32 4294901760, %v3737_v1  ;;  %v3744_v56 = vand.u32 4294901760, %v3743_v28  ;;  %v4547_v1 = vld [vmem:[%s8339_s2 + $0x500] sm:$0xff] }
 0x202   :  { %3594 = vmatpush.msra.mxu2 %v3425_v4  ;;  %3633 = vmatpush.msra.mxu3 %v7500_v5  ;;  %v2471_v17 = vpop.f32.mrf.mxu3  ;;  %v7897_v28 = vsub.f32 %v4550_v27, %v7861_v55  ;;  %v7910_v45 = vand.u32 4294901760, %v4547_v1 }
 0x203   :  { %3496 = vmatmul.f32.vlgmr.msra.gmra.mxu0 %v7609_v57  ;;  %3525 = vmatpush.msra.mxu1 %v7500_v5  ;;  %v4555_v5 = vld [vmem:[%s8339_s2 + $0x540] sm:$0xff]  ;;  %v8465_v37 = vand.u32 4294901760, %v7753_v53  ;;  %v8462_v61 = vand.u32 4294901760, %v7786_v41  ;;  %v2472_v54 = vadd.f32 %v2471_v17, %v2433_v8  ;;  %v8454_v17 = vand.u32 4294901760, %v7879_v44 }
 0x204   :  { %3688 = vmatpush.msrb.mxu0 %v7689_v39  ;;  %3598 = vmatpush.msra.mxu2 %v3431_v58  ;;  %v7782_v4 = vand.u32 4294901760, %v4555_v5  ;;  %v7793_v58 = vand.u32 4294901760, %v4554_v46  ;;  %v2540_v31 = vpop.f32.mrf.mxu0 }
 0x205   :  { %3635 = vmatpush.msra.mxu3 %v7524_v2  ;;  %3527 = vmatpush.msra.mxu1 %v7524_v2  ;;  %v7770_v2 = vsub.f32 %v4558_v0, %v7735_v51  ;;  %v3749_v32 = vsub.f32 %v7753_v53, %v8465_v37  ;;  %v3761_v60 = vsub.f32 %v7786_v41, %v8462_v61  ;;  %v4548_v0 = vld [vmem:[%s8339_s2 + $0x508] sm:$0xff] }
 0x206   :  { %3690 = vmatpush.msrb.mxu0 %v7699_v13  ;;  %3602 = vmatpush.msra.mxu2 %v3437_v62  ;;  %v7802_v62 = vsub.f32 %v4556_v33, %v7766_v52  ;;  %v7818_v35 = vsub.f32 %v4555_v5, %v7782_v4  ;;  %v7876_v5 = vand.u32 4294901760, %v4549_v10 }
 0x207   :  { %3637 = vmatpush.msra.mxu3 %v7540_v30  ;;  %3604 = vmatmul.f32.vlgmr.msra.gmra.mxu2 %v7591_v38  ;;  %v8464_v26 = vand.u32 4294901760, %v7770_v2  ;;  %v3750_v18 = vand.u32 4294901760, %v3749_v32  ;;  %v3762_v3 = vand.u32 4294901760, %v3761_v60  ;;  %v4577_v32 = vld [vmem:[%s8339_s2 + $0x5f0] sm:$0xff] }
 0x208   :  { %3692 = vmatpush.msrb.mxu0 %v7709_v19  ;;  %3831 = vmatpush.msrb.mxu2 %v7712_v15  ;;  %v8460_v50 = vand.u32 4294901760, %v7802_v62  ;;  %v8459_v6 = vand.u32 4294901760, %v7818_v35  ;;  %v2618_v60 = vpop.f32.mrf.mxu2 }
 0x209   :  { %3529 = vmatpush.msra.mxu1 %v7540_v30  ;;  %3639 = vmatpush.msra.mxu3 %v7561_v25  ;;  %v7806_v30 = vand.u32 4294901760, %v4553_v49  ;;  %v3755_v57 = vsub.f32 %v7770_v2, %v8464_v26 }
 0x20a   :  { %3641 = vmatmul.f32.vlgmr.msra.gmra.mxu3 %v7591_v38  ;;  %3694 = vmatpush.msrb.mxu0 %v7722_v42  ;;  %v4552_v38 = vld [vmem:[%s8339_s2 + $0x528] sm:$0xff]  ;;  %v3767_v34 = vsub.f32 %v7802_v62, %v8460_v50  ;;  %v3773_v33 = vsub.f32 %v7818_v35, %v8459_v6 }
 0x20b   :  { %3834 = vmatpush.msrb.mxu2 %v7725_v40  ;;  %3884 = vmatpush.msrb.mxu3 %v7689_v39  ;;  %v7839_v21 = vsub.f32 %v4553_v49, %v7806_v30  ;;  %v3756_v9 = vand.u32 4294901760, %v3755_v57  ;;  %v2577_v49 = vpop.f32.mrf.mxu1 }
 0x20c   :  { %3531 = vmatpush.msra.mxu1 %v7561_v25  ;;  %3696 = vmatpush.msrb.mxu0 %v7735_v51  ;;  %v7824_v25 = vsub.f32 %v4554_v46, %v7793_v58  ;;  %v2541_v46 = vadd.f32 %v2540_v31, %v2472_v54  ;;  %v3768_v47 = vand.u32 4294901760, %v3767_v34  ;;  %v3774_v8 = vand.u32 4294901760, %v3773_v33  ;;  %v4575_v34 = vld [vmem:[%s8339_s2 + $0x5e0] sm:$0xff] }
 0x20d   :  { %3535 = vmatmul.f32.vlgmr.msra.gmra.mxu1 %v3338_v63  ;;  %3837 = vmatpush.msrb.mxu2 %v7739_v7  ;;  %v7833_v63 = vand.u32 4294901760, %v4552_v38  ;;  %v8456_v24 = vand.u32 4294901760, %v7839_v21 }
 0x20e   :  { %3733 = vmatpush.msrb.mxu1 %v3732_v16  ;;  %3886 = vmatpush.msrb.mxu3 %v7699_v13  ;;  %v8458_v12 = vand.u32 4294901760, %v7824_v25  ;;  %v7893_v16 = vand.u32 4294901760, %v4548_v0  ;;  %v2578_v57 = vadd.f32 %v2577_v49, %v2541_v46 }
 0x20f   :  { %3698 = vmatpush.msrb.mxu0 %v7749_v43  ;;  %3840 = vmatpush.msrb.mxu2 %v7753_v53  ;;  %v7864_v36 = vsub.f32 %v4552_v38, %v7833_v63  ;;  %v3785_v38 = vsub.f32 %v7839_v21, %v8456_v24 }
 0x210   :  { %3739 = vmatpush.msrb.mxu1 %v3738_v22  ;;  %3888 = vmatpush.msrb.mxu3 %v7709_v19  ;;  %v3779_v23 = vsub.f32 %v7824_v25, %v8458_v12  ;;  %v7904_v22 = vand.u32 4294901760, %v4578_v14  ;;  %v7927_v31 = vsub.f32 %v4548_v0, %v7893_v16  ;;  %v3797_v0 = vsub.f32 %v7879_v44, %v8454_v17 }
 0x211   :  { %3700 = vmatpush.msrb.mxu0 %v7766_v52  ;;  %3843 = vmatpush.msrb.mxu2 %v7770_v2  ;;  %v8455_v59 = vand.u32 4294901760, %v7864_v36 }
 0x212   :  { %3745 = vmatpush.msrb.mxu1 %v3744_v56  ;;  %3890 = vmatpush.msrb.mxu3 %v7722_v42  ;;  %v7914_v56 = vsub.f32 %v4549_v10, %v7876_v5  ;;  %v3780_v27 = vand.u32 4294901760, %v3779_v23  ;;  %v8457_v10 = vand.u32 4294901760, %v7897_v28  ;;  %v7937_v33 = vsub.f32 %v4578_v14, %v7904_v22 }
 0x213   :  { %3702 = vmatpush.msrb.mxu0 %v7782_v4  ;;  %3846 = vmatpush.msrb.mxu2 %v7786_v41  ;;  %v3791_v54 = vsub.f32 %v7864_v36, %v8455_v59  ;;  %v7945_v23 = vsub.f32 %v4547_v1, %v7910_v45  ;;  %v2619_v14 = vadd.f32 %v2618_v60, %v2578_v57  ;;  %v8463_v59 = vand.u32 4294901760, %v7927_v31 }
 0x214   :  { %3751 = vmatpush.msrb.mxu1 %v3750_v18  ;;  %3892 = vmatpush.msrb.mxu3 %v7735_v51  ;;  %v4576_v18 = vld [vmem:[%s8339_s2 + $0x5e8] sm:$0xff]  ;;  %v8461_v46 = vand.u32 4294901760, %v7914_v56  ;;  %v3803_v1 = vsub.f32 %v7897_v28, %v8457_v10  ;;  %v8466_v57 = vand.u32 4294901760, %v7937_v33 }
 0x215   :  { %3704 = vmatpush.msrb.mxu0 %v7793_v58  ;;  %3849 = vmatpush.msrb.mxu2 %v7802_v62  ;;  %v7947_v49 = vand.u32 4294901760, %v4576_v18  ;;  %v3792_v17 = vand.u32 4294901760, %v3791_v54  ;;  %v3798_v54 = vand.u32 4294901760, %v3797_v0  ;;  %v8467_v12 = vand.u32 4294901760, %v7945_v23  ;;  %v4572_v0 = vld [vmem:[%s8339_s2 + $0x5c8] sm:$0xff] }
 0x216   :  { %3757 = vmatpush.msrb.mxu1 %v3756_v9  ;;  %3894 = vmatpush.msrb.mxu3 %v7749_v43  ;;  %v7929_v9 = vand.u32 4294901760, %v4577_v32 }
 0x217   :  { %3706 = vmatpush.msrb.mxu0 %v7806_v30  ;;  %3852 = vmatpush.msrb.mxu2 %v7818_v35  ;;  %v7978_v6 = vsub.f32 %v4576_v18, %v7947_v49  ;;  %v3815_v18 = vsub.f32 %v7927_v31, %v8463_v59  ;;  %v3821_v26 = vsub.f32 %v7945_v23, %v8467_v12 }
 0x218   :  { %3763 = vmatpush.msrb.mxu1 %v3762_v3  ;;  %3896 = vmatpush.msrb.mxu3 %v7766_v52  ;;  %v3786_v3 = vand.u32 4294901760, %v3785_v38  ;;  %v7954_v38 = vand.u32 4294901760, %v4575_v34  ;;  %v7962_v24 = vsub.f32 %v4577_v32, %v7929_v9  ;;  %v3809_v32 = vsub.f32 %v7914_v56, %v8461_v46 }
 0x219   :  { %3708 = vmatpush.msrb.mxu0 %v7833_v63  ;;  %3855 = vmatpush.msrb.mxu2 %v7824_v25  ;;  %v3804_v46 = vand.u32 4294901760, %v3803_v1  ;;  %v4571_v1 = vld [vmem:[%s8339_s2 + $0x5c0] sm:$0xff]  ;;  %v3816_v12 = vand.u32 4294901760, %v3815_v18  ;;  %v8605_v18 = vand.u32 4294901760, %v7753_v53 }
 0x21a   :  { %3769 = vmatpush.msrb.mxu1 %v3768_v47  ;;  %3898 = vmatpush.msrb.mxu3 %v7782_v4  ;;  %v4574_v47 = vld [vmem:[%s8339_s2 + $0x5d8] sm:$0xff]  ;;  %v2773_v10 = vpop.f32.mrf.mxu0  ;;  %v3810_v59 = vand.u32 4294901760, %v3809_v32 }
 0x21b   :  { %3710 = vmatpush.msrb.mxu0 %v7848_v20  ;;  %3858 = vmatpush.msrb.mxu2 %v7839_v21  ;;  %v7967_v60 = vand.u32 4294901760, %v4574_v47  ;;  %v4570_v32 = vld [vmem:[%s8339_s2 + $0x5b8] sm:$0xff] }
 0x21c   :  { %3775 = vmatpush.msrb.mxu1 %v3774_v8  ;;  %3900 = vmatpush.msrb.mxu3 %v7793_v58  ;;  %v2719_v8 = vpop.f32.mrf.mxu3 }
 0x21d   :  { %3712 = vmatpush.msrb.mxu0 %v7861_v55  ;;  %3861 = vmatpush.msrb.mxu2 %v7864_v36  ;;  %v2720_v50 = vadd.f32 %v2719_v8, %v2619_v14  ;;  %v8469_v14 = vand.u32 4294901760, %v7962_v24  ;;  %v8003_v61 = vsub.f32 %v4574_v47, %v7967_v60 }
 0x21e   :  { %3781 = vmatpush.msrb.mxu1 %v3780_v27  ;;  %3902 = vmatpush.msrb.mxu3 %v7806_v30  ;;  %v4573_v27 = vld [vmem:[%s8339_s2 + $0x5d0] sm:$0xff] }
 0x21f   :  { %3714 = vmatpush.msrb.mxu0 %v7876_v5  ;;  %3864 = vmatpush.msrb.mxu2 %v7879_v44  ;;  %v7995_v8 = vand.u32 4294901760, %v4573_v27  ;;  %v4078_v29 = vsub.f32 %v7962_v24, %v8469_v14  ;;  %v4569_v14 = vld [vmem:[%s8339_s2 + $0x5b0] sm:$0xff] }
 0x220   :  { %3787 = vmatpush.msrb.mxu1 %v3786_v3  ;;  %3904 = vmatpush.msrb.mxu3 %v7833_v63  ;;  %v7985_v3 = vsub.f32 %v4575_v34, %v7954_v38  ;;  %v2774_v34 = vadd.f32 %v2773_v10, %v2720_v50  ;;  %v8470_v10 = vand.u32 4294901760, %v7978_v6 }
 0x221   :  { %3716 = vmatpush.msrb.mxu0 %v7893_v16  ;;  %3867 = vmatpush.msrb.mxu2 %v7897_v28  ;;  %v8027_v15 = vsub.f32 %v4573_v27, %v7995_v8  ;;  %v3822_v27 = vand.u32 4294901760, %v3821_v26 }
 0x222   :  { %3793 = vmatpush.msrb.mxu1 %v3792_v17  ;;  %3906 = vmatpush.msrb.mxu3 %v7848_v20  ;;  %v4072_v17 = vsub.f32 %v7937_v33, %v8466_v57  ;;  %v8013_v57 = vand.u32 4294901760, %v4572_v0  ;;  %v4084_v40 = vsub.f32 %v7978_v6, %v8470_v10 }
 0x223   :  { %3718 = vmatpush.msrb.mxu0 %v7910_v45  ;;  %3870 = vmatpush.msrb.mxu2 %v7914_v56  ;;  %v8471_v10 = vand.u32 4294901760, %v8027_v15 }
 0x224   :  { %3799 = vmatpush.msrb.mxu1 %v3798_v54  ;;  %3908 = vmatpush.msrb.mxu3 %v7861_v55  ;;  %v2812_v50 = vpop.f32.mrf.mxu1  ;;  %v2881_v37 = vpop.f32.mrf.mxu2  ;;  %v8472_v54 = vand.u32 4294901760, %v7985_v3  ;;  %v4085_v53 = vand.u32 4294901760, %v4084_v40 }
 0x225   :  { %3925 = vmatpush.msra.mxu0 %v3730_v11  ;;  %3873 = vmatpush.msrb.mxu2 %v7927_v31  ;;  %v2813_v47 = vadd.f32 %v2812_v50, %v2774_v34  ;;  %v8029_v11 = vand.u32 4294901760, %v4571_v1  ;;  %v4073_v34 = vand.u32 4294901760, %v4072_v17  ;;  %v8045_v17 = vand.u32 4294901760, %v4570_v32 }
 0x226   :  { %3805 = vmatpush.msrb.mxu1 %v3804_v46  ;;  %3910 = vmatpush.msrb.mxu3 %v7876_v5 }
 0x227   :  { %3929 = vmatpush.msra.mxu0 %v3736_v48  ;;  %3876 = vmatpush.msrb.mxu2 %v7945_v23  ;;  %v2882_v46 = vadd.f32 %v2881_v37, %v2813_v47  ;;  %v2918_v50 = vpop.f32.mrf.mxu3  ;;  %v8043_v48 = vsub.f32 %v4572_v0, %v8013_v57  ;;  %v8604_v37 = vand.u32 4294901760, %v7739_v7  ;;  %v4568_v47 = vld [vmem:[%s8339_s2 + $0x5a8] sm:$0xff]  ;;  %v4079_v0 = vand.u32 4294901760, %v4078_v29  ;;  %v4567_v29 = vld [vmem:[%s8339_s2 + $0x5a0] sm:$0xff] }
 0x228   :  { %3811 = vmatpush.msrb.mxu1 %v3810_v59  ;;  %3912 = vmatpush.msrb.mxu3 %v7893_v16  ;;  %v4090_v59 = vsub.f32 %v7985_v3, %v8472_v54  ;;  %v8060_v7 = vsub.f32 %v4571_v1, %v8029_v11 }
 0x229   :  { %3933 = vmatpush.msra.mxu0 %v8604_v37  ;;  %4029 = vmatpush.msra.mxu2 %v7904_v22  ;;  %v2919_v26 = vadd.f32 %v2918_v50, %v2882_v46  ;;  %v8062_v37 = vand.u32 4294901760, %v4569_v14  ;;  %v8606_v46 = vand.u32 4294901760, %v8003_v61  ;;  %v8473_v1 = vand.u32 4294901760, %v8043_v48 }
 0x22a   :  { %3817 = vmatpush.msrb.mxu1 %v3816_v12  ;;  %3914 = vmatpush.msrb.mxu3 %v7910_v45  ;;  %v8081_v50 = vsub.f32 %v4570_v32, %v8045_v17  ;;  %v4102_v32 = vsub.f32 %v8027_v15, %v8471_v10 }
 0x22b   :  { %3937 = vmatpush.msra.mxu0 %v8605_v18  ;;  %4031 = vmatpush.msra.mxu2 %v7929_v9  ;;  %2922 = vst.msk [vmem:[#allocation5 + $0x18] sm:$0xff] %vm749_vm0, %v2919_v26  ;;  %v4096_v12 = vsub.f32 %v8003_v61, %v8606_v46  ;;  %v8083_v18 = vand.u32 4294901760, %v4568_v47  ;;  %v8607_v26 = vand.u32 4294901760, %v7770_v2  ;;  %v4091_v46 = vand.u32 4294901760, %v4090_v59 }
 0x22c   :  { %4074 = vmatpush.msra.mxu3 %v4073_v34  ;;  %3823 = vmatpush.msrb.mxu1 %v3822_v27  ;;  %v4566_v34 = vld [vmem:[%s8339_s2 + $0x598] sm:$0xff]  ;;  %v8474_v27 = vand.u32 4294901760, %v8060_v7  ;;  %v8097_v40 = vsub.f32 %v4569_v14, %v8062_v37  ;;  %v8099_v2 = vand.u32 4294901760, %v4567_v29  ;;  %v8608_v59 = vand.u32 4294901760, %v7786_v41  ;;  %v4565_v41 = vld [vmem:[%s8339_s2 + $0x590] sm:$0xff] }
 0x22d   :  { %3941 = vmatpush.msra.mxu0 %v8607_v26  ;;  %4033 = vmatpush.msra.mxu2 %v7947_v49  ;;  %v4097_v26 = vand.u32 4294901760, %v4096_v12  ;;  %v4119_v10 = vand.u32 4294901760, %v8081_v50  ;;  %v8111_v14 = vsub.f32 %v4568_v47, %v8083_v18  ;;  %v8113_v54 = vand.u32 4294901760, %v4566_v34 }
 0x22e   :  { %3992 = vmatpush.msra.mxu1 %v7689_v39  ;;  %4080 = vmatpush.msra.mxu3 %v4079_v0  ;;  %v3652_v39 = vld [vmem:[%s8077_s28] sm:$0xff]  ;;  %v4108_v0 = vsub.f32 %v8043_v48, %v8473_v1  ;;  %v4114_v47 = vsub.f32 %v8060_v7, %v8474_v27  ;;  %v8129_v1 = vsub.f32 %v4567_v29, %v8099_v2 }
 0x22f   :  { %3945 = vmatpush.msra.mxu0 %v8608_v59  ;;  %4035 = vmatpush.msra.mxu2 %v7954_v38  ;;  %v8121_v12 = vand.u32 4294901760, %v3652_v39  ;;  %v8475_v59 = vand.u32 4294901760, %v8097_v40  ;;  %v4120_v29 = vsub.f32 %v8081_v50, %v4119_v10  ;;  %v8145_v27 = vsub.f32 %v4566_v34, %v8113_v54 }
 0x230   :  { %3994 = vmatpush.msra.mxu1 %v7699_v13  ;;  %4086 = vmatpush.msra.mxu3 %v4085_v53  ;;  %v8609_v13 = vand.u32 4294901760, %v7802_v62  ;;  %v4103_v53 = vand.u32 4294901760, %v4102_v32  ;;  %v4564_v62 = vld [vmem:[%s8339_s2 + $0x588] sm:$0xff]  ;;  %v4109_v32 = vand.u32 4294901760, %v4108_v0  ;;  %v4115_v0 = vand.u32 4294901760, %v4114_v47 }
 0x231   :  { %4037 = vmatpush.msra.mxu2 %v7967_v60  ;;  %v4137_v34 = vand.u32 4294901760, %v8129_v1  ;;  %3825 = vmatmul.f32.vlgmr.msrb.gmra.mxu1 %v8121_v12 }
 0x232   :  { %3949 = vmatpush.msra.mxu0 %v8609_v13  ;;  %3996 = vmatpush.msra.mxu1 %v7709_v19  ;;  %v8610_v19 = vand.u32 4294901760, %v7818_v35  ;;  %v8476_v13 = vand.u32 4294901760, %v8111_v14  ;;  %v8611_v35 = vand.u32 4294901760, %v7824_v25  ;;  %v4126_v25 = vsub.f32 %v8097_v40, %v8475_v59 }
 0x233   :  { %4092 = vmatpush.msra.mxu3 %v4091_v46  ;;  %v8137_v46 = vand.u32 4294901760, %v4565_v41  ;;  %4039 = vmatpush.msra.mxu2 %v7995_v8 }
 0x234   :  { %3953 = vmatpush.msra.mxu0 %v8610_v19  ;;  %3998 = vmatpush.msra.mxu1 %v7722_v42  ;;  %v8151_v42 = vsub.f32 %v3652_v39, %v8121_v12  ;;  %v8153_v19 = vand.u32 4294901760, %v4564_v62  ;;  %v4132_v47 = vsub.f32 %v8111_v14, %v8476_v13  ;;  %v8614_v13 = vand.u32 4294901760, %v7879_v44 }
 0x235   :  { %4098 = vmatpush.msra.mxu3 %v4097_v26  ;;  %v4563_v26 = vld [vmem:[%s8339_s2 + $0x580] sm:$0xff]  ;;  %4041 = vmatpush.msra.mxu2 %v8013_v57  ;;  %v8167_v39 = vsub.f32 %v4565_v41, %v8137_v46  ;;  %s4630_s2 = smov [#allocation5]  }
 0x236   :  { %3957 = vmatpush.msra.mxu0 %v8611_v35  ;;  %4000 = vmatpush.msra.mxu1 %v7735_v51  ;;  %v8612_v51 = vand.u32 4294901760, %v7839_v21  ;;  %v4143_v35 = vand.u32 4294901760, %v8145_v27  ;;  %v8174_v59 = vand.u32 4294901760, %v4563_v26  ;;  %v8613_v21 = vand.u32 4294901760, %v7864_v36  ;;  %s4375_s9 = sshll.u32 %s4630_s2, 4  ;;  %s4376_s9 = int_to_ptr.vmem [resolvable:$true] %s4375_s9 }
 0x237   :  { %4104 = vmatpush.msra.mxu3 %v4103_v53  ;;  %4043 = vmatpush.msra.mxu2 %v8029_v11  ;;  %v4121_v53 = vand.u32 4294901760, %v4120_v29  ;;  %v8181_v41 = vsub.f32 %v4564_v62, %v8153_v19  ;;  %v4138_v29 = vsub.f32 %v8129_v1, %v4137_v34  ;;  %v4133_v36 = vand.u32 4294901760, %v4132_v47 }
 0x238   :  { %3961 = vmatpush.msra.mxu0 %v8612_v51  ;;  %4002 = vmatpush.msra.mxu1 %v7749_v43  ;;  %v3721_v43 = vand.u32 4294901760, %v8151_v42  ;;  %v3653_v51 = vld [vmem:[%s8077_s28 + $0x8] sm:$0xff]  ;;  %v4144_v62 = vsub.f32 %v8145_v27, %v4143_v35  ;;  %v8616_v47 = vand.u32 4294901760, %v7914_v56 }
 0x239   :  { %4110 = vmatpush.msra.mxu3 %v4109_v32  ;;  %4045 = vmatpush.msra.mxu2 %v8045_v17  ;;  %v4127_v32 = vand.u32 4294901760, %v4126_v25  ;;  %v8615_v25 = vand.u32 4294901760, %v7897_v28  ;;  %v4155_v44 = vand.u32 4294901760, %v8181_v41 }
 0x23a   :  { %3965 = vmatpush.msra.mxu0 %v8613_v21  ;;  %4004 = vmatpush.msra.mxu1 %v7766_v52  ;;  %v4149_v52 = vand.u32 4294901760, %v8167_v39  ;;  %v8617_v21 = vand.u32 4294901760, %v7927_v31 }
 0x23b   :  { %4116 = vmatpush.msra.mxu3 %v4115_v0  ;;  %4047 = vmatpush.msra.mxu2 %v8062_v37  ;;  %v8197_v0 = vsub.f32 %v4563_v26, %v8174_v59 }
 0x23c   :  { %3969 = vmatpush.msra.mxu0 %v8614_v13  ;;  %4006 = vmatpush.msra.mxu1 %v7782_v4  ;;  %v3722_v4 = vsub.f32 %v8151_v42, %v3721_v43  ;;  %v8204_v13 = vand.u32 4294901760, %v3653_v51  ;;  %v4150_v28 = vsub.f32 %v8167_v39, %v4149_v52 }
 0x23d   :  { %4122 = vmatpush.msra.mxu3 %v4121_v53  ;;  %4049 = vmatpush.msra.mxu2 %v8083_v18  ;;  %v4139_v53 = vand.u32 4294901760, %v4138_v29  ;;  %v4161_v26 = vand.u32 4294901760, %v8197_v0  ;;  %v8618_v29 = vand.u32 4294901760, %v7945_v23  ;;  %v8619_v23 = vand.u32 4294901760, %v7937_v33 }
 0x23e   :  { %3973 = vmatpush.msra.mxu0 %v8615_v25  ;;  %4008 = vmatpush.msra.mxu1 %v7793_v58  ;;  %v4145_v58 = vand.u32 4294901760, %v4144_v62  ;;  %v8222_v56 = vsub.f32 %v3653_v51, %v8204_v13  ;;  %v4151_v31 = vand.u32 4294901760, %v4150_v28 }
 0x23f   :  { %4128 = vmatpush.msra.mxu3 %v4127_v32  ;;  %4051 = vmatpush.msra.mxu2 %v8099_v2  ;;  %v3723_v32 = vand.u32 4294901760, %v3722_v4 }
 0x240   :  { %3977 = vmatpush.msra.mxu0 %v8616_v47  ;;  %4010 = vmatpush.msra.mxu1 %v7806_v30  ;;  %v4156_v30 = vsub.f32 %v8181_v41, %v4155_v44 }
 0x241   :  { %4134 = vmatpush.msra.mxu3 %v4133_v36  ;;  %4053 = vmatpush.msra.mxu2 %v8113_v54  ;;  %v4062_v36 = vand.u32 4294901760, %v8222_v56 }
 0x242   :  { %3981 = vmatpush.msra.mxu0 %v8617_v21  ;;  %4012 = vmatpush.msra.mxu1 %v7833_v63  ;;  %v4162_v63 = vsub.f32 %v8197_v0, %v4161_v26  ;;  %v4157_v51 = vand.u32 4294901760, %v4156_v30 }
 0x243   :  { %4140 = vmatpush.msra.mxu3 %v4139_v53  ;;  %4055 = vmatpush.msra.mxu2 %v8137_v46 }
 0x244   :  { %3985 = vmatpush.msra.mxu0 %v8618_v29  ;;  %4014 = vmatpush.msra.mxu1 %v7848_v20  ;;  %v4163_v20 = vand.u32 4294901760, %v4162_v63 }
 0x245   :  { %4146 = vmatpush.msra.mxu3 %v4145_v58  ;;  %3724 = vmatmul.f32.vlgmr.msrb.gmra.mxu0 %v3723_v32 }
 0x246   :  { %4016 = vmatpush.msra.mxu1 %v7861_v55  ;;  %4172 = vmatpush.msrb.mxu0 %v7937_v33  ;;  %v4063_v55 = vsub.f32 %v8222_v56, %v4062_v36  ;;  %v8621_v33 = vand.u32 4294901760, %v7978_v6 }
 0x247   :  { %4057 = vmatpush.msra.mxu2 %v8153_v19  ;;  %4152 = vmatpush.msra.mxu3 %v4151_v31 }
 0x248   :  { %3879 = vmatmul.f32.vlgmr.msrb.gmra.mxu2 %v8151_v42  ;;  %4175 = vmatpush.msrb.mxu0 %v7962_v24  ;;  %v4064_v42 = vand.u32 4294901760, %v4063_v55 }
 0x249   :  { %4018 = vmatpush.msra.mxu1 %v7876_v5  ;;  %4059 = vmatpush.msra.mxu2 %v8174_v59  ;;  %v8620_v5 = vand.u32 4294901760, %v7962_v24  ;;  %v8622_v24 = vand.u32 4294901760, %v7985_v3 }
 0x24a   :  { %4158 = vmatpush.msra.mxu3 %v4157_v51  ;;  %4178 = vmatpush.msrb.mxu0 %v7978_v6  ;;  %v8623_v6 = vand.u32 4294901760, %v8003_v61 }
 0x24b   :  { %3918 = vmatmul.f32.vlgmr.msrb.gmra.mxu3 %v3721_v43  ;;  %4266 = vmatpush.msrb.mxu2 %v8619_v23 }
 0x24c   :  { %4020 = vmatpush.msra.mxu1 %v7893_v16  ;;  %4164 = vmatpush.msra.mxu3 %v4163_v20  ;;  %v8624_v16 = vand.u32 4294901760, %v8027_v15 }
 0x24d   :  { %4181 = vmatpush.msrb.mxu0 %v7985_v3  ;;  %4270 = vmatpush.msrb.mxu2 %v8620_v5 }
 0x24e   :  { %4333 = vmatpush.msrb.mxu3 %v7904_v22  ;;  %4022 = vmatpush.msra.mxu1 %v7910_v45  ;;  %v8627_v45 = vand.u32 4294901760, %v8097_v40 }
 0x24f   :  { %4184 = vmatpush.msrb.mxu0 %v8003_v61  ;;  %4274 = vmatpush.msrb.mxu2 %v8621_v33  ;;  %v8625_v61 = vand.u32 4294901760, %v8043_v48 }
 0x250   :  { %4225 = vmatpush.msrb.mxu1 %v7904_v22  ;;  %4335 = vmatpush.msrb.mxu3 %v7929_v9  ;;  %v8626_v22 = vand.u32 4294901760, %v8060_v7 }
 0x251   :  { %4065 = vmatmul.f32.vlgmr.msra.gmra.mxu2 %v4064_v42  ;;  %4187 = vmatpush.msrb.mxu0 %v8027_v15 }
 0x252   :  { %4227 = vmatpush.msrb.mxu1 %v7929_v9  ;;  %4278 = vmatpush.msrb.mxu2 %v8622_v24  ;;  %v8628_v9 = vand.u32 4294901760, %v8111_v14 }
 0x253   :  { %4337 = vmatpush.msrb.mxu3 %v7947_v49  ;;  %3987 = vmatmul.f32.vlgmr.msra.gmra.mxu0 %v8121_v12 }
 0x254   :  { %4166 = vmatmul.f32.vlgmr.msra.gmra.mxu3 %v8204_v13  ;;  %4190 = vmatpush.msrb.mxu0 %v8043_v48 }
 0x255   :  { %4229 = vmatpush.msrb.mxu1 %v7947_v49  ;;  %4282 = vmatpush.msrb.mxu2 %v8623_v6  ;;  %v3102_v49 = vpop.f32.mrf.mxu1 }
 0x256   :  { %4339 = vmatpush.msrb.mxu3 %v7954_v38  ;;  %4024 = vmatmul.f32.vlgmr.msra.gmra.mxu1 %v8121_v12 }
 0x257   :  { %4193 = vmatpush.msrb.mxu0 %v8060_v7  ;;  %4231 = vmatpush.msrb.mxu1 %v7954_v38 }
 0x258   :  { %4286 = vmatpush.msrb.mxu2 %v8624_v16  ;;  %4341 = vmatpush.msrb.mxu3 %v7967_v60 }
 0x259   :  { %4196 = vmatpush.msrb.mxu0 %v8081_v50  ;;  %4233 = vmatpush.msrb.mxu1 %v7967_v60 }
 0x25a   :  { %4290 = vmatpush.msrb.mxu2 %v8625_v61  ;;  %4343 = vmatpush.msrb.mxu3 %v7995_v8 }
 0x25b   :  { %4199 = vmatpush.msrb.mxu0 %v8097_v40  ;;  %4235 = vmatpush.msrb.mxu1 %v7995_v8 }
 0x25c   :  { %4294 = vmatpush.msrb.mxu2 %v8626_v22  ;;  %4345 = vmatpush.msrb.mxu3 %v8013_v57  ;;  %v3001_v38 = vpop.f32.mrf.mxu0 }
 0x25d   :  { %4202 = vmatpush.msrb.mxu0 %v8111_v14  ;;  %4237 = vmatpush.msrb.mxu1 %v8013_v57  ;;  %v3103_v57 = vadd.f32 %v3102_v49, %v3001_v38 }
 0x25e   :  { %4298 = vmatpush.msrb.mxu2 %v4119_v10  ;;  %4347 = vmatpush.msrb.mxu3 %v8029_v11 }
 0x25f   :  { %4205 = vmatpush.msrb.mxu0 %v8129_v1  ;;  %4239 = vmatpush.msrb.mxu1 %v8029_v11 }
 0x260   :  { %4302 = vmatpush.msrb.mxu2 %v8627_v45  ;;  %4349 = vmatpush.msrb.mxu3 %v8045_v17 }
 0x261   :  { %4208 = vmatpush.msrb.mxu0 %v8145_v27  ;;  %4241 = vmatpush.msrb.mxu1 %v8045_v17 }
 0x262   :  { %4306 = vmatpush.msrb.mxu2 %v8628_v9  ;;  %4351 = vmatpush.msrb.mxu3 %v8062_v37 }
 0x263   :  { %4211 = vmatpush.msrb.mxu0 %v8167_v39  ;;  %4243 = vmatpush.msrb.mxu1 %v8062_v37 }
 0x264   :  { %4310 = vmatpush.msrb.mxu2 %v4137_v34  ;;  %4353 = vmatpush.msrb.mxu3 %v8083_v18 }
 0x265   :  { %4214 = vmatpush.msrb.mxu0 %v8181_v41  ;;  %4245 = vmatpush.msrb.mxu1 %v8083_v18  ;;  %v3156_v60 = vpop.f32.mrf.mxu2 }
 0x266   :  { %4314 = vmatpush.msrb.mxu2 %v4143_v35  ;;  %4355 = vmatpush.msrb.mxu3 %v8099_v2  ;;  %v3157_v3 = vadd.f32 %v3156_v60, %v3103_v57 }
 0x267   :  { %4217 = vmatpush.msrb.mxu0 %v8197_v0  ;;  %4247 = vmatpush.msrb.mxu1 %v8099_v2 }
 0x268   :  { %4318 = vmatpush.msrb.mxu2 %v4149_v52  ;;  %4357 = vmatpush.msrb.mxu3 %v8113_v54  ;;  %v3195_v8 = vpop.f32.mrf.mxu3 }
 0x269   :  { %4220 = vmatmul.f32.vlgmr.msrb.gmra.mxu0 %v8222_v56  ;;  %4249 = vmatpush.msrb.mxu1 %v8113_v54  ;;  %v3196_v10 = vadd.f32 %v3195_v8, %v3157_v3 }
 0x26a   :  { %4322 = vmatpush.msrb.mxu2 %v4155_v44  ;;  %4359 = vmatpush.msrb.mxu3 %v8137_v46  ;;  %v3264_v54 = vpop.f32.mrf.mxu0 }
 0x26b   :  { %4251 = vmatpush.msrb.mxu1 %v8137_v46  ;;  %v3265_v15 = vadd.f32 %v3264_v54, %v3196_v10 }
 0x26c   :  { %4326 = vmatpush.msrb.mxu2 %v4161_v26  ;;  %4361 = vmatpush.msrb.mxu3 %v8153_v19 }
 0x26d   :  { %4328 = vmatmul.f32.vlgmr.msrb.gmra.mxu2 %v8204_v13  ;;  %4253 = vmatpush.msrb.mxu1 %v8153_v19  ;;  %v3301_v11 = vpop.f32.mrf.mxu1 }
 0x26e   :  { %4363 = vmatpush.msrb.mxu3 %v8174_v59  ;;  %v3302_v48 = vadd.f32 %v3301_v11, %v3265_v15  ;;  %v3342_v17 = vpop.f32.mrf.mxu2 }
 0x26f   :  { %4365 = vmatmul.f32.vlgmr.msrb.gmra.mxu3 %v8204_v13  ;;  %4255 = vmatpush.msrb.mxu1 %v8174_v59 }
 0x270   :  { %4259 = vmatmul.f32.vlgmr.msrb.gmra.mxu1 %v4062_v36  ;;  %v3343_v7 = vadd.f32 %v3342_v17, %v3302_v48 }
 0x271   :  { %v3443_v37 = vpop.f32.mrf.mxu3 }
 0x272   :  { %v3444_v50 = vadd.f32 %v3443_v37, %v3343_v7 }
 0x280   :  { %v3497_v1 = vpop.f32.mrf.mxu0 }
 0x281   :  { %v3498_v18 = vadd.f32 %v3497_v1, %v3444_v50 }
 0x28a   :  { %v3536_v27 = vpop.f32.mrf.mxu1  ;;  %v3605_v40 = vpop.f32.mrf.mxu2 }
 0x28b   :  { %v3537_v2 = vadd.f32 %v3536_v27, %v3498_v18 }
 0x28d   :  { %v3606_v14 = vadd.f32 %v3605_v40, %v3537_v2  ;;  %v3642_v12 = vpop.f32.mrf.mxu3 }
 0x28f   :  { %v3643_v59 = vadd.f32 %v3642_v12, %v3606_v14 }
 0x291   :  { %3646 = vst.msk [vmem:[#allocation5 + $0x20] sm:$0xff] %vm749_vm0, %v3643_v59 }
 0x2ae   :  { %v3826_v46 = vpop.f32.mrf.mxu1 }
 0x2c2   :  { %v3725_v19 = vpop.f32.mrf.mxu0 }
 0x2c3   :  { %v3827_v34 = vadd.f32 %v3826_v46, %v3725_v19 }
 0x2cb   :  { %v3880_v39 = vpop.f32.mrf.mxu2 }
 0x2cc   :  { %v3881_v35 = vadd.f32 %v3880_v39, %v3827_v34 }
 0x2ce   :  { %v3919_v43 = vpop.f32.mrf.mxu3 }
 0x2cf   :  { %v3920_v41 = vadd.f32 %v3919_v43, %v3881_v35 }
 0x2d0   :  { %v3988_v52 = vpop.f32.mrf.mxu0 }
 0x2d1   :  { %v3989_v62 = vadd.f32 %v3988_v52, %v3920_v41 }
 0x2d3   :  { %v4025_v0 = vpop.f32.mrf.mxu1 }
 0x2d4   :  { %v4026_v25 = vadd.f32 %v4025_v0, %v3989_v62  ;;  %v4066_v4 = vpop.f32.mrf.mxu2 }
 0x2d6   :  { %v4067_v44 = vadd.f32 %v4066_v4, %v4026_v25 }
 0x2d7   :  { %v4167_v13 = vpop.f32.mrf.mxu3 }
 0x2d8   :  { %v4168_v47 = vadd.f32 %v4167_v13, %v4067_v44 }
 0x2e6   :  { %v4221_v53 = vpop.f32.mrf.mxu0 }
 0x2e7   :  { %v4222_v28 = vadd.f32 %v4221_v53, %v4168_v47 }
 0x2ed   :  { %v4260_v58 = vpop.f32.mrf.mxu1 }
 0x2ee   :  { %v4261_v26 = vadd.f32 %v4260_v58, %v4222_v28 }
 0x2f0   :  { %v4329_v21 = vpop.f32.mrf.mxu2 }
 0x2f1   :  { %v4330_v32 = vadd.f32 %v4329_v21, %v4261_v26 }
 0x2f2   :  { %v4366_v30 = vpop.f32.mrf.mxu3 }
 0x2f3   :  { %v4367_v56 = vadd.f32 %v4366_v30, %v4330_v32 }
 0x2f5   :  { %4370 = vst.msk [vmem:[#allocation5 + $0x28] sm:$0xff] %vm749_vm0, %v4367_v56 }
 0x2f6   :  { %4383 = dma.vmem_to_hbm [thread:$0]  %s4376_s9, 768, %s4378_s12, [#allocation3], %s4631_s13, %s4631_s13, %s4632_s14  }
 0x2f7   :  { %4627 = dma.done.wait [#allocation3], 768  }
 0x2f8   :  { %4628 = vsyncadd [#allocation3], 4294966528 }
 0x2f9   :  { %4388 = vsyncpa [#allocation3], 1 }
 0x2fa   :  { %4389 = vsyncpa [#allocation4], 1 }

</bundles_post_ra>
